<compile_context>
chip_gen: v5e
topology: v5e:2x2
jax: 0.10.0
libtpu: 0.0.40
codegen_flags: <defaults>
</compile_context>

<pallas_src>
import functools
import math

import jax
import jax.numpy as jnp
from jax.experimental import pallas as pl
from jax.experimental.pallas import tpu as pltpu


# ----------------------------- in-kernel math helpers -----------------------------

def _erf(x):
    # Abramowitz & Stegun 7.1.26 rational approximation (max abs err ~1.5e-7).
    # The 1/(1+p|x|) divide goes to the EUP via approximate reciprocal (free bundle slot).
    a1, a2, a3, a4, a5 = 0.254829592, -0.284496736, 1.421413741, -1.453152027, 1.061405429
    p = 0.3275911
    ax = jnp.abs(x)
    t = pl.reciprocal(1.0 + p * ax, approx=True)
    poly = ((((a5 * t + a4) * t + a3) * t + a2) * t + a1) * t
    y = 1.0 - poly * jnp.exp(-ax * ax)
    return jnp.where(x >= 0, y, -y)


def _gelu_exact(x):
    return 0.5 * x * (1.0 + _erf(x * (1.0 / math.sqrt(2.0))))


# ----------------------------- kernel 1: norm + MHSA + layer_scale_1 + residual -----------------------------

def mhsa_block_kernel(x_ref, wqkv_ref, bqkv_ref, wproj_ref, bproj_ref, o_ref,
                      *, num_heads, head_dim):
    # x_ref: (1, N, C) tokens for one batch element.
    # wqkv already has BN1 affine + softmax scale folded in; wproj/bproj have layer_scale_1 folded in.
    x = x_ref[0]                                            # (N, C) f32
    N, C = x.shape
    bf16 = jnp.bfloat16

    # qkv = norm(x) @ Wqkv   (BN affine folded host-side -> single bf16 matmul + f32 bias)
    qkv = jnp.dot(x.astype(bf16), wqkv_ref[...],
                  preferred_element_type=jnp.float32) + bqkv_ref[...]     # (N, 3C) f32

    wproj = wproj_ref[...]                                  # (C, C) bf16, ls1 folded in
    acc = jnp.zeros((N, C), jnp.float32)

    for h in range(num_heads):  # static unrolled loop over heads
        lo, hi = h * head_dim, (h + 1) * head_dim
        q = qkv[:, lo:hi]                                   # (N, hd) f32 (scale already folded)
        k = qkv[:, C + lo:C + hi]
        v = qkv[:, 2 * C + lo:2 * C + hi]

        # s = q @ k^T  on the MXU in bf16, f32 accumulate
        s = jax.lax.dot_general(q.astype(bf16), k.astype(bf16), (((1,), (1,)), ((), ())),
                                preferred_element_type=jnp.float32)       # (N, N) f32
        # softmax with deferred normalization (max/exp/sum in f32)
        m = jnp.max(s, axis=-1, keepdims=True)
        p = jnp.exp(s - m)
        r = jnp.sum(p, axis=-1, keepdims=True)              # (N, 1)
        o_h = jnp.dot(p.astype(bf16), v.astype(bf16),
                      preferred_element_type=jnp.float32)   # (N, hd) = exp(s-m) @ v
        o_h = o_h * pl.reciprocal(r, approx=True)           # normalize on the EUP
        # accumulate this head's projection contribution (no concat over heads)
        acc = acc + jnp.dot(o_h.astype(bf16), wproj[lo:hi, :],
                            preferred_element_type=jnp.float32)           # (N, C)

    # x + layer_scale_1 * (token_mixer(norm(x)))   -- ls1 already folded into wproj/bproj
    o_ref[0] = (x + acc + bproj_ref[...]).astype(o_ref.dtype)


def _compiler_params(est_block_bytes):
    # Scoped-VMEM default is 16 MiB (v5e) / 32 MiB (v6e, v7x).  Raise it from the per-step
    # footprint with headroom, but stay well under the smallest physical VMEM (64 MiB/TC on v7x).
    limit = int(min(48 << 20, max(32 << 20, 2 * est_block_bytes)))
    return pltpu.CompilerParams(dimension_semantics=("parallel",),
                                vmem_limit_bytes=limit)


def mhsa_residual(x_tok, fp, *, num_heads, head_dim):
    B, N, C = x_tok.shape
    kernel = functools.partial(mhsa_block_kernel, num_heads=num_heads, head_dim=head_dim)

    est = (4 * N * C * 4                      # x in + out blocks (double buffered)
           + 3 * N * C * 4                    # qkv activations
           + 2 * N * N * 4                    # scores + probs for one head
           + sum(int(v.size) * v.dtype.itemsize for v in (fp["wqkv"], fp["wproj"])))

    return pl.pallas_call(
        kernel,
        out_shape=jax.ShapeDtypeStruct((B, N, C), x_tok.dtype),
        grid=(B,),
        in_specs=[
            pl.BlockSpec((1, N, C), lambda b: (b, 0, 0)),     # tokens
            pl.BlockSpec((C, 3 * C), lambda b: (0, 0)),       # wqkv (bf16, BN1+scale folded)
            pl.BlockSpec((1, 3 * C), lambda b: (0, 0)),       # bqkv (f32, from BN1 shift)
            pl.BlockSpec((C, C), lambda b: (0, 0)),           # wproj (bf16, ls1 folded)
            pl.BlockSpec((1, C), lambda b: (0, 0)),           # bproj (f32, ls1 folded)
        ],
        out_specs=pl.BlockSpec((1, N, C), lambda b: (b, 0, 0)),
        compiler_params=_compiler_params(est),
    )(x_tok, fp["wqkv"], fp["bqkv"], fp["wproj"], fp["bproj"])


# ----------------------------- kernel 2: ConvFFN + layer_scale_2 + residual -----------------------------

def convffn_block_kernel(xpad_ref, wdw_ref, w1_ref, b1_ref, w2_ref, b2_ref, o_ref,
                         *, H, W, ks):
    # xpad_ref: (1, H+ks-1, W+ks-1, C) zero-padded input for one batch element.
    # wdw already has BN2 scale folded; b1 has BN2 shift folded; w2/b2 have layer_scale_2 folded.
    C = o_ref.shape[-1]
    pad = (ks - 1) // 2
    bf16 = jnp.bfloat16

    wdw = wdw_ref[...]                                       # (ks*ks, C) f32, loaded once

    # depthwise ks x ks conv (groups=C, no bias): 4 independent partial accumulators for VALU ILP
    n_acc = 4
    accs = [jnp.zeros((H, W, C), jnp.float32) for _ in range(n_acc)]
    idx = 0
    for dy in range(ks):
        for dx in range(ks):
            patch = xpad_ref[0, dy:dy + H, dx:dx + W, :]     # (H, W, C)
            accs[idx % n_acc] = accs[idx % n_acc] + patch * wdw[idx:idx + 1, :]
            idx += 1
    y = (accs[0] + accs[1]) + (accs[2] + accs[3])            # dw-conv output, BN2 scale already in taps

    # fc1 (1x1 conv) -> exact GELU -> fc2 (1x1 conv), bf16 MXU with f32 accumulation
    y2d = y.reshape(H * W, C)
    h1 = jnp.dot(y2d.astype(bf16), w1_ref[...],
                 preferred_element_type=jnp.float32) + b1_ref[...]        # (HW, hidden)
    h1 = _gelu_exact(h1)
    h2 = jnp.dot(h1.astype(bf16), w2_ref[...],
                 preferred_element_type=jnp.float32) + b2_ref[...]        # (HW, C), ls2 folded
    ffn = h2.reshape(H, W, C)

    x_res = xpad_ref[0, pad:pad + H, pad:pad + W, :]         # the un-padded input (residual)
    # x + layer_scale_2 * convffn(x)   -- ls2 already folded into w2/b2
    o_ref[0] = (x_res + ffn).astype(o_ref.dtype)


def convffn_residual(x_pad, fp, *, H, W, ks=7):
    B, Hp, Wp, C = x_pad.shape
    hidden = fp["w1"].shape[1]
    kernel = functools.partial(convffn_block_kernel, H=H, W=W, ks=ks)
    # TODO(synk): for large H*W on v7x, add a grid dim over row strips (halo via element-offset
    # index_map) so the padded image + (HW, hidden) activation never exceed 64 MiB VMEM.

    est = (2 * Hp * Wp * C * 4                 # padded input block (double buffered)
           + 2 * H * W * C * 4                 # output block (double buffered)
           + 5 * H * W * C * 4                 # dw-conv partial accumulators + residual temp
           + 2 * H * W * hidden * 4            # fc1 activations + GELU temporaries
           + sum(int(v.size) * v.dtype.itemsize for v in (fp["w1"], fp["w2"], fp["wdw"])))

    return pl.pallas_call(
        kernel,
        out_shape=jax.ShapeDtypeStruct((B, H, W, C), x_pad.dtype),
        grid=(B,),
        in_specs=[
            pl.BlockSpec((1, Hp, Wp, C), lambda b: (b, 0, 0, 0)),   # padded input
            pl.BlockSpec((ks * ks, C), lambda b: (0, 0)),           # depthwise taps (BN2 scale folded)
            pl.BlockSpec((C, hidden), lambda b: (0, 0)),            # fc1 weight (bf16)
            pl.BlockSpec((1, hidden), lambda b: (0, 0)),            # fc1 bias (BN2 shift folded)
            pl.BlockSpec((hidden, C), lambda b: (0, 0)),            # fc2 weight (bf16, ls2 folded)
            pl.BlockSpec((1, C), lambda b: (0, 0)),                 # fc2 bias (ls2 folded)
        ],
        out_specs=pl.BlockSpec((1, H, W, C), lambda b: (b, 0, 0, 0)),
        compiler_params=_compiler_params(est),
    )(x_pad, fp["wdw"], fp["w1"], fp["b1"], fp["w2"], fp["b2"])


# ----------------------------- parameter init (deterministic, synthetic) + host-side folding -----------------------------

def init_params(key, dim, *, mlp_ratio=4.0, ls_init=1e-5, bn_eps=1e-5, ks=7):
    """Raw parameters matching a fresh AttentionBlock(dim) in .eval()."""
    hidden = int(dim * mlp_ratio)
    keys = jax.random.split(key, 6)

    def tn(k, shape, std=0.02):
        return std * jax.random.truncated_normal(k, -2.0, 2.0, shape, jnp.float32)

    def bn_affine(gamma, beta, mean, var):
        scale = gamma / jnp.sqrt(var + bn_eps)
        shift = beta - mean * scale
        return scale, shift

    # BatchNorm2d default init + fresh running stats (mean=0, var=1) -> inference affine
    bn1_scale, bn1_shift = bn_affine(jnp.ones((dim,)), jnp.zeros((dim,)),
                                     jnp.zeros((dim,)), jnp.ones((dim,)))
    bn2_scale, bn2_shift = bn_affine(jnp.ones((dim,)), jnp.zeros((dim,)),
                                     jnp.zeros((dim,)), jnp.ones((dim,)))

    # MHSA: qkv Linear(dim, 3*dim, bias=False), proj Linear(dim, dim)
    wqkv = tn(keys[0], (3 * dim, dim)).T                   # (dim, 3*dim); y = x @ W^T
    wproj = tn(keys[1], (dim, dim)).T                      # (dim, dim)
    bproj = tn(keys[2], (dim,))

    # ConvFFN: depthwise 7x7 (groups=dim, no bias), fc1 1x1, fc2 1x1 (biases init 0 per _init_weights)
    wdw = tn(keys[3], (dim, ks, ks))                       # torch weight (dim, 1, 7, 7) squeezed
    wdw = jnp.transpose(wdw, (1, 2, 0)).reshape(ks * ks, dim)   # (ky*ks+kx, C)
    w1 = tn(keys[4], (hidden, dim)).T                      # (dim, hidden)
    b1 = jnp.zeros((hidden,), jnp.float32)
    w2 = tn(keys[5], (dim, hidden)).T                      # (hidden, dim)
    b2 = jnp.zeros((dim,), jnp.float32)

    ls1 = ls_init * jnp.ones((dim,), jnp.float32)
    ls2 = ls_init * jnp.ones((dim,), jnp.float32)

    return dict(bn1_scale=bn1_scale, bn1_shift=bn1_shift, wqkv=wqkv, wproj=wproj,
                bproj=bproj, ls1=ls1, wdw=wdw, bn2_scale=bn2_scale, bn2_shift=bn2_shift,
                w1=w1, b1=b1, w2=w2, b2=b2, ls2=ls2)


def fold_params(p, *, head_dim=32):
    """Host-side constant folding (zero runtime cost) + bf16 weight casts for the MXU:
       BN1 affine + softmax scale -> wqkv/bqkv;  ls1 -> wproj/bproj;
       BN2 scale -> depthwise taps; BN2 shift -> fc1 bias;  ls2 -> w2/b2."""
    dim = p["wproj"].shape[0]
    scale = head_dim ** (-0.5)

    # norm(x) @ Wqkv == x @ (diag(s) Wqkv) + shift @ Wqkv ; softmax scale onto the Q columns
    wqkv = p["bn1_scale"][:, None] * p["wqkv"]                 # (dim, 3*dim)
    bqkv = p["bn1_shift"] @ p["wqkv"]                          # (3*dim,)
    qcol = jnp.concatenate([jnp.full((dim,), scale, jnp.float32),
                            jnp.ones((2 * dim,), jnp.float32)])
    wqkv = wqkv * qcol[None, :]
    bqkv = bqkv * qcol

    wproj = p["wproj"] * p["ls1"][None, :]                     # ls1 * (h @ Wp + bp)
    bproj = p["bproj"] * p["ls1"]

    wdw = p["wdw"] * p["bn2_scale"][None, :]                   # BN2 scale into dw taps
    b1 = p["b1"] + p["bn2_shift"] @ p["w1"]                    # BN2 shift into fc1 bias
    w2 = p["w2"] * p["ls2"][None, :]                           # ls2 * (h1 @ W2 + b2)
    b2 = p["b2"] * p["ls2"]

    bf = jnp.bfloat16
    return dict(
        wqkv=wqkv.astype(bf), bqkv=bqkv.reshape(1, -1).astype(jnp.float32),
        wproj=wproj.astype(bf), bproj=bproj.reshape(1, -1).astype(jnp.float32),
        wdw=wdw.astype(jnp.float32),                           # stays f32 (VPU path)
        w1=p["w1"].astype(bf), b1=b1.reshape(1, -1).astype(jnp.float32),
        w2=w2.astype(bf), b2=b2.reshape(1, -1).astype(jnp.float32),
    )


# ----------------------------- full AttentionBlock forward -----------------------------

def attention_block(x_nchw, folded_params, *, head_dim=32, ks=7):
    B, C, H, W = x_nchw.shape
    assert C % head_dim == 0, "dim should be divisible by head_dim"
    num_heads = C // head_dim

    # NCHW -> channels-last tokens (B, N, C); torch's flatten(2).transpose(-2,-1): token n = h*W + w
    x_hwc = jnp.transpose(x_nchw, (0, 2, 3, 1))            # (B, H, W, C)
    x_tok = x_hwc.reshape(B, H * W, C)                     # (B, N, C)

    # x = x + layer_scale_1 * MHSA(norm(x))
    x_tok = mhsa_residual(x_tok, folded_params, num_heads=num_heads, head_dim=head_dim)
    x1 = x_tok.reshape(B, H, W, C)

    # x = x + layer_scale_2 * ConvFFN(x)
    pad = (ks - 1) // 2
    x1_pad = jnp.pad(x1, ((0, 0), (pad, pad), (pad, pad), (0, 0)))
    x2 = convffn_residual(x1_pad, folded_params, H=H, W=W, ks=ks)

    return jnp.transpose(x2, (0, 3, 1, 2))                 # back to NCHW


if __name__ == "__main__":
    key = jax.random.PRNGKey(0)
    kx, kp = jax.random.split(key)

    # small shapes consistent with the module: dim must be a multiple of head_dim (32)
    B, C, H, W = 2, 64, 16, 16
    x = jax.random.normal(kx, (B, C, H, W), jnp.float32)
    params = fold_params(init_params(kp, C, mlp_ratio=4.0), head_dim=32)

    out = attention_block(x, params, head_dim=32)
    out = jax.block_until_ready(out)
    assert out.shape == (B, C, H, W) and out.dtype == jnp.float32
    assert bool(jnp.all(jnp.isfinite(out)))
    print("KERNEL_OK")
</pallas_src>

<mosaic_0001>
module attributes {stable_mosaic.version = 11 : i64} {
  func.func @mhsa_block_kernel(%arg0: i32, %arg1: memref<1x256x64xf32, #tpu.memory_space<vmem>>, %arg2: memref<64x192xbf16, #tpu.memory_space<vmem>>, %arg3: memref<1x192xf32, #tpu.memory_space<vmem>>, %arg4: memref<64x64xbf16, #tpu.memory_space<vmem>>, %arg5: memref<1x64xf32, #tpu.memory_space<vmem>>, %arg6: memref<1x256x64xf32, #tpu.memory_space<vmem>>) attributes {dimension_semantics = [#tpu.dimension_semantics<parallel>], iteration_bounds = array<i64: 2>, scalar_prefetch = 0 : i64, scratch_operands = 0 : i64, tpu.core_type = #tpu.core_type<tc>, window_params = [{transform_indices = @transform_0, window_bounds = array<i64: 1, 256, 64>}, {pipeline_mode = #tpu.pipeline_mode<synchronous>, transform_indices = @transform_1, window_bounds = array<i64: 64, 192>}, {pipeline_mode = #tpu.pipeline_mode<synchronous>, transform_indices = @transform_2, window_bounds = array<i64: 1, 192>}, {pipeline_mode = #tpu.pipeline_mode<synchronous>, transform_indices = @transform_3, window_bounds = array<i64: 64, 64>}, {pipeline_mode = #tpu.pipeline_mode<synchronous>, transform_indices = @transform_4, window_bounds = array<i64: 1, 64>}, {transform_indices = @transform_5, window_bounds = array<i64: 1, 256, 64>}]} {
    %c0 = arith.constant 0 : index
    %c0_0 = arith.constant 0 : index
    %c0_1 = arith.constant 0 : index
    %0 = vector.load %arg1[%c0, %c0_0, %c0_1] : memref<1x256x64xf32, #tpu.memory_space<vmem>>, vector<1x256x64xf32>
    %1 = vector.shape_cast %0 : vector<1x256x64xf32> to vector<256x64xf32>
    %2 = arith.truncf %1 : vector<256x64xf32> to vector<256x64xbf16>
    %c0_2 = arith.constant 0 : index
    %c0_3 = arith.constant 0 : index
    %3 = vector.load %arg2[%c0_2, %c0_3] : memref<64x192xbf16, #tpu.memory_space<vmem>>, vector<64x192xbf16>
    %cst = arith.constant dense<0.000000e+00> : vector<256x192xf32>
    %4 = tpu.matmul %2, %3, %cst {dimension_numbers = #tpu.dot_dimension_numbers<[1], [0], [0], [1], [0, 0, 1, 1], [], []>} : vector<256x64xbf16>, vector<64x192xbf16>, vector<256x192xf32> -> vector<256x192xf32>
    %c0_4 = arith.constant 0 : index
    %c0_5 = arith.constant 0 : index
    %5 = vector.load %arg3[%c0_4, %c0_5] : memref<1x192xf32, #tpu.memory_space<vmem>>, vector<1x192xf32>
    %6 = vector.broadcast %5 : vector<1x192xf32> to vector<256x192xf32>
    %7 = arith.addf %4, %6 : vector<256x192xf32>
    %c0_6 = arith.constant 0 : index
    %c0_7 = arith.constant 0 : index
    %8 = vector.load %arg4[%c0_6, %c0_7] : memref<64x64xbf16, #tpu.memory_space<vmem>>, vector<64x64xbf16>
    %cst_8 = arith.constant 0.000000e+00 : f32
    %9 = vector.broadcast %cst_8 : f32 to vector<256x64xf32>
    %10 = vector.extract_strided_slice %7 {offsets = [0, 0], sizes = [256, 32], strides = [1, 1]} : vector<256x192xf32> to vector<256x32xf32>
    %11 = vector.extract_strided_slice %7 {offsets = [0, 64], sizes = [256, 32], strides = [1, 1]} : vector<256x192xf32> to vector<256x32xf32>
    %12 = vector.extract_strided_slice %7 {offsets = [0, 128], sizes = [256, 32], strides = [1, 1]} : vector<256x192xf32> to vector<256x32xf32>
    %13 = arith.truncf %10 : vector<256x32xf32> to vector<256x32xbf16>
    %14 = arith.truncf %11 : vector<256x32xf32> to vector<256x32xbf16>
    %cst_9 = arith.constant dense<0.000000e+00> : vector<256x256xf32>
    %15 = tpu.matmul %13, %14, %cst_9 {dimension_numbers = #tpu.dot_dimension_numbers<[1], [1], [0], [0], [0, 0, 1, 0], [], []>} : vector<256x32xbf16>, vector<256x32xbf16>, vector<256x256xf32> -> vector<256x256xf32>
    %cst_10 = arith.constant dense<0xFF800000> : vector<256xf32>
    %16 = vector.multi_reduction <maximumf>, %15, %cst_10 [1] : vector<256x256xf32> to vector<256xf32>
    %17 = vector.shape_cast %16 : vector<256xf32> to vector<256x1xf32>
    %18 = vector.broadcast %17 : vector<256x1xf32> to vector<256x256xf32>
    %19 = arith.subf %15, %18 : vector<256x256xf32>
    %20 = math.exp %19 : vector<256x256xf32>
    %cst_11 = arith.constant dense<0.000000e+00> : vector<256xf32>
    %21 = vector.multi_reduction <add>, %20, %cst_11 [1] : vector<256x256xf32> to vector<256xf32>
    %22 = vector.shape_cast %21 : vector<256xf32> to vector<256x1xf32>
    %23 = arith.truncf %20 : vector<256x256xf32> to vector<256x256xbf16>
    %24 = arith.truncf %12 : vector<256x32xf32> to vector<256x32xbf16>
    %cst_12 = arith.constant dense<0.000000e+00> : vector<256x32xf32>
    %25 = tpu.matmul %23, %24, %cst_12 {dimension_numbers = #tpu.dot_dimension_numbers<[1], [0], [0], [1], [0, 0, 1, 1], [], []>} : vector<256x256xbf16>, vector<256x32xbf16>, vector<256x32xf32> -> vector<256x32xf32>
    %26 = tpu.reciprocal %22 {approx = true} : vector<256x1xf32> -> vector<256x1xf32>
    %27 = vector.broadcast %26 : vector<256x1xf32> to vector<256x32xf32>
    %28 = arith.mulf %25, %27 : vector<256x32xf32>
    %29 = arith.truncf %28 : vector<256x32xf32> to vector<256x32xbf16>
    %30 = vector.extract_strided_slice %8 {offsets = [0, 0], sizes = [32, 64], strides = [1, 1]} : vector<64x64xbf16> to vector<32x64xbf16>
    %cst_13 = arith.constant dense<0.000000e+00> : vector<256x64xf32>
    %31 = tpu.matmul %29, %30, %cst_13 {dimension_numbers = #tpu.dot_dimension_numbers<[1], [0], [0], [1], [0, 0, 1, 1], [], []>} : vector<256x32xbf16>, vector<32x64xbf16>, vector<256x64xf32> -> vector<256x64xf32>
    %32 = arith.addf %9, %31 : vector<256x64xf32>
    %33 = vector.extract_strided_slice %7 {offsets = [0, 32], sizes = [256, 32], strides = [1, 1]} : vector<256x192xf32> to vector<256x32xf32>
    %34 = vector.extract_strided_slice %7 {offsets = [0, 96], sizes = [256, 32], strides = [1, 1]} : vector<256x192xf32> to vector<256x32xf32>
    %35 = vector.extract_strided_slice %7 {offsets = [0, 160], sizes = [256, 32], strides = [1, 1]} : vector<256x192xf32> to vector<256x32xf32>
    %36 = arith.truncf %33 : vector<256x32xf32> to vector<256x32xbf16>
    %37 = arith.truncf %34 : vector<256x32xf32> to vector<256x32xbf16>
    %cst_14 = arith.constant dense<0.000000e+00> : vector<256x256xf32>
    %38 = tpu.matmul %36, %37, %cst_14 {dimension_numbers = #tpu.dot_dimension_numbers<[1], [1], [0], [0], [0, 0, 1, 0], [], []>} : vector<256x32xbf16>, vector<256x32xbf16>, vector<256x256xf32> -> vector<256x256xf32>
    %cst_15 = arith.constant dense<0xFF800000> : vector<256xf32>
    %39 = vector.multi_reduction <maximumf>, %38, %cst_15 [1] : vector<256x256xf32> to vector<256xf32>
    %40 = vector.shape_cast %39 : vector<256xf32> to vector<256x1xf32>
    %41 = vector.broadcast %40 : vector<256x1xf32> to vector<256x256xf32>
    %42 = arith.subf %38, %41 : vector<256x256xf32>
    %43 = math.exp %42 : vector<256x256xf32>
    %cst_16 = arith.constant dense<0.000000e+00> : vector<256xf32>
    %44 = vector.multi_reduction <add>, %43, %cst_16 [1] : vector<256x256xf32> to vector<256xf32>
    %45 = vector.shape_cast %44 : vector<256xf32> to vector<256x1xf32>
    %46 = arith.truncf %43 : vector<256x256xf32> to vector<256x256xbf16>
    %47 = arith.truncf %35 : vector<256x32xf32> to vector<256x32xbf16>
    %cst_17 = arith.constant dense<0.000000e+00> : vector<256x32xf32>
    %48 = tpu.matmul %46, %47, %cst_17 {dimension_numbers = #tpu.dot_dimension_numbers<[1], [0], [0], [1], [0, 0, 1, 1], [], []>} : vector<256x256xbf16>, vector<256x32xbf16>, vector<256x32xf32> -> vector<256x32xf32>
    %49 = tpu.reciprocal %45 {approx = true} : vector<256x1xf32> -> vector<256x1xf32>
    %50 = vector.broadcast %49 : vector<256x1xf32> to vector<256x32xf32>
    %51 = arith.mulf %48, %50 : vector<256x32xf32>
    %52 = arith.truncf %51 : vector<256x32xf32> to vector<256x32xbf16>
    %53 = vector.extract_strided_slice %8 {offsets = [32, 0], sizes = [32, 64], strides = [1, 1]} : vector<64x64xbf16> to vector<32x64xbf16>
    %cst_18 = arith.constant dense<0.000000e+00> : vector<256x64xf32>
    %54 = tpu.matmul %52, %53, %cst_18 {dimension_numbers = #tpu.dot_dimension_numbers<[1], [0], [0], [1], [0, 0, 1, 1], [], []>} : vector<256x32xbf16>, vector<32x64xbf16>, vector<256x64xf32> -> vector<256x64xf32>
    %55 = arith.addf %32, %54 : vector<256x64xf32>
    %56 = arith.addf %1, %55 : vector<256x64xf32>
    %c0_19 = arith.constant 0 : index
    %c0_20 = arith.constant 0 : index
    %57 = vector.load %arg5[%c0_19, %c0_20] : memref<1x64xf32, #tpu.memory_space<vmem>>, vector<1x64xf32>
    %58 = vector.broadcast %57 : vector<1x64xf32> to vector<256x64xf32>
    %59 = arith.addf %56, %58 : vector<256x64xf32>
    %c0_21 = arith.constant 0 : index
    %c0_22 = arith.constant 0 : index
    %c0_23 = arith.constant 0 : index
    %60 = vector.load %arg6[%c0_21, %c0_22, %c0_23] : memref<1x256x64xf32, #tpu.memory_space<vmem>>, vector<1x256x64xf32>
    %61 = vector.shape_cast %60 : vector<1x256x64xf32> to vector<256x64xf32>
    %62 = vector.shape_cast %59 : vector<256x64xf32> to vector<1x256x64xf32>
    tpu.vector_store %arg6[%c0_21, %c0_22, %c0_23], %62 {strides = array<i32>} : memref<1x256x64xf32, #tpu.memory_space<vmem>>, vector<1x256x64xf32>,
    return
  }
  func.func @transform_0(%arg0: i32) -> (i32, i32, i32) {
    %c0_i32 = arith.constant 0 : i32
    %c0_i32_0 = arith.constant 0 : i32
    %c0_i32_1 = arith.constant 0 : i32
    return %arg0, %c0_i32, %c0_i32_0 : i32, i32, i32
  }
  func.func @transform_1(%arg0: i32) -> (i32, i32) {
    %c0_i32 = arith.constant 0 : i32
    %c0_i32_0 = arith.constant 0 : i32
    %c0_i32_1 = arith.constant 0 : i32
    return %c0_i32, %c0_i32_0 : i32, i32
  }
  func.func @transform_2(%arg0: i32) -> (i32, i32) {
    %c0_i32 = arith.constant 0 : i32
    %c0_i32_0 = arith.constant 0 : i32
    %c0_i32_1 = arith.constant 0 : i32
    return %c0_i32, %c0_i32_0 : i32, i32
  }
  func.func @transform_3(%arg0: i32) -> (i32, i32) {
    %c0_i32 = arith.constant 0 : i32
    %c0_i32_0 = arith.constant 0 : i32
    %c0_i32_1 = arith.constant 0 : i32
    return %c0_i32, %c0_i32_0 : i32, i32
  }
  func.func @transform_4(%arg0: i32) -> (i32, i32) {
    %c0_i32 = arith.constant 0 : i32
    %c0_i32_0 = arith.constant 0 : i32
    %c0_i32_1 = arith.constant 0 : i32
    return %c0_i32, %c0_i32_0 : i32, i32
  }
  func.func @transform_5(%arg0: i32) -> (i32, i32, i32) {
    %c0_i32 = arith.constant 0 : i32
    %c0_i32_0 = arith.constant 0 : i32
    %c0_i32_1 = arith.constant 0 : i32
    return %arg0, %c0_i32, %c0_i32_0 : i32, i32, i32
  }
}

</mosaic_0001>

<bundles_post_ra>
// kernel: tpu_custom_call.1
= control target key start
LH: loop header
LB: loop body
LE: loop exit
PB: predicated region body
PF: predicated region fallthrough
CT: control target
= control target key end

     0   :  { %s3795_s18 = smov 0   ;;  %s5786_s0 = inlined_call_operand.vmem [shape: f32[2,256,64], index: 0, kind: input, shape index: {}]   ;;  %s5787_s1 = inlined_call_operand.vmem [shape: bf16[64,192], index: 1, kind: input, shape index: {}]   ;;  %s5788_s2 = inlined_call_operand.vmem [shape: f32[1,192], index: 2, kind: input, shape index: {}]   ;;  %s5789_s3 = inlined_call_operand.vmem [shape: bf16[64,64], index: 3, kind: input, shape index: {}]   ;;  %s5790_s4 = inlined_call_operand.vmem [shape: f32[1,64], index: 4, kind: input, shape index: {}]   ;;  %s5791_s5 = inlined_call_operand.vmem [shape: f32[2,256,64], index: 5, kind: output, shape index: {}]  }
   0x1 LB: > { %s3121_s19 = sadd.s32 4294967295, %s3760_s18   ;;  %p3125_p0 = scmp.ge.s32.totalorder %s3760_s18, 1  ;;  %s3760_s18 = sphi %s3795_s18, %s15_s18  }
   0x2   : > { %p187_p1 = scmp.lt.s32.totalorder %s3760_s18, 3 }
   0x4   : > { %p188_p2 = pnand %p3125_p0, %p187_p1 }
   0x6   : > { %191 = sbr.rel (%p188_p2) target bundleno = 1791 (0x6ff), region = 40 }
   0xb   : > { %v3156_v0 = vld [vmem:[%s5787_s1 + $0x30] sm:$0xf]  ;;  %v3317_v1 = vld [vmem:[%s5787_s1 + $0x34] sm:$0xf0]  ;;  %v3148_v2 = vld [vmem:[%s5787_s1 + $0x20] sm:$0xf] }
   0xc   : > { %v3157_v3 = vor.u32 %v3317_v1, %v3156_v0  ;;  %v3315_v4 = vld [vmem:[%s5787_s1 + $0x24] sm:$0xf0]  ;;  %p215_p3 = scmp.lt.s32.totalorder %s3121_s19, 1  ;;  %v3140_v6 = vld [vmem:[%s5787_s1 + $0x10] sm:$0xf]  ;;  %vm328_vm0 = vcmask 523264  }
   0xd   : > { %v3149_v5 = vor.u32 %v3315_v4, %v3148_v2  ;;  %v3313_v7 = vld [vmem:[%s5787_s1 + $0x14] sm:$0xf0]  ;;  %v3132_v9 = vld [vmem:[%s5787_s1] sm:$0xf]  ;;  %v3311_v10 = vld [vmem:[%s5787_s1 + $0x4] sm:$0xf0] }
   0xe   : > { %381 = vmatpush.bf16.msra.mxu0 %v3157_v3  ;;  %s5949_s19 = smov (!%p215_p3, %s3121_s19), 1  ;;  %v3141_v8 = vor.u32 %v3313_v7, %v3140_v6  ;;  %v3133_v11 = vor.u32 %v3311_v10, %v3132_v9  ;;  %v3892_v40 = vld [vmem:[%s5788_s2] sm:$0x3]  ;;  %v3316_v41 = vld [vmem:[%s5787_s1 + $0x34] sm:$0xf]  ;;  %s3762_s11 = smov 64  }
   0xf   : > { %s3308_s7 = sshll.u32 %s5949_s19, 8  ;;  %v3158_v42 = vld [vmem:[%s5787_s1 + $0x38] sm:$0xf0]  ;;  %v3903_v43 = vperm.slane %v3892_v40, 0  ;;  %v3314_v46 = vld [vmem:[%s5787_s1 + $0x24] sm:$0xf] }
  0x10   : > { %s3835_s14 = scalar_lea.vmem %s5786_s0, %s3308_s7  ;;  %v3161_v44 = vor.u32 %v3316_v41, %v3158_v42  ;;  %v3150_v47 = vld [vmem:[%s5787_s1 + $0x28] sm:$0xf0]  ;;  %v3312_v54 = vld [vmem:[%s5787_s1 + $0x14] sm:$0xf]  ;;  %v3142_v55 = vld [vmem:[%s5787_s1 + $0x18] sm:$0xf0]  ;;  %s5574_s29 = scalar_lea.vmem %s5791_s5, %s3308_s7 }
  0x11   : > { %v226_v12 = vld [vmem:[%s3835_s14] sm:$0xff]  ;;  %v227_v13 = vld [vmem:[%s3835_s14 + $0x8] sm:$0xff]  ;;  %v228_v15 = vld [vmem:[%s3835_s14 + $0x10] sm:$0xff]  ;;  %v3153_v50 = vor.u32 %v3314_v46, %v3150_v47  ;;  %v3145_v56 = vor.u32 %v3312_v54, %v3142_v55  ;;  %vm627_vm1 = vcmask 261120   ;;  %s3763_s12 = smov 32   ;;  %s3764_s13 = smov 96  }
  0x12   : > { %382 = vmatpush.bf16.msra.mxu0 %v3149_v5  ;;  %v3839_v14 = vpack.c.bf16 %v227_v13, %v226_v12  ;;  %v229_v16 = vld [vmem:[%s3835_s14 + $0x18] sm:$0xff]  ;;  %v230_v18 = vld [vmem:[%s3835_s14 + $0x20] sm:$0xff]  ;;  %v231_v19 = vld [vmem:[%s3835_s14 + $0x28] sm:$0xff]  ;;  %470 = vmatpush.bf16.msra.mxu1 %v3161_v44 }
  0x13   : > { %v3845_v17 = vpack.c.bf16 %v229_v16, %v228_v15  ;;  %v3851_v20 = vpack.c.bf16 %v231_v19, %v230_v18  ;;  %v232_v21 = vld [vmem:[%s3835_s14 + $0x30] sm:$0xff]  ;;  %v233_v22 = vld [vmem:[%s3835_s14 + $0x38] sm:$0xff]  ;;  %v234_v24 = vld [vmem:[%s3835_s14 + $0x40] sm:$0xff] }
  0x14   : > { %v3857_v23 = vpack.c.bf16 %v233_v22, %v232_v21  ;;  %v235_v25 = vld [vmem:[%s3835_s14 + $0x48] sm:$0xff]  ;;  %v236_v27 = vld [vmem:[%s3835_s14 + $0x50] sm:$0xff]  ;;  %v237_v28 = vld [vmem:[%s3835_s14 + $0x58] sm:$0xff] }
  0x15   : > { %v3863_v26 = vpack.c.bf16 %v235_v25, %v234_v24  ;;  %v3869_v29 = vpack.c.bf16 %v237_v28, %v236_v27  ;;  %v238_v30 = vld [vmem:[%s3835_s14 + $0x60] sm:$0xff]  ;;  %v239_v31 = vld [vmem:[%s3835_s14 + $0x68] sm:$0xff]  ;;  %v240_v33 = vld [vmem:[%s3835_s14 + $0x70] sm:$0xff] }
  0x16   : > { %383 = vmatpush.bf16.msra.mxu0 %v3141_v8  ;;  %v3875_v32 = vpack.c.bf16 %v239_v31, %v238_v30  ;;  %v241_v34 = vld [vmem:[%s3835_s14 + $0x78] sm:$0xff]  ;;  %v242_v36 = vld [vmem:[%s3835_s14 + $0x80] sm:$0xff]  ;;  %v243_v37 = vld [vmem:[%s3835_s14 + $0x88] sm:$0xff]  ;;  %471 = vmatpush.bf16.msra.mxu1 %v3153_v50 }
  0x17   : > { %v3881_v35 = vpack.c.bf16 %v241_v34, %v240_v33  ;;  %v3887_v38 = vpack.c.bf16 %v243_v37, %v242_v36  ;;  %v244_v52 = vld [vmem:[%s3835_s14 + $0x90] sm:$0xff]  ;;  %v245_v53 = vld [vmem:[%s3835_s14 + $0x98] sm:$0xff]  ;;  %v3310_v59 = vld [vmem:[%s5787_s1 + $0x4] sm:$0xf] }
  0x18   : > { %v3923_v57 = vpack.c.bf16 %v245_v53, %v244_v52  ;;  %v3134_v60 = vld [vmem:[%s5787_s1 + $0x8] sm:$0xf0]  ;;  %v246_v2 = vld [vmem:[%s3835_s14 + $0xa0] sm:$0xff]  ;;  %v248_v10 = vld [vmem:[%s3835_s14 + $0xb0] sm:$0xff] }
  0x19   : > { %v3137_v61 = vor.u32 %v3310_v59, %v3134_v60  ;;  %v247_v3 = vld [vmem:[%s3835_s14 + $0xa8] sm:$0xff]  ;;  %v250_v18 = vld [vmem:[%s3835_s14 + $0xc0] sm:$0xff]  ;;  %v252_v24 = vld [vmem:[%s3835_s14 + $0xd0] sm:$0xff] }
  0x1a   : > { %384 = vmatpush.bf16.msra.mxu0 %v3133_v11  ;;  %472 = vmatpush.bf16.msra.mxu1 %v3145_v56  ;;  %v3941_v4 = vpack.c.bf16 %v247_v3, %v246_v2  ;;  %v249_v11 = vld [vmem:[%s3835_s14 + $0xb8] sm:$0xff]  ;;  %v251_v19 = vld [vmem:[%s3835_s14 + $0xc8] sm:$0xff]  ;;  %v254_v34 = vld [vmem:[%s3835_s14 + $0xe0] sm:$0xff] }
  0x1b   : > { %v3953_v12 = vpack.c.bf16 %v249_v11, %v248_v10  ;;  %v3965_v21 = vpack.c.bf16 %v251_v19, %v250_v18  ;;  %v253_v25 = vld [vmem:[%s3835_s14 + $0xd8] sm:$0xff]  ;;  %v255_v36 = vld [vmem:[%s3835_s14 + $0xe8] sm:$0xff] }
  0x1c   : > { %v3977_v27 = vpack.c.bf16 %v253_v25, %v252_v24  ;;  %v3991_v37 = vpack.c.bf16 %v255_v36, %v254_v34  ;;  %v257_v46 = vld [vmem:[%s3835_s14 + $0xf8] sm:$0xff] }
  0x1d   : > { %3162 = vmatmul.msk.bf16.vlgmr.msra.gmra.mxu0 %vm328_vm0, %v3839_v14 }
  0x1e   : > { %473 = vmatpush.bf16.msra.mxu1 %v3137_v61 }
  0x21   : > { %3178 = vmatmul.msk.bf16.vlgmr.msra.gmra.mxu1 %vm328_vm0, %v3839_v14 }
  0x2d   : > { %3163 = vmatmul.msk.bf16.gmra.mxu0 %vm328_vm0, %v3845_v17 }
  0x31   : > { %3179 = vmatmul.msk.bf16.gmra.mxu1 %vm328_vm0, %v3845_v17 }
  0x3d   : > { %3164 = vmatmul.msk.bf16.gmra.mxu0 %vm328_vm0, %v3851_v20 }
  0x41   : > { %3180 = vmatmul.msk.bf16.gmra.mxu1 %vm328_vm0, %v3851_v20 }
  0x4d   : > { %3165 = vmatmul.msk.bf16.gmra.mxu0 %vm328_vm0, %v3857_v23 }
  0x51   : > { %3181 = vmatmul.msk.bf16.gmra.mxu1 %vm328_vm0, %v3857_v23 }
  0x5d   : > { %3166 = vmatmul.msk.bf16.gmra.mxu0 %vm328_vm0, %v3863_v26 }
  0x61   : > { %3182 = vmatmul.msk.bf16.gmra.mxu1 %vm328_vm0, %v3863_v26 }
  0x6d   : > { %3167 = vmatmul.msk.bf16.gmra.mxu0 %vm328_vm0, %v3869_v29 }
  0x71   : > { %3183 = vmatmul.msk.bf16.gmra.mxu1 %vm328_vm0, %v3869_v29 }
  0x7d   : > { %3168 = vmatmul.msk.bf16.gmra.mxu0 %vm328_vm0, %v3875_v32 }
  0x81   : > { %3184 = vmatmul.msk.bf16.gmra.mxu1 %vm328_vm0, %v3875_v32 }
  0x8d   : > { %3169 = vmatmul.msk.bf16.gmra.mxu0 %vm328_vm0, %v3881_v35 }
  0x91   : > { %3185 = vmatmul.msk.bf16.gmra.mxu1 %vm328_vm0, %v3881_v35 }
  0x9a   : > { %v386_v39 = vpop.f32.mrf.mxu0 }
  0x9b   : > { %v387_v48 = vadd.f32 %v386_v39, %v3903_v43 }
  0x9d   : > { %3170 = vmatmul.msk.bf16.gmra.mxu0 %vm328_vm0, %v3887_v38 }
  0x9e   : > { %v4025_v32 = vpop.f32.mrf.mxu1 }
  0xa1   : > { %3186 = vmatmul.msk.bf16.gmra.mxu1 %vm328_vm0, %v3887_v38 }
  0xa2   : > { %v388_v45 = vpop.f32.mrf.mxu0 }
  0xa3   : > { %v389_v49 = vadd.f32 %v388_v45, %v3903_v43  ;;  %v256_v45 = vld [vmem:[%s3835_s14 + $0xf0] sm:$0xff] }
  0xa4   : > { %v4005_v47 = vpack.c.bf16 %v257_v46, %v256_v45 }
  0xa5   : > { %v3913_v51 = vpack.c.bf16 %v389_v49, %v387_v48 }
  0xaa   : > { %v391_v58 = vpop.f32.mrf.mxu0 }
  0xab   : > { %v392_v63 = vadd.f32 %v391_v58, %v3903_v43  ;;  %v4031_v58 = vpop.f32.mrf.mxu1 }
  0xad   : > { %3171 = vmatmul.msk.bf16.gmra.mxu0 %vm328_vm0, %v3923_v57 }
  0xb1   : > { %3187 = vmatmul.msk.bf16.gmra.mxu1 %vm328_vm0, %v3923_v57 }
  0xb2   : > { %v393_v62 = vpop.f32.mrf.mxu0 }
  0xb3   : > { %v394_v0 = vadd.f32 %v393_v62, %v3903_v43  ;;  %v4033_v60 = vpop.f32.mrf.mxu1 }
  0xb5   : > { %v3937_v1 = vpack.c.bf16 %v394_v0, %v392_v63 }
  0xba   : > { %v396_v5 = vpop.f32.mrf.mxu0 }
  0xbb   : > { %v397_v7 = vadd.f32 %v396_v5, %v3903_v43  ;;  %v4037_v61 = vpop.f32.mrf.mxu1 }
  0xbd   : > { %3172 = vmatmul.msk.bf16.gmra.mxu0 %vm328_vm0, %v3941_v4 }
  0xc1   : > { %3188 = vmatmul.msk.bf16.gmra.mxu1 %vm328_vm0, %v3941_v4 }
  0xc2   : > { %v398_v6 = vpop.f32.mrf.mxu0 }
  0xc3   : > { %v399_v8 = vadd.f32 %v398_v6, %v3903_v43  ;;  %v4041_v63 = vpop.f32.mrf.mxu1 }
  0xc5   : > { %v3949_v9 = vpack.c.bf16 %v399_v8, %v397_v7 }
  0xca   : > { %v401_v13 = vpop.f32.mrf.mxu0 }
  0xcb   : > { %v402_v15 = vadd.f32 %v401_v13, %v3903_v43  ;;  %v4047_v0 = vpop.f32.mrf.mxu1 }
  0xcd   : > { %3173 = vmatmul.msk.bf16.gmra.mxu0 %vm328_vm0, %v3953_v12 }
  0xd1   : > { %3189 = vmatmul.msk.bf16.gmra.mxu1 %vm328_vm0, %v3953_v12 }
  0xd2   : > { %v403_v14 = vpop.f32.mrf.mxu0 }
  0xd3   : > { %v404_v16 = vadd.f32 %v403_v14, %v3903_v43  ;;  %v4049_v3 = vpop.f32.mrf.mxu1 }
  0xd5   : > { %v3961_v17 = vpack.c.bf16 %v404_v16, %v402_v15 }
  0xda   : > { %v3967_v22 = vpop.f32.mrf.mxu0 }
  0xdb   : > { %v4053_v5 = vpop.f32.mrf.mxu1 }
  0xdd   : > { %3174 = vmatmul.msk.bf16.gmra.mxu0 %vm328_vm0, %v3965_v21 }
  0xe1   : > { %3190 = vmatmul.msk.bf16.gmra.mxu1 %vm328_vm0, %v3965_v21 }
  0xe2   : > { %v3973_v20 = vpop.f32.mrf.mxu0 }
  0xe3   : > { %v4055_v7 = vpop.f32.mrf.mxu1 }
  0xea   : > { %v411_v28 = vpop.f32.mrf.mxu0 }
  0xeb   : > { %v412_v31 = vadd.f32 %v411_v28, %v3903_v43  ;;  %v4063_v13 = vpop.f32.mrf.mxu1 }
  0xed   : > { %3175 = vmatmul.msk.bf16.gmra.mxu0 %vm328_vm0, %v3977_v27 }
  0xf1   : > { %3191 = vmatmul.msk.bf16.gmra.mxu1 %vm328_vm0, %v3977_v27 }
  0xf2   : > { %v413_v30 = vpop.f32.mrf.mxu0 }
  0xf3   : > { %v414_v23 = vadd.f32 %v413_v30, %v3903_v43  ;;  %v4067_v14 = vpop.f32.mrf.mxu1 }
  0xf5   : > { %v3985_v33 = vpack.c.bf16 %v414_v23, %v412_v31 }
  0xf7   : > { %605 = vrot.lane.b32.xlu2 %v3985_v33, %s3762_s11 }
  0xfa   : > { %v416_v39 = vpop.f32.mrf.mxu0 }
  0xfb   : > { %v417_v41 = vadd.f32 %v416_v39, %v3903_v43  ;;  %v502_v28 = vpop.f32.mrf.mxu1 }
  0xfd   : > { %3176 = vmatmul.msk.bf16.gmra.mxu0 %vm328_vm0, %v3991_v37 }
 0x101   : > { %3192 = vmatmul.msk.bf16.gmra.mxu1 %vm328_vm0, %v3991_v37  ;;  %v409_v37 = vadd.f32 %v3973_v20, %v3903_v43 }
 0x102   : > { %v418_v26 = vpop.f32.mrf.mxu0 }
 0x103   : > { %v419_v42 = vadd.f32 %v418_v26, %v3903_v43  ;;  %v505_v39 = vpop.f32.mrf.mxu1 }
 0x105   : > { %v3999_v44 = vpack.c.bf16 %v419_v42, %v417_v41 }
 0x107   : > { %607 = vrot.lane.b32.xlu1 %v3999_v44, %s3762_s11 }
 0x10a   : > { %v421_v48 = vpop.f32.mrf.mxu0 }
 0x10b   : > { %v422_v49 = vadd.f32 %v421_v48, %v3903_v43 }
 0x10d   : > { %3177 = vmatmul.msk.bf16.gmra.mxu0 %vm328_vm0, %v4005_v47 }
 0x111   : > { %3193 = vmatmul.msk.bf16.gmra.mxu1 %vm328_vm0, %v4005_v47 }
 0x112   : > { %v423_v29 = vpop.f32.mrf.mxu0 }
 0x113   : > { %v424_v50 = vadd.f32 %v423_v29, %v3903_v43  ;;  %v507_v29 = vpop.f32.mrf.mxu1 }
 0x115   : > { %v4013_v52 = vpack.c.bf16 %v424_v50, %v422_v49 }
 0x117   : > { %609 = vrot.lane.b32.xlu0 %v4013_v52, %s3762_s11 }
 0x11a   : > { %v4017_v53 = vpop.f32.mrf.mxu0 }
 0x122   : > { %v4021_v54 = vpop.f32.mrf.mxu0 }
 0x12a   : > { %v4023_v55 = vpop.f32.mrf.mxu0 }
 0x132   : > { %v4029_v56 = vpop.f32.mrf.mxu0 }
 0x133   : > { %v434_v50 = vadd.f32 %v4029_v56, %v3903_v43 }
 0x13a   : > { %v436_v59 = vpop.f32.mrf.mxu0 }
 0x13b   : > { %v437_v18 = vadd.f32 %v436_v59, %v3903_v43 }
 0x142   : > { %v438_v35 = vpop.f32.mrf.mxu0 }
 0x143   : > { %v439_v15 = vadd.f32 %v438_v35, %v3903_v43  ;;  %v407_v35 = vadd.f32 %v3967_v22, %v3903_v43 }
 0x145   : > { %v4077_v24 = vpack.c.bf16 %v439_v15, %v437_v18 }
 0x14a   : > { %v4039_v62 = vpop.f32.mrf.mxu0 }
 0x14b   : > { %v442_v20 = vadd.f32 %v4039_v62, %v3903_v43 }
 0x151   : > { %v606_v49 = vpop.permute.xlu2 %605 }
 0x152   : > { %v4045_v38 = vpop.f32.mrf.mxu0  ;;  %v692_v59 = vsel %vm627_vm1, %v606_v49, 0 }
 0x153   : > { %v444_v22 = vadd.f32 %v4045_v38, %v3903_v43 }
 0x155   : > { %v4135_v56 = vpack.c.bf16 %v444_v22, %v442_v20 }
 0x15a   : > { %v446_v2 = vpop.f32.mrf.mxu0 }
 0x15b   : > { %v447_v34 = vadd.f32 %v446_v2, %v3903_v43  ;;  %v432_v2 = vadd.f32 %v4023_v55, %v3903_v43  ;;  %v4133_v55 = vperm.slane %v3892_v40, 1 }
 0x15d   : > { %v506_v40 = vadd.f32 %v505_v39, %v4133_v55  ;;  %v508_v62 = vadd.f32 %v507_v29, %v4133_v55  ;;  %v503_v15 = vadd.f32 %v502_v28, %v4133_v55 }
 0x162   : > { %v448_v57 = vpop.f32.mrf.mxu0 }
 0x163   : > { %v449_v27 = vadd.f32 %v448_v57, %v3903_v43  ;;  %v4116_v57 = vpack.c.bf16 %v409_v37, %v407_v35 }
 0x165   : > { %v4088_v36 = vpack.c.bf16 %v449_v27, %v447_v34  ;;  %v427_v27 = vadd.f32 %v4017_v53, %v3903_v43  ;;  %v488_v53 = vadd.f32 %v4047_v0, %v4133_v55 }
 0x16a   : > { %v451_v6 = vpop.f32.mrf.mxu0 }
 0x16b   : > { %v452_v8 = vadd.f32 %v451_v6, %v3903_v43  ;;  %v4118_v6 = vpack.c.bf16 %v434_v50, %v432_v2 }
 0x172   : > { %v453_v4 = vpop.f32.mrf.mxu0 }
 0x173   : > { %v454_v10 = vadd.f32 %v453_v4, %v3903_v43  ;;  %v510_v4 = vpop.f32.mrf.mxu1 }
 0x174   : > { %v511_v38 = vadd.f32 %v510_v4, %v4133_v55 }
 0x175   : > { %v4061_v11 = vpack.c.bf16 %v454_v10, %v452_v8 }
 0x177   : > { %5800 = vst [vmem:[#allocation2_spill] sm:$0xff] %v4061_v11  ;;  %621 = vrot.lane.b32.xlu2 %v4061_v11, %s3762_s11 }
 0x179   : > { %v608_v26 = vpop.permute.xlu1 %607 }
 0x17a   : > { %v456_v12 = vpop.f32.mrf.mxu0  ;;  %v695_v42 = vsel %vm627_vm1, %v608_v26, 0 }
 0x17b   : > { %v457_v19 = vadd.f32 %v456_v12, %v3903_v43  ;;  %v512_v8 = vpop.f32.mrf.mxu1  ;;  %v501_v12 = vadd.f32 %v4067_v14, %v4133_v55  ;;  %v496_v14 = vadd.f32 %v4055_v7, %v4133_v55  ;;  %v483_v7 = vadd.f32 %v4037_v61, %v4133_v55 }
 0x17c   : > { %v513_v10 = vadd.f32 %v512_v8, %v4133_v55  ;;  %v478_v61 = vadd.f32 %v4031_v58, %v4133_v55 }
 0x17d   : > { %v1323_v28 = vpack.c.bf16 %v503_v15, %v501_v12 }
 0x17e   : > { %v1325_v47 = vpack.c.bf16 %v513_v10, %v511_v38 }
 0x17f   : > { %601 = vrot.lane.b32.xlu2 %v3961_v17, %s3762_s11 }
 0x180   : > { %1334 = vmatpush.bf16.msrb.mxu0 %v1325_v47 }
 0x182   : > { %v458_v16 = vpop.f32.mrf.mxu0 }
 0x183   : > { %v459_v21 = vadd.f32 %v458_v16, %v3903_v43  ;;  %v1324_v16 = vpack.c.bf16 %v508_v62, %v506_v40  ;;  %v4150_v18 = vpop.f32.mrf.mxu1 }
 0x185   : > { %v4079_v25 = vpack.c.bf16 %v459_v21, %v457_v19  ;;  %1335 = vmatpush.bf16.msrb.mxu0 %v1324_v16  ;;  %v429_v19 = vadd.f32 %v4021_v54, %v3903_v43  ;;  %v498_v21 = vadd.f32 %v4063_v13, %v4133_v55 }
 0x187   : > { %5801 = vst [vmem:[#allocation3_spill] sm:$0xff] %v4079_v25  ;;  %623 = vrot.lane.b32.xlu1 %v4079_v25, %s3762_s11  ;;  %615 = vrot.lane.b32.xlu2 %v4077_v24, %s3762_s11  ;;  %v4172_v54 = vpack.c.bf16 %v498_v21, %v496_v14 }
 0x189   : > { %v610_v30 = vpop.permute.xlu0 %609  ;;  %1336 = vmatpush.bf16.msrb.mxu0 %v1323_v28 }
 0x18a   : > { %v461_v31 = vpop.f32.mrf.mxu0  ;;  %v698_v23 = vsel %vm627_vm1, %v610_v30, 0  ;;  %v4166_v30 = vpack.c.bf16 %v429_v19, %v427_v27 }
 0x18b   : > { %724 = vmatpush.bf16.xpose.msra.mxu2 %v698_v23  ;;  %v462_v45 = vadd.f32 %v461_v31, %v3903_v43  ;;  %v491_v31 = vadd.f32 %v4049_v3, %v4133_v55  ;;  %v493_v23 = vadd.f32 %v4053_v5, %v4133_v55  ;;  %v4174_v34 = vpop.f32.mrf.mxu1  ;;  %v481_v5 = vadd.f32 %v4033_v60, %v4133_v55 }
 0x18c   : > { %v476_v60 = vadd.f32 %v4025_v32, %v4133_v55 }
 0x18d   : > { %1337 = vmatpush.bf16.msrb.mxu0 %v4172_v54  ;;  %v4186_v3 = vpack.c.bf16 %v493_v23, %v491_v31 }
 0x18e   : > { %v4210_v0 = vpack.c.bf16 %v478_v61, %v476_v60 }
 0x18f   : > { %619 = vrot.lane.b32.xlu1 %v4088_v36, %s3762_s11  ;;  %595 = vrot.lane.b32.xlu2 %v3913_v51, %s3762_s11 }
 0x190   : > { %5803 = vst [vmem:[#allocation5_spill] sm:$0xff] %v4210_v0 }
 0x191   : > { %1338 = vmatpush.bf16.msrb.mxu0 %v4186_v3 }
 0x192   : > { %v463_v41 = vpop.f32.mrf.mxu0 }
 0x193   : > { %v464_v46 = vadd.f32 %v463_v41, %v3903_v43  ;;  %725 = vmatpush.bf16.xpose.msra.mxu2 %v695_v42  ;;  %v486_v43 = vadd.f32 %v4041_v63, %v4133_v55  ;;  %v4195_v39 = vpop.f32.mrf.mxu1  ;;  %v4207_v63 = vpack.c.bf16 %v483_v7, %v481_v5 }
 0x195   : > { %v4099_v48 = vpack.c.bf16 %v464_v46, %v462_v45  ;;  %v4193_v13 = vpack.c.bf16 %v488_v53, %v486_v43 }
 0x197   : > { %5802 = vst [vmem:[#allocation4_spill] sm:$0xff] %v4099_v48  ;;  %625 = vrot.lane.b32.xlu0 %v4099_v48, %s3762_s11  ;;  %599 = vrot.lane.b32.xlu1 %v3949_v9, %s3762_s11 }
 0x198   : > { %1652 = vrot.lane.b32.xlu2 %v4079_v25, %s3763_s12  ;;  %1339 = vmatpush.bf16.msrb.mxu0 %v4193_v13 }
 0x19b   : > { %726 = vmatpush.bf16.xpose.msra.mxu2 %v692_v59  ;;  %v4212_v26 = vpop.f32.mrf.mxu1 }
 0x19c   : > { %1340 = vmatpush.bf16.msrb.mxu0 %v4207_v63 }
 0x19f   : > { %603 = vrot.lane.b32.xlu0 %v4116_v57, %s3762_s11  ;;  %613 = vrot.lane.b32.xlu1 %v4118_v6, %s3762_s11 }
 0x1a0   : > { %1644 = vrot.lane.b32.xlu2 %v4077_v24, %s3763_s12  ;;  %1341 = vmatpush.bf16.msrb.mxu0 %v4210_v0 }
 0x1a3   : > { %v4220_v32 = vpop.f32.mrf.mxu1 }
 0x1a7   : > { %617 = vrot.lane.b32.xlu0 %v4135_v56, %s3762_s11  ;;  %1636 = vrot.lane.b32.xlu1 %v3999_v44, %s3763_s12 }
 0x1a8   : > { %1596 = vrot.lane.b32.xlu2 %v3949_v9, %s3764_s13 }
 0x1ab   : > { %v4226_v58 = vpop.f32.mrf.mxu1 }
 0x1af   : > { %1650 = vrot.lane.b32.xlu1 %v4061_v11, %s3763_s12  ;;  %597 = vrot.lane.b32.xlu0 %v3937_v1, %s3762_s11 }
 0x1b0   : > { %1606 = vrot.lane.b32.xlu2 %v4013_v52, %s3764_s13 }
 0x1b3   : > { %v4232_v41 = vpop.f32.mrf.mxu1 }
 0x1b7   : > { %1626 = vrot.lane.b32.xlu1 %v3937_v1, %s3763_s12  ;;  %611 = vrot.lane.b32.xlu0 %v4166_v30, %s3762_s11 }
 0x1b8   : > { %2376 = vrot.lane.b32.xlu2 %v1325_v47, %s3764_s13 }
 0x1bb   : > { %v4238_v42 = vpop.f32.mrf.mxu1 }
 0x1bf   : > { %1638 = vrot.lane.b32.xlu0 %v4013_v52, %s3763_s12  ;;  %1624 = vrot.lane.b32.xlu1 %v3913_v51, %s3763_s12 }
 0x1c0   : > { %2374 = vrot.lane.b32.xlu2 %v1324_v16, %s3764_s13 }
 0x1c3   : > { %v535_v45 = vpop.f32.mrf.mxu1 }
 0x1c7   : > { %1634 = vrot.lane.b32.xlu0 %v3985_v33, %s3763_s12  ;;  %1640 = vrot.lane.b32.xlu1 %v4166_v30, %s3763_s12 }
 0x1c8   : > { %2372 = vrot.lane.b32.xlu2 %v1323_v28, %s3764_s13 }
 0x1cb   : > { %v537_v46 = vpop.f32.mrf.mxu1 }
 0x1cf   : > { %1632 = vrot.lane.b32.xlu0 %v4116_v57, %s3763_s12  ;;  %1592 = vrot.lane.b32.xlu1 %v3913_v51, %s3764_s13 }
 0x1d1   : > { %v622_v35 = vpop.permute.xlu2 %621 }
 0x1d2   : > { %v716_v62 = vsel %vm627_vm1, %v622_v35, 0 }
 0x1d3   : > { %v540_v29 = vpop.f32.mrf.mxu1 }
 0x1d4   : > { %v541_v61 = vadd.f32 %v540_v29, %v4133_v55 }
 0x1d7   : > { %1648 = vrot.lane.b32.xlu0 %v4088_v36, %s3763_s12  ;;  %1598 = vrot.lane.b32.xlu1 %v3961_v17, %s3764_s13 }
 0x1d9   : > { %v602_v10 = vpop.permute.xlu2 %601 }
 0x1da   : > { %v686_v40 = vsel %vm627_vm1, %v602_v10, 0  ;;  %v533_v10 = vadd.f32 %v4238_v42, %v4133_v55 }
 0x1db   : > { %v542_v49 = vpop.f32.mrf.mxu1 }
 0x1df   : > { %1630 = vrot.lane.b32.xlu0 %v3961_v17, %s3763_s12  ;;  %1600 = vrot.lane.b32.xlu1 %v4116_v57, %s3764_s13 }
 0x1e1   : > { %v616_v21 = vpop.permute.xlu2 %615 }
 0x1e2   : > { %v707_v29 = vsel %vm627_vm1, %v616_v21, 0 }
 0x1e3   : > { %v545_v2 = vpop.f32.mrf.mxu1 }
 0x1e4   : > { %v546_v7 = vadd.f32 %v545_v2, %v4133_v55  ;;  %v538_v2 = vadd.f32 %v537_v46, %v4133_v55 }
 0x1e7   : > { %1646 = vrot.lane.b32.xlu0 %v4135_v56, %s3763_s12  ;;  %1608 = vrot.lane.b32.xlu1 %v4166_v30, %s3764_s13 }
 0x1e9   : > { %v596_v35 = vpop.permute.xlu2 %595 }
 0x1eb   : > { %v547_v38 = vpop.f32.mrf.mxu1 }
 0x1ec   : > { %v548_v60 = vadd.f32 %v547_v38, %v4133_v55  ;;  %v531_v38 = vadd.f32 %v4232_v41, %v4133_v55 }
 0x1ef   : > { %1628 = vrot.lane.b32.xlu0 %v3949_v9, %s3763_s12 }
 0x1f2   : > { %v4299_v42 = vpop.permute.xlu2 %1652 }
 0x1f3   : > { %v550_v12 = vpop.f32.mrf.mxu1 }
 0x1f4   : > { %v551_v27 = vadd.f32 %v550_v12, %v4133_v55  ;;  %v4294_v12 = vpack.c.bf16 %v533_v10, %v531_v38  ;;  %v1747_v38 = vsel %vm627_vm1, %v4299_v42, 0 }
 0x1f7   : > { %1642 = vrot.lane.b32.xlu0 %v4118_v6, %s3763_s12 }
 0x1f9   : > { %v624_v59 = vpop.permute.xlu1 %623 }
 0x1fa   : > { %v719_v20 = vsel %vm627_vm1, %v624_v59, 0 }
 0x1fb   : > { %v552_v28 = vpop.f32.mrf.mxu1 }
 0x1fc   : > { %v553_v31 = vadd.f32 %v552_v28, %v4133_v55 }
 0x1fe   : > { %v1333_v43 = vpack.c.bf16 %v553_v31, %v551_v27 }
 0x1ff   : > { %1594 = vrot.lane.b32.xlu0 %v3937_v1, %s3764_s13 }
 0x200   : > { %1423 = vmatpush.bf16.msrb.mxu1 %v1333_v43 }
 0x201   : > { %v620_v8 = vpop.permute.xlu1 %619 }
 0x202   : > { %v713_v14 = vsel %vm627_vm1, %v620_v8, 0  ;;  %v677_v8 = vsel %vm627_vm1, %v596_v35, 0 }
 0x207   : > { %1602 = vrot.lane.b32.xlu0 %v3985_v33, %s3764_s13 }
 0x209   : > { %v626_v37 = vpop.permute.xlu0 %625  ;;  %v600_v15 = vpop.permute.xlu1 %599 }
 0x20a   : > { %v722_v50 = vsel %vm627_vm1, %v626_v37, 0  ;;  %v683_v19 = vsel %vm627_vm1, %v600_v15, 0  ;;  %v543_v37 = vadd.f32 %v542_v49, %v4133_v55 }
 0x20b   : > { %813 = vmatpush.bf16.xpose.msra.mxu3 %v722_v50  ;;  %v1332_v50 = vpack.c.bf16 %v548_v60, %v546_v7 }
 0x20d   : > { %2390 = vrot.lane.b32.xlu1 %v1332_v50, %s3764_s13  ;;  %1424 = vmatpush.bf16.msrb.mxu1 %v1332_v50 }
 0x20f   : > { %1604 = vrot.lane.b32.xlu0 %v3999_v44, %s3764_s13 }
 0x211   : > { %v604_v4 = vpop.permute.xlu0 %603  ;;  %v614_v59 = vpop.permute.xlu1 %613 }
 0x212   : > { %v689_v22 = vsel %vm627_vm1, %v604_v4, 0  ;;  %v704_v41 = vsel %vm627_vm1, %v614_v59, 0 }
 0x213   : > { %727 = vmatpush.bf16.xpose.msra.mxu2 %v689_v22  ;;  %814 = vmatpush.bf16.xpose.msra.mxu3 %v719_v20  ;;  %v536_v22 = vadd.f32 %v535_v45, %v4133_v55  ;;  %v1331_v20 = vpack.c.bf16 %v543_v37, %v541_v61 }
 0x215   : > { %1425 = vmatpush.bf16.msrb.mxu1 %v1331_v20  ;;  %v4286_v45 = vpack.c.bf16 %v538_v2, %v536_v22  ;;  %2388 = vrot.lane.b32.xlu2 %v1331_v20, %s3764_s13 }
 0x217   : > { %1610 = vrot.lane.b32.xlu0 %v4118_v6, %s3764_s13 }
 0x219   : > { %v618_v47 = vpop.permute.xlu0 %617  ;;  %v1637_v46 = vpop.permute.xlu1 %1636  ;;  %1426 = vmatpush.bf16.msrb.mxu1 %v4286_v45 }
 0x21a   : > { %v710_v5 = vsel %vm627_vm1, %v618_v47, 0  ;;  %v526_v47 = vadd.f32 %v4220_v32, %v4133_v55  ;;  %v1723_v15 = vsel %vm627_vm1, %v1637_v46, 0  ;;  %v521_v32 = vadd.f32 %v4195_v39, %v4133_v55 }
 0x21b   : > { %728 = vmatpush.bf16.xpose.msra.mxu2 %v686_v40  ;;  %815 = vmatpush.bf16.xpose.msra.mxu3 %v716_v62  ;;  %v528_v40 = vadd.f32 %v4226_v58, %v4133_v55  ;;  %v523_v58 = vadd.f32 %v4212_v26, %v4133_v55  ;;  %v4319_v26 = vpop.permute.xlu2 %1644 }
 0x21d   : > { %1427 = vmatpush.bf16.msrb.mxu1 %v4294_v12  ;;  %v4314_v28 = vpack.c.bf16 %v523_v58, %v521_v32 }
 0x21f   : > { %1612 = vrot.lane.b32.xlu0 %v4077_v24, %s3764_s13 }
 0x221   : > { %v598_v16 = vpop.permute.xlu0 %597  ;;  %v1651_v7 = vpop.permute.xlu1 %1650 }
 0x222   : > { %v680_v53 = vsel %vm627_vm1, %v598_v16, 0  ;;  %v4307_v16 = vpack.c.bf16 %v528_v40, %v526_v47 }
 0x223   : > { %729 = vmatpush.bf16.xpose.msra.mxu2 %v683_v19  ;;  %816 = vmatpush.bf16.xpose.msra.mxu3 %v713_v14  ;;  %v516_v19 = vadd.f32 %v4150_v18, %v4133_v55  ;;  %v518_v14 = vadd.f32 %v4174_v34, %v4133_v55  ;;  %v4329_v34 = vpop.permute.xlu2 %1596 }
 0x224   : > { %1428 = vmatpush.bf16.msrb.mxu1 %v4307_v16 }
 0x225   : > { %v4321_v31 = vpack.c.bf16 %v518_v14, %v516_v19 }
 0x227   : > { %1654 = vrot.lane.b32.xlu0 %v4099_v48, %s3763_s12  ;;  %5804 = vst [vmem:[#allocation6_spill] sm:$0xff] %v4321_v31 }
 0x228   : > { %1429 = vmatpush.bf16.msrb.mxu1 %v4314_v28 }
 0x229   : > { %v612_v23 = vpop.permute.xlu0 %611  ;;  %v1627_v37 = vpop.permute.xlu1 %1626 }
 0x22a   : > { %v701_v27 = vsel %vm627_vm1, %v612_v23, 0  ;;  %v1708_v35 = vsel %vm627_vm1, %v1627_v37, 0 }
 0x22b   : > { %730 = vmatpush.bf16.xpose.msra.mxu2 %v680_v53  ;;  %817 = vmatpush.bf16.xpose.msra.mxu3 %v710_v5  ;;  %v4332_v53 = vpop.permute.xlu2 %1606 }
 0x22c   : > { %1430 = vmatpush.bf16.msrb.mxu1 %v4321_v31 }
 0x22f   : > { %2392 = vrot.lane.b32.xlu0 %v1333_v43, %s3764_s13 }
 0x231   : > { %v1639_v4 = vpop.permute.xlu0 %1638 }
 0x232   : > { %v1726_v49 = vsel %vm627_vm1, %v1639_v4, 0 }
 0x233   : > { %731 = vmatpush.bf16.xpose.msra.mxu2 %v677_v8  ;;  %818 = vmatpush.bf16.xpose.msra.mxu3 %v707_v29  ;;  %v2377_v60 = vpop.permute.xlu2 %2376 }
 0x234   : > { %2410 = vmatpush.bf16.msra.mxu0 %v2377_v60 }
 0x239   : > { %v1635_v62 = vpop.permute.xlu0 %1634 }
 0x23a   : > { %3194 = vmatmul.msk.bf16.vlgmr.msra.gmra.mxu2 %vm627_vm1, %v3913_v51  ;;  %v1720_v39 = vsel %vm627_vm1, %v1635_v62, 0 }
 0x23b   : > { %1752 = vmatpush.bf16.xpose.msrb.mxu2 %v1726_v49  ;;  %819 = vmatpush.bf16.xpose.msra.mxu3 %v704_v41  ;;  %v2375_v59 = vpop.permute.xlu2 %2374 }
 0x23c   : > { %2411 = vmatpush.bf16.msra.mxu0 %v2375_v59 }
 0x241   : > { %v1633_v21 = vpop.permute.xlu0 %1632 }
 0x242   : > { %v1717_v55 = vsel %vm627_vm1, %v1633_v21, 0 }
 0x243   : > { %1753 = vmatpush.bf16.xpose.msrb.mxu2 %v1723_v15  ;;  %820 = vmatpush.bf16.xpose.msra.mxu3 %v701_v27  ;;  %v2373_v22 = vpop.permute.xlu2 %2372 }
 0x244   : > { %2412 = vmatpush.bf16.msra.mxu0 %v2373_v22 }
 0x249   : > { %v1649_v18 = vpop.permute.xlu0 %1648 }
 0x24a   : > { %3195 = vmatmul.msk.bf16.gmra.mxu2 %vm627_vm1, %v3937_v1  ;;  %3210 = vmatmul.msk.bf16.vlgmr.msra.gmra.mxu3 %vm627_vm1, %v3913_v51  ;;  %v1741_v10 = vsel %vm627_vm1, %v1649_v18, 0 }
 0x24b   : > { %1754 = vmatpush.bf16.xpose.msrb.mxu2 %v1720_v39 }
 0x251   : > { %v1631_v23 = vpop.permute.xlu0 %1630 }
 0x252   : > { %v1714_v43 = vsel %vm627_vm1, %v1631_v23, 0 }
 0x253   : > { %1755 = vmatpush.bf16.xpose.msrb.mxu2 %v1717_v55 }
 0x259   : > { %v1647_v5 = vpop.permute.xlu0 %1646 }
 0x25a   : > { %3196 = vmatmul.msk.bf16.gmra.mxu2 %vm627_vm1, %v3949_v9  ;;  %3211 = vmatmul.msk.bf16.gmra.mxu3 %vm627_vm1, %v3937_v1  ;;  %v1625_v1 = vpop.permute.xlu1 %1624 }
 0x25b   : > { %1756 = vmatpush.bf16.xpose.msrb.mxu2 %v1714_v43  ;;  %v1705_v2 = vsel %vm627_vm1, %v1625_v1, 0 }
 0x261   : > { %v1629_v51 = vpop.permute.xlu0 %1628 }
 0x262   : > { %v1711_v61 = vsel %vm627_vm1, %v1629_v51, 0  ;;  %v1641_v47 = vpop.permute.xlu1 %1640 }
 0x263   : > { %1757 = vmatpush.bf16.xpose.msrb.mxu2 %v1711_v61  ;;  %v1729_v58 = vsel %vm627_vm1, %v1641_v47, 0 }
 0x269   : > { %v1643_v50 = vpop.permute.xlu0 %1642 }
 0x26a   : > { %3197 = vmatmul.msk.bf16.gmra.mxu2 %vm627_vm1, %v3961_v17  ;;  %3212 = vmatmul.msk.bf16.gmra.mxu3 %vm627_vm1, %v3949_v9  ;;  %v4387_v62 = vpop.permute.xlu1 %1592 }
 0x26b   : > { %1758 = vmatpush.bf16.xpose.msrb.mxu2 %v1708_v35 }
 0x26f   : > { %v2389_v61 = vpop.permute.xlu2 %2388 }
 0x271   : > { %v4344_v4 = vpop.permute.xlu0 %1594 }
 0x272   : > { %v4400_v32 = vpop.permute.xlu1 %1598 }
 0x273   : > { %1759 = vmatpush.bf16.xpose.msrb.mxu2 %v1705_v2 }
 0x279   : > { %v4347_v20 = vpop.permute.xlu0 %1602 }
 0x27a   : > { %3198 = vmatmul.msk.bf16.gmra.mxu2 %vm627_vm1, %v4116_v57  ;;  %3213 = vmatmul.msk.bf16.gmra.mxu3 %vm627_vm1, %v3961_v17  ;;  %v4413_v21 = vpop.permute.xlu1 %1600 }
 0x281   : > { %v4353_v9 = vpop.permute.xlu0 %1604 }
 0x282   : > { %v4425_v23 = vpop.permute.xlu1 %1608 }
 0x289   : > { %v4355_v8 = vpop.permute.xlu0 %1610 }
 0x28a   : > { %3199 = vmatmul.msk.bf16.gmra.mxu2 %vm627_vm1, %v3985_v33  ;;  %3214 = vmatmul.msk.bf16.gmra.mxu3 %vm627_vm1, %v4116_v57  ;;  %v1744_v57 = vsel %vm627_vm1, %v1651_v7, 0  ;;  %v2391_v60 = vpop.permute.xlu1 %2390 }
 0x291   : > { %v4361_v29 = vpop.permute.xlu0 %1612 }
 0x299   : > { %v1655_v49 = vpop.permute.xlu0 %1654 }
 0x29a   : > { %3200 = vmatmul.msk.bf16.gmra.mxu2 %vm627_vm1, %v3999_v44  ;;  %3215 = vmatmul.msk.bf16.gmra.mxu3 %vm627_vm1, %v3985_v33  ;;  %v1750_v17 = vsel %vm627_vm1, %v1655_v49, 0  ;;  %v1738_v33 = vsel %vm627_vm1, %v1647_v5, 0 }
 0x29b   : > { %1841 = vmatpush.bf16.xpose.msrb.mxu3 %v1750_v17 }
 0x2a3   : > { %1842 = vmatpush.bf16.xpose.msrb.mxu3 %v1747_v38 }
 0x2aa   : > { %3201 = vmatmul.msk.bf16.gmra.mxu2 %vm627_vm1, %v4013_v52  ;;  %3216 = vmatmul.msk.bf16.gmra.mxu3 %vm627_vm1, %v3999_v44  ;;  %v1735_v44 = vsel %vm627_vm1, %v4319_v26, 0 }
 0x2ab   : > { %1843 = vmatpush.bf16.xpose.msrb.mxu3 %v1744_v57 }
 0x2b3   : > { %1844 = vmatpush.bf16.xpose.msrb.mxu3 %v1741_v10 }
 0x2ba   : > { %3202 = vmatmul.msk.bf16.gmra.mxu2 %vm627_vm1, %v4166_v30  ;;  %3217 = vmatmul.msk.bf16.gmra.mxu3 %vm627_vm1, %v4013_v52  ;;  %v1732_v52 = vsel %vm627_vm1, %v1643_v50, 0 }
 0x2bb   : > { %1845 = vmatpush.bf16.xpose.msrb.mxu3 %v1738_v33 }
 0x2bd   : > { %v4381_v46 = vpop.f32.mrf.mxu2 }
 0x2c3   : > { %1846 = vmatpush.bf16.xpose.msrb.mxu3 %v1735_v44 }
 0x2c5   : > { %v4385_v40 = vpop.f32.mrf.mxu2 }
 0x2ca   : > { %3203 = vmatmul.msk.bf16.gmra.mxu2 %vm627_vm1, %v4118_v6  ;;  %3218 = vmatmul.msk.bf16.gmra.mxu3 %vm627_vm1, %v4166_v30 }
 0x2cb   : > { %1847 = vmatpush.bf16.xpose.msrb.mxu3 %v1732_v52 }
 0x2cd   : > { %v4394_v41 = vpop.f32.mrf.mxu2  ;;  %v4396_v42 = vpop.f32.mrf.mxu3 }
 0x2ce   : > { %v902_v15 = vmax.f32 %v4381_v46, %v4396_v42 }
 0x2d0   : > { %903 = vmax.xlane.f32.xlu1 %v902_v15 }
 0x2d3   : > { %1848 = vmatpush.bf16.xpose.msrb.mxu3 %v1729_v58 }
 0x2d5   : > { %v4403_v19 = vpop.f32.mrf.mxu2  ;;  %v4405_v14 = vpop.f32.mrf.mxu3 }
 0x2d6   : > { %v905_v30 = vmax.f32 %v4385_v40, %v4405_v14 }
 0x2d8   : > { %906 = vmax.xlane.f32.xlu2 %v905_v30 }
 0x2da   : > { %3204 = vmatmul.msk.bf16.gmra.mxu2 %vm627_vm1, %v4077_v24  ;;  %3219 = vmatmul.msk.bf16.gmra.mxu3 %vm627_vm1, %v4118_v6  ;;  %v2393_v6 = vpop.permute.xlu0 %2392 }
 0x2db   : > { %2499 = vmatpush.bf16.msra.mxu1 %v2393_v6 }
 0x2dd   : > { %v4415_v27 = vpop.f32.mrf.mxu2  ;;  %v4417_v39 = vpop.f32.mrf.mxu3 }
 0x2de   : > { %v908_v26 = vmax.f32 %v4394_v41, %v4417_v39 }
 0x2df   : > { %2500 = vmatpush.bf16.msra.mxu1 %v2391_v60 }
 0x2e0   : > { %909 = vmax.xlane.f32.xlu0 %v908_v26 }
 0x2e3   : > { %2501 = vmatpush.bf16.msra.mxu1 %v2389_v61 }
 0x2e5   : > { %v4421_v18 = vpop.f32.mrf.mxu2  ;;  %v4423_v55 = vpop.f32.mrf.mxu3 }
 0x2e6   : > { %v911_v43 = vmax.f32 %v4403_v19, %v4423_v55 }
 0x2e8   : > { %912 = vmax.xlane.f32.xlu2 %v911_v43 }
 0x2ea   : > { %3205 = vmatmul.msk.bf16.gmra.mxu2 %vm627_vm1, %v4135_v56  ;;  %3220 = vmatmul.msk.bf16.gmra.mxu3 %vm627_vm1, %v4077_v24 }
 0x2ed   : > { %v4433_v5 = vpop.f32.mrf.mxu2  ;;  %v4435_v7 = vpop.f32.mrf.mxu3 }
 0x2ee   : > { %v914_v51 = vmax.f32 %v4415_v27, %v4435_v7 }
 0x2f0   : > { %915 = vmax.xlane.f32.xlu2 %v914_v51 }
 0x2f5   : > { %v4439_v37 = vpop.f32.mrf.mxu2  ;;  %v4441_v50 = vpop.f32.mrf.mxu3 }
 0x2f6   : > { %v917_v24 = vmax.f32 %v4421_v18, %v4441_v50 }
 0x2f8   : > { %918 = vmax.xlane.f32.xlu1 %v917_v24 }
 0x2fa   : > { %3206 = vmatmul.msk.bf16.gmra.mxu2 %vm627_vm1, %v4088_v36  ;;  %3221 = vmatmul.msk.bf16.gmra.mxu3 %vm627_vm1, %v4135_v56 }
 0x2fd   : > { %v4449_v59 = vpop.f32.mrf.mxu2  ;;  %v4451_v35 = vpop.f32.mrf.mxu3 }
 0x2fe   : > { %v920_v1 = vmax.f32 %v4433_v5, %v4451_v35 }
 0x300   : > { %921 = vmax.xlane.f32.xlu2 %v920_v1 }
 0x305   : > { %v4455_v22 = vpop.f32.mrf.mxu2  ;;  %v4457_v2 = vpop.f32.mrf.mxu3 }
 0x306   : > { %v923_v49 = vmax.f32 %v4439_v37, %v4457_v2 }
 0x308   : > { %924 = vmax.xlane.f32.xlu1 %v923_v49 }
 0x30a   : > { %3207 = vmatmul.msk.bf16.gmra.mxu2 %vm627_vm1, %v4061_v11  ;;  %3222 = vmatmul.msk.bf16.gmra.mxu3 %vm627_vm1, %v4088_v36 }
 0x30d   : > { %v4465_v17 = vpop.f32.mrf.mxu2  ;;  %v4467_v38 = vpop.f32.mrf.mxu3 }
 0x30e   : > { %v926_v57 = vmax.f32 %v4449_v59, %v4467_v38 }
 0x310   : > { %927 = vmax.xlane.f32.xlu0 %v926_v57 }
 0x315   : > { %v4471_v10 = vpop.f32.mrf.mxu2  ;;  %v4473_v33 = vpop.f32.mrf.mxu3 }
 0x316   : > { %v929_v47 = vmax.f32 %v4455_v22, %v4473_v33 }
 0x318   : > { %930 = vmax.xlane.f32.xlu2 %v929_v47 }
 0x31a   : > { %3208 = vmatmul.msk.bf16.gmra.mxu2 %vm627_vm1, %v4079_v25  ;;  %3223 = vmatmul.msk.bf16.gmra.mxu3 %vm627_vm1, %v4061_v11 }
 0x31d   : > { %v4481_v44 = vpop.f32.mrf.mxu2  ;;  %v4483_v52 = vpop.f32.mrf.mxu3 }
 0x31e   : > { %v932_v57 = vmax.f32 %v4465_v17, %v4483_v52 }
 0x321   : > { %2370 = vrot.lane.b32.xlu1 %v4172_v54, %s3764_s13 }
 0x324   : > { %2386 = vrot.lane.b32.xlu0 %v4286_v45, %s3764_s13 }
 0x325   : > { %v4489_v15 = vpop.f32.mrf.mxu2  ;;  %v4491_v58 = vpop.f32.mrf.mxu3 }
 0x32a   : > { %3209 = vmatmul.msk.bf16.gmra.mxu2 %vm627_vm1, %v4099_v48  ;;  %3224 = vmatmul.msk.bf16.gmra.mxu3 %vm627_vm1, %v4079_v25 }
 0x32d   : > { %v4497_v30 = vpop.f32.mrf.mxu2  ;;  %v4499_v26 = vpop.f32.mrf.mxu3 }
 0x330   : > { %1614 = vrot.lane.b32.xlu2 %v4135_v56, %s3764_s13 }
 0x335   : > { %v4503_v54 = vpop.f32.mrf.mxu2  ;;  %v4505_v45 = vpop.f32.mrf.mxu3 }
 0x33a   : > { %3225 = vmatmul.msk.bf16.gmra.mxu3 %vm627_vm1, %v4099_v48  ;;  %3226 = vmatmul.msk.bf16.vlgmr.msrb.gmra.mxu2 %vm627_vm1, %v4387_v62 }
 0x33d   : > { %v4511_v43 = vpop.f32.mrf.mxu2  ;;  %v4513_v6 = vpop.f32.mrf.mxu3 }
 0x33e   : > { %v944_v25 = vmax.f32 %v4497_v30, %v4513_v6 }
 0x343   : > { %v904_v51 = vpop.xlane.xlu1 %903 }
 0x344   : > { %v998_v60 = vsub.f32 %v4381_v46, %v904_v51  ;;  %v999_v61 = vsub.f32 %v4396_v42, %v904_v51  ;;  %v935_v51 = vmax.f32 %v4471_v10, %v4491_v58 }
 0x345   : > { %v4517_v56 = vpop.f32.mrf.mxu2  ;;  %v4519_v24 = vpop.f32.mrf.mxu3 }
 0x346   : > { %v1062_v1 = vmul.f32 1.442695, %v998_v60  ;;  %v1064_v49 = vmul.f32 1.442695, %v999_v61 }
 0x348   : > { %3338 = vpow2.f32 %v1062_v1 }
 0x349   : > { %3340 = vpow2.f32 %v1064_v49 }
 0x34a   : > { %3227 = vmatmul.msk.bf16.gmra.mxu2 %vm627_vm1, %v4344_v4  ;;  %3242 = vmatmul.msk.bf16.vlgmr.msrb.gmra.mxu3 %vm627_vm1, %v4387_v62 }
 0x34b   : > { %v907_v46 = vpop.xlane.xlu2 %906  ;;  %933 = vmax.xlane.f32.xlu1 %v932_v57 }
 0x34c   : > { %v1000_v42 = vsub.f32 %v4385_v40, %v907_v46  ;;  %v1001_v47 = vsub.f32 %v4405_v14, %v907_v46  ;;  %v947_v40 = vmax.f32 %v4503_v54, %v4519_v24 }
 0x34d   : > { %v4531_v60 = vpop.f32.mrf.mxu2  ;;  %v4533_v61 = vpop.f32.mrf.mxu3 }
 0x34e   : > { %v3339_v1 = vpop.eup %3338  ;;  %v1066_v49 = vmul.f32 1.442695, %v1000_v42  ;;  %v1068_v48 = vmul.f32 1.442695, %v1001_v47  ;;  %936 = vmax.xlane.f32.xlu0 %v935_v51 }
 0x34f   : > { %v3341_v11 = vpop.eup %3340 }
 0x350   : > { %3342 = vpow2.f32 %v1066_v49  ;;  %v4535_v62 = vadd.f32 %v3341_v11, %v3339_v1 }
 0x351   : > { %3344 = vpow2.f32 %v1068_v48 }
 0x352   : > { %5805 = vst [vmem:[#allocation7_spill] sm:$0xff] %v4535_v62 }
 0x353   : > { %v910_v14 = vpop.xlane.xlu0 %909  ;;  %948 = vmax.xlane.f32.xlu1 %v947_v40  ;;  %v938_v40 = vmax.f32 %v4481_v44, %v4499_v26 }
 0x354   : > { %v1002_v57 = vsub.f32 %v4394_v41, %v910_v14  ;;  %v1003_v46 = vsub.f32 %v4417_v39, %v910_v14 }
 0x355   : > { %v4543_v42 = vpop.f32.mrf.mxu2  ;;  %v4545_v47 = vpop.f32.mrf.mxu3 }
 0x356   : > { %v3343_v51 = vpop.eup %3342  ;;  %v1070_v49 = vmul.f32 1.442695, %v1002_v57  ;;  %v1072_v62 = vmul.f32 1.442695, %v1003_v46  ;;  %945 = vmax.xlane.f32.xlu0 %v944_v25 }
 0x357   : > { %v3345_v48 = vpop.eup %3344  ;;  %v1286_v0 = vpack.c.bf16 %v3343_v51, %v3339_v1 }
 0x358   : > { %3346 = vpow2.f32 %v1070_v49  ;;  %v1287_v41 = vpack.c.bf16 %v3345_v48, %v3341_v11  ;;  %v4549_v31 = vadd.f32 %v3345_v48, %v3343_v51  ;;  %v953_v11 = vmax.f32 %v4517_v56, %v4545_v47 }
 0x359   : > { %3348 = vpow2.f32 %v1072_v62  ;;  %1342 = vmatmul.bf16.vlgmr.msrb.gmra.mxu0 %v1286_v0  ;;  %939 = vmax.xlane.f32.xlu2 %v938_v40 }
 0x35a   : > { %5806 = vst [vmem:[#allocation8_spill] sm:$0xff] %v4549_v31  ;;  %1431 = vmatmul.bf16.vlgmr.msrb.gmra.mxu1 %v1287_v41  ;;  %3228 = vmatmul.msk.bf16.gmra.mxu2 %vm627_vm1, %v4329_v34 }
 0x35b   : > { %3243 = vmatmul.msk.bf16.gmra.mxu3 %vm627_vm1, %v4344_v4  ;;  %v913_v25 = vpop.xlane.xlu2 %912  ;;  %v941_v4 = vmax.f32 %v4489_v15, %v4505_v45 }
 0x35c   : > { %v1004_v39 = vsub.f32 %v4403_v19, %v913_v25  ;;  %v1005_v1 = vsub.f32 %v4423_v55, %v913_v25 }
 0x35d   : > { %v4559_v14 = vpop.f32.mrf.mxu2  ;;  %v4561_v62 = vpop.f32.mrf.mxu3 }
 0x35e   : > { %v3347_v0 = vpop.eup %3346  ;;  %v1074_v57 = vmul.f32 1.442695, %v1004_v39  ;;  %v1076_v46 = vmul.f32 1.442695, %v1005_v1  ;;  %954 = vmax.xlane.f32.xlu0 %v953_v11  ;;  %v956_v40 = vmax.f32 %v4531_v60, %v4561_v62 }
 0x35f   : > { %v3349_v51 = vpop.eup %3348 }
 0x360   : > { %3350 = vpow2.f32 %v1074_v57  ;;  %v4565_v49 = vadd.f32 %v3349_v51, %v3347_v0 }
 0x361   : > { %3352 = vpow2.f32 %v1076_v46  ;;  %942 = vmax.xlane.f32.xlu2 %v941_v4 }
 0x363   : > { %v916_v19 = vpop.xlane.xlu2 %915 }
 0x364   : > { %v1006_v55 = vsub.f32 %v4415_v27, %v916_v19  ;;  %v1007_v48 = vsub.f32 %v4435_v7, %v916_v19  ;;  %v950_v27 = vmax.f32 %v4511_v43, %v4533_v61 }
 0x365   : > { %v4571_v41 = vpop.f32.mrf.mxu2  ;;  %v4573_v25 = vpop.f32.mrf.mxu3 }
 0x366   : > { %v3351_v39 = vpop.eup %3350  ;;  %v1078_v1 = vmul.f32 1.442695, %v1006_v55  ;;  %v1080_v11 = vmul.f32 1.442695, %v1007_v48  ;;  %957 = vmax.xlane.f32.xlu0 %v956_v40  ;;  %v959_v57 = vmax.f32 %v4543_v42, %v4573_v25 }
 0x367   : > { %v3353_v46 = vpop.eup %3352  ;;  %v1288_v4 = vpack.c.bf16 %v3351_v39, %v3347_v0 }
 0x368   : > { %3354 = vpow2.f32 %v1078_v1  ;;  %960 = vmax.xlane.f32.xlu1 %v959_v57  ;;  %v1289_v7 = vpack.c.bf16 %v3353_v46, %v3349_v51  ;;  %v4579_v19 = vadd.f32 %v3353_v46, %v3351_v39 }
 0x369   : > { %3356 = vpow2.f32 %v1080_v11  ;;  %1347 = vmatmul.bf16.gmra.mxu0 %v1288_v4  ;;  %951 = vmax.xlane.f32.xlu2 %v950_v27 }
 0x36a   : > { %5807 = vst [vmem:[#allocation9_spill] sm:$0xff] %v4579_v19  ;;  %1436 = vmatmul.bf16.gmra.mxu1 %v1289_v7  ;;  %3229 = vmatmul.msk.bf16.gmra.mxu2 %vm627_vm1, %v4400_v32 }
 0x36b   : > { %3244 = vmatmul.msk.bf16.gmra.mxu3 %vm627_vm1, %v4329_v34  ;;  %v919_v55 = vpop.xlane.xlu1 %918 }
 0x36c   : > { %v1008_v0 = vsub.f32 %v4421_v18, %v919_v55  ;;  %v1009_v48 = vsub.f32 %v4441_v50, %v919_v55 }
 0x36d   : > { %v4587_v40 = vpop.f32.mrf.mxu2  ;;  %v4589_v51 = vpop.f32.mrf.mxu3 }
 0x36e   : > { %v3355_v39 = vpop.eup %3354  ;;  %v1082_v1 = vmul.f32 1.442695, %v1008_v0  ;;  %v1084_v11 = vmul.f32 1.442695, %v1009_v48  ;;  %v962_v57 = vmax.f32 %v4559_v14, %v4589_v51 }
 0x36f   : > { %v3357_v46 = vpop.eup %3356 }
 0x370   : > { %3358 = vpow2.f32 %v1082_v1  ;;  %v4593_v4 = vadd.f32 %v3357_v46, %v3355_v39 }
 0x371   : > { %3360 = vpow2.f32 %v1084_v11  ;;  %963 = vmax.xlane.f32.xlu2 %v962_v57 }
 0x373   : > { %v922_v34 = vpop.xlane.xlu2 %921 }
 0x374   : > { %v1010_v18 = vsub.f32 %v4433_v5, %v922_v34  ;;  %v1011_v50 = vsub.f32 %v4451_v35, %v922_v34 }
 0x375   : > { %v4597_v27 = vpop.f32.mrf.mxu2  ;;  %v4599_v7 = vpop.f32.mrf.mxu3 }
 0x376   : > { %v3359_v55 = vpop.eup %3358  ;;  %v1086_v0 = vmul.f32 1.442695, %v1010_v18  ;;  %v1088_v48 = vmul.f32 1.442695, %v1011_v50  ;;  %v965_v31 = vmax.f32 %v4571_v41, %v4599_v7 }
 0x377   : > { %v3361_v1 = vpop.eup %3360  ;;  %v1290_v19 = vpack.c.bf16 %v3359_v55, %v3355_v39 }
 0x378   : > { %3362 = vpow2.f32 %v1086_v0  ;;  %v1291_v11 = vpack.c.bf16 %v3361_v1, %v3357_v46  ;;  %v4603_v57 = vadd.f32 %v3361_v1, %v3359_v55 }
 0x379   : > { %3364 = vpow2.f32 %v1088_v48  ;;  %1352 = vmatmul.bf16.gmra.mxu0 %v1290_v19  ;;  %966 = vmax.xlane.f32.xlu2 %v965_v31 }
 0x37a   : > { %1441 = vmatmul.bf16.gmra.mxu1 %v1291_v11  ;;  %3230 = vmatmul.msk.bf16.gmra.mxu2 %vm627_vm1, %v4413_v21 }
 0x37b   : > { %3245 = vmatmul.msk.bf16.gmra.mxu3 %vm627_vm1, %v4400_v32  ;;  %2366 = vrot.lane.b32.xlu0 %v4193_v13, %s3764_s13  ;;  %v925_v5 = vpop.xlane.xlu1 %924 }
 0x37c   : > { %v1012_v35 = vsub.f32 %v4439_v37, %v925_v5  ;;  %v1013_v39 = vsub.f32 %v4457_v2, %v925_v5 }
 0x37d   : > { %v4613_v46 = vpop.f32.mrf.mxu2  ;;  %v4615_v34 = vpop.f32.mrf.mxu3 }
 0x37e   : > { %v3363_v31 = vpop.eup %3362  ;;  %v1090_v19 = vmul.f32 1.442695, %v1012_v35  ;;  %v1092_v18 = vmul.f32 1.442695, %v1013_v39  ;;  %v968_v50 = vmax.f32 %v4587_v40, %v4615_v34 }
 0x37f   : > { %v3365_v55 = vpop.eup %3364 }
 0x380   : > { %3366 = vpow2.f32 %v1090_v19  ;;  %v4619_v32 = vadd.f32 %v3365_v55, %v3363_v31 }
 0x381   : > { %3368 = vpow2.f32 %v1092_v18  ;;  %2384 = vrot.lane.b32.xlu1 %v4294_v12, %s3764_s13  ;;  %969 = vmax.xlane.f32.xlu2 %v968_v50 }
 0x382   : > { %5808 = vst [vmem:[#allocation10_spill] sm:$0xff] %v4619_v32 }
 0x383   : > { %2382 = vrot.lane.b32.xlu0 %v4307_v16, %s3764_s13  ;;  %v928_v13 = vpop.xlane.xlu0 %927 }
 0x384   : > { %v1014_v37 = vsub.f32 %v4449_v59, %v928_v13  ;;  %v1015_v2 = vsub.f32 %v4467_v38, %v928_v13 }
 0x385   : > { %v4627_v0 = vpop.f32.mrf.mxu2  ;;  %v4629_v48 = vpop.f32.mrf.mxu3 }
 0x386   : > { %v3367_v1 = vpop.eup %3366  ;;  %v1094_v11 = vmul.f32 1.442695, %v1014_v37  ;;  %v1096_v5 = vmul.f32 1.442695, %v1015_v2 }
 0x387   : > { %v3369_v35 = vpop.eup %3368  ;;  %v1292_v39 = vpack.c.bf16 %v3367_v1, %v3363_v31 }
 0x388   : > { %3370 = vpow2.f32 %v1094_v11  ;;  %v1293_v12 = vpack.c.bf16 %v3369_v35, %v3365_v55  ;;  %v4631_v19 = vadd.f32 %v3369_v35, %v3367_v1 }
 0x389   : > { %3372 = vpow2.f32 %v1096_v5  ;;  %1357 = vmatmul.bf16.gmra.mxu0 %v1292_v39 }
 0x38a   : > { %1446 = vmatmul.bf16.gmra.mxu1 %v1293_v12  ;;  %3231 = vmatmul.msk.bf16.gmra.mxu2 %vm627_vm1, %v4347_v20 }
 0x38b   : > { %3246 = vmatmul.msk.bf16.gmra.mxu3 %vm627_vm1, %v4413_v21  ;;  %2364 = vrot.lane.b32.xlu0 %v4207_v63, %s3764_s13  ;;  %v931_v16 = vpop.xlane.xlu2 %930 }
 0x38c   : > { %v1016_v59 = vsub.f32 %v4455_v22, %v931_v16  ;;  %v1017_v38 = vsub.f32 %v4473_v33, %v931_v16 }
 0x38d   : > { %v4641_v31 = vpop.f32.mrf.mxu2  ;;  %v4643_v18 = vpop.f32.mrf.mxu3 }
 0x38e   : > { %v3371_v50 = vpop.eup %3370  ;;  %v1098_v55 = vmul.f32 1.442695, %v1016_v59  ;;  %v1100_v13 = vmul.f32 1.442695, %v1017_v38  ;;  %v974_v38 = vmax.f32 %v4613_v46, %v4643_v18 }
 0x38f   : > { %v3373_v37 = vpop.eup %3372 }
 0x390   : > { %3374 = vpow2.f32 %v1098_v55  ;;  %v4645_v2 = vadd.f32 %v3373_v37, %v3371_v50 }
 0x391   : > { %3376 = vpow2.f32 %v1100_v13 }
 0x392   : > { %5809 = vst [vmem:[#allocation11_spill] sm:$0xff] %v4645_v2 }
 0x393   : > { %2380 = vrot.lane.b32.xlu0 %v4314_v28, %s3764_s13  ;;  %v2371_v63 = vpop.permute.xlu1 %2370 }
 0x394   : > { %2413 = vmatpush.bf16.msra.mxu0 %v2371_v63 }
 0x395   : > { %v4649_v21 = vpop.f32.mrf.mxu2  ;;  %v4651_v22 = vpop.f32.mrf.mxu3 }
 0x396   : > { %v3375_v33 = vpop.eup %3374  ;;  %v2387_v1 = vpop.permute.xlu0 %2386 }
 0x397   : > { %v3377_v11 = vpop.eup %3376  ;;  %2502 = vmatpush.bf16.msra.mxu1 %v2387_v1  ;;  %v1294_v5 = vpack.c.bf16 %v3375_v33, %v3371_v50  ;;  %v977_v50 = vmax.f32 %v4627_v0, %v4651_v22 }
 0x398   : > { %v1295_v35 = vpack.c.bf16 %v3377_v11, %v3373_v37  ;;  %v4653_v39 = vadd.f32 %v3377_v11, %v3375_v33 }
 0x399   : > { %1362 = vmatmul.bf16.gmra.mxu0 %v1294_v5  ;;  %2368 = vrot.lane.b32.xlu2 %v4186_v3, %s3764_s13 }
 0x39a   : > { %5810 = vst [vmem:[#allocation12_spill] sm:$0xff] %v4653_v39  ;;  %1451 = vmatmul.bf16.gmra.mxu1 %v1295_v35  ;;  %3232 = vmatmul.msk.bf16.gmra.mxu2 %vm627_vm1, %v4353_v9 }
 0x39b   : > { %3247 = vmatmul.msk.bf16.gmra.mxu3 %vm627_vm1, %v4347_v20 }
 0x39d   : > { %v4661_v28 = vpop.f32.mrf.mxu2  ;;  %v4663_v12 = vpop.f32.mrf.mxu3 }
 0x39e   : > { %v980_v35 = vmax.f32 %v4641_v31, %v4663_v12 }
 0x3a5   : > { %v4665_v16 = vpop.f32.mrf.mxu2  ;;  %v4667_v59 = vpop.f32.mrf.mxu3 }
 0x3aa   : > { %3233 = vmatmul.msk.bf16.gmra.mxu2 %vm627_vm1, %v4332_v53 }
 0x3ab   : > { %3248 = vmatmul.msk.bf16.gmra.mxu3 %vm627_vm1, %v4353_v9  ;;  %975 = vmax.xlane.f32.xlu1 %v974_v38  ;;  %v971_v9 = vmax.f32 %v4597_v27, %v4629_v48 }
 0x3ad   : > { %v4675_v3 = vpop.f32.mrf.mxu2  ;;  %v4677_v20 = vpop.f32.mrf.mxu3 }
 0x3ae   : > { %v986_v37 = vmax.f32 %v4661_v28, %v4677_v20 }
 0x3b3   : > { %978 = vmax.xlane.f32.xlu1 %v977_v50 }
 0x3b5   : > { %v4681_v55 = vpop.f32.mrf.mxu2  ;;  %v4683_v13 = vpop.f32.mrf.mxu3 }
 0x3ba   : > { %3234 = vmatmul.msk.bf16.gmra.mxu2 %vm627_vm1, %v4425_v23 }
 0x3bb   : > { %3249 = vmatmul.msk.bf16.gmra.mxu3 %vm627_vm1, %v4332_v53  ;;  %987 = vmax.xlane.f32.xlu1 %v986_v37 }
 0x3bd   : > { %972 = vmax.xlane.f32.xlu0 %v971_v9  ;;  %v4693_v63 = vpop.f32.mrf.mxu3  ;;  %v4695_v33 = vpop.f32.mrf.mxu2 }
 0x3be   : > { %v934_v1 = vpop.xlane.xlu1 %933  ;;  %v4703_v9 = vpop.permute.xlu2 %1614 }
 0x3bf   : > { %v1018_v11 = vsub.f32 %v4465_v17, %v934_v1  ;;  %v1019_v5 = vsub.f32 %v4483_v52, %v934_v1 }
 0x3c1   : > { %v1102_v38 = vmul.f32 1.442695, %v1018_v11  ;;  %v1104_v50 = vmul.f32 1.442695, %v1019_v5  ;;  %v937_v53 = vpop.xlane.xlu0 %936  ;;  %v989_v5 = vmax.f32 %v4665_v16, %v4683_v13 }
 0x3c2   : > { %v1020_v37 = vsub.f32 %v4471_v10, %v937_v53  ;;  %v1021_v2 = vsub.f32 %v4491_v58, %v937_v53  ;;  %981 = vmax.xlane.f32.xlu2 %v980_v35 }
 0x3c3   : > { %3378 = vpow2.f32 %v1102_v38 }
 0x3c4   : > { %3380 = vpow2.f32 %v1104_v50  ;;  %v1106_v32 = vmul.f32 1.442695, %v1020_v37  ;;  %v1108_v39 = vmul.f32 1.442695, %v1021_v2 }
 0x3c5   : > { %v4705_v17 = vpop.f32.mrf.mxu3  ;;  %v4707_v52 = vpop.f32.mrf.mxu2 }
 0x3c6   : > { %3382 = vpow2.f32 %v1106_v32  ;;  %v949_v1 = vpop.xlane.xlu1 %948  ;;  %v995_v11 = vmax.f32 %v4681_v55, %v4705_v17 }
 0x3c7   : > { %3384 = vpow2.f32 %v1108_v39  ;;  %v1028_v10 = vsub.f32 %v4503_v54, %v949_v1  ;;  %v1029_v58 = vsub.f32 %v4519_v24, %v949_v1 }
 0x3c8   : > { %996 = vmax.xlane.f32.xlu1 %v995_v11 }
 0x3c9   : > { %v3379_v35 = vpop.eup %3378  ;;  %v1122_v2 = vmul.f32 1.442695, %v1028_v10  ;;  %v1124_v38 = vmul.f32 1.442695, %v1029_v58  ;;  %v946_v50 = vpop.xlane.xlu0 %945 }
 0x3ca   : > { %v3381_v53 = vpop.eup %3380  ;;  %v1026_v32 = vsub.f32 %v4497_v30, %v946_v50  ;;  %v1027_v37 = vsub.f32 %v4513_v6, %v946_v50  ;;  %3235 = vmatmul.msk.bf16.gmra.mxu2 %vm627_vm1, %v4355_v8  ;;  %990 = vmax.xlane.f32.xlu2 %v989_v5 }
 0x3cb   : > { %3386 = vpow2.f32 %v1122_v2  ;;  %3250 = vmatmul.msk.bf16.gmra.mxu3 %vm627_vm1, %v4425_v23  ;;  %v4721_v54 = vadd.f32 %v3381_v53, %v3379_v35 }
 0x3cc   : > { %v3383_v24 = vpop.eup %3382  ;;  %3388 = vpow2.f32 %v1124_v38  ;;  %v1118_v39 = vmul.f32 1.442695, %v1026_v32  ;;  %v1120_v1 = vmul.f32 1.442695, %v1027_v37  ;;  %v940_v11 = vpop.xlane.xlu2 %939 }
 0x3cd   : > { %5811 = vst [vmem:[#allocation13_spill] sm:$0xff] %v4721_v54  ;;  %v3385_v10 = vpop.eup %3384  ;;  %v1022_v30 = vsub.f32 %v4481_v44, %v940_v11  ;;  %v1023_v6 = vsub.f32 %v4499_v26, %v940_v11  ;;  %v4725_v58 = vpop.f32.mrf.mxu2  ;;  %v1296_v5 = vpack.c.bf16 %v3383_v24, %v3379_v35 }
 0x3ce   : > { %v4727_v50 = vpop.f32.mrf.mxu3  ;;  %3390 = vpow2.f32 %v1118_v39  ;;  %v1297_v2 = vpack.c.bf16 %v3385_v10, %v3381_v53  ;;  %v4729_v23 = vadd.f32 %v3385_v10, %v3383_v24 }
 0x3cf   : > { %3392 = vpow2.f32 %v1120_v1  ;;  %v1110_v54 = vmul.f32 1.442695, %v1022_v30  ;;  %v1112_v38 = vmul.f32 1.442695, %v1023_v6  ;;  %1367 = vmatmul.bf16.gmra.mxu0 %v1296_v5  ;;  %v1930_v32 = vmax.f32 %v4695_v33, %v4727_v50 }
 0x3d0   : > { %5812 = vst [vmem:[#allocation14_spill] sm:$0xff] %v4729_v23  ;;  %1456 = vmatmul.bf16.gmra.mxu1 %v1297_v2 }
 0x3d1   : > { %v4733_v44 = vpop.eup %3386  ;;  %3394 = vpow2.f32 %v1110_v54  ;;  %1616 = vrot.lane.b32.xlu0 %v4088_v36, %s3764_s13  ;;  %v955_v26 = vpop.xlane.xlu0 %954 }
 0x3d2   : > { %v4737_v35 = vpop.eup %3388  ;;  %3396 = vpow2.f32 %v1112_v38  ;;  %v1032_v53 = vsub.f32 %v4517_v56, %v955_v26  ;;  %v1033_v37 = vsub.f32 %v4545_v47, %v955_v26  ;;  %1931 = vmax.xlane.f32.xlu2 %v1930_v32 }
 0x3d3   : > { %v4743_v24 = vadd.f32 %v4737_v35, %v4733_v44 }
 0x3d4   : > { %v4745_v39 = vpop.eup %3390  ;;  %v1130_v1 = vmul.f32 1.442695, %v1032_v53  ;;  %v1132_v54 = vmul.f32 1.442695, %v1033_v37  ;;  %v943_v11 = vpop.xlane.xlu2 %942 }
 0x3d5   : > { %5813 = vst [vmem:[#allocation15_spill] sm:$0xff] %v4743_v24  ;;  %v4747_v10 = vpop.eup %3392  ;;  %v1024_v36 = vsub.f32 %v4489_v15, %v943_v11  ;;  %v1025_v30 = vsub.f32 %v4505_v45, %v943_v11  ;;  %v4751_v6 = vpop.f32.mrf.mxu2 }
 0x3d6   : > { %v4753_v56 = vpop.f32.mrf.mxu3  ;;  %3398 = vpow2.f32 %v1130_v1  ;;  %v1343_v47 = vpop.f32.mrf.mxu0  ;;  %v4757_v5 = vadd.f32 %v4747_v10, %v4745_v39 }
 0x3d7   : > { %v3395_v2 = vpop.eup %3394  ;;  %3400 = vpow2.f32 %v1132_v54  ;;  %v1114_v38 = vmul.f32 1.442695, %v1024_v36  ;;  %v1116_v32 = vmul.f32 1.442695, %v1025_v30  ;;  %v1432_v26 = vpop.f32.mrf.mxu1 }
 0x3d8   : > { %5814 = vst [vmem:[#allocation16_spill] sm:$0xff] %v4757_v5  ;;  %v3397_v53 = vpop.eup %3396  ;;  %v4759_v37 = vadd.f32 %v1432_v26, %v1343_v47 }
 0x3d9   : > { %3402 = vpow2.f32 %v1114_v38  ;;  %v958_v15 = vpop.xlane.xlu0 %957  ;;  %v4761_v45 = vadd.f32 %v3397_v53, %v3395_v2 }
 0x3da   : > { %5815 = vst [vmem:[#allocation17_spill] sm:$0xff] %v4759_v37  ;;  %3404 = vpow2.f32 %v1116_v32  ;;  %v1034_v1 = vsub.f32 %v4531_v60, %v958_v15  ;;  %v1035_v11 = vsub.f32 %v4561_v62, %v958_v15  ;;  %3236 = vmatmul.msk.bf16.gmra.mxu2 %vm627_vm1, %v4361_v29 }
 0x3db   : > { %5816 = vst [vmem:[#allocation18_spill] sm:$0xff] %v4761_v45  ;;  %3251 = vmatmul.msk.bf16.gmra.mxu3 %vm627_vm1, %v4355_v8  ;;  %v961_v54 = vpop.xlane.xlu1 %960 }
 0x3dc   : > { %v4769_v36 = vpop.eup %3398  ;;  %v1134_v30 = vmul.f32 1.442695, %v1034_v1  ;;  %v1136_v47 = vmul.f32 1.442695, %v1035_v11  ;;  %v1036_v38 = vsub.f32 %v4543_v42, %v961_v54  ;;  %v1037_v26 = vsub.f32 %v4573_v25, %v961_v54  ;;  %v952_v32 = vpop.xlane.xlu2 %951 }
 0x3dd   : > { %v4773_v37 = vpop.eup %3400  ;;  %v1030_v60 = vsub.f32 %v4511_v43, %v952_v32  ;;  %v1031_v62 = vsub.f32 %v4533_v61, %v952_v32  ;;  %v4777_v15 = vpop.f32.mrf.mxu2 }
 0x3de   : > { %3406 = vpow2.f32 %v1134_v30  ;;  %v1138_v8 = vmul.f32 1.442695, %v1036_v38  ;;  %v1140_v24 = vmul.f32 1.442695, %v1037_v26  ;;  %v4779_v23 = vpop.f32.mrf.mxu3  ;;  %v4781_v1 = vpop.f32.mrf.mxu0  ;;  %v4785_v42 = vadd.f32 %v4773_v37, %v4769_v36  ;;  %v5820_v30 = vld [vmem:[#allocation6_spill] sm:$0xff] }
 0x3df   : > { %5817 = vst [vmem:[#allocation19_spill] sm:$0xff] %v4781_v1  ;;  %v3403_v25 = vpop.eup %3402  ;;  %3408 = vpow2.f32 %v1136_v47  ;;  %v1126_v11 = vmul.f32 1.442695, %v1030_v60  ;;  %v1128_v54 = vmul.f32 1.442695, %v1031_v62  ;;  %v4787_v43 = vpop.f32.mrf.mxu1 }
 0x3e0   : > { %5818 = vst [vmem:[#allocation20_spill] sm:$0xff] %v4785_v42  ;;  %v3405_v61 = vpop.eup %3404  ;;  %3410 = vpow2.f32 %v1138_v8  ;;  %v1298_v32 = vpack.c.bf16 %v3403_v25, %v3395_v2 }
 0x3e1   : > { %5819 = vst [vmem:[#allocation21_spill] sm:$0xff] %v4787_v43  ;;  %3412 = vpow2.f32 %v1140_v24  ;;  %2378 = vrot.lane.b32.xlu1 %v5820_v30, %s3764_s13  ;;  %v1299_v38 = vpack.c.bf16 %v3405_v61, %v3397_v53  ;;  %v4791_v26 = vadd.f32 %v3405_v61, %v3403_v25  ;;  %v5825_v43 = vld [vmem:[#allocation5_spill] sm:$0xff] }
 0x3e2   : > { %3414 = vpow2.f32 %v1126_v11  ;;  %1372 = vmatmul.bf16.gmra.mxu0 %v1298_v32 }
 0x3e3   : > { %5821 = vst [vmem:[#allocation6_spill] sm:$0xff] %v4791_v26  ;;  %3416 = vpow2.f32 %v1128_v54  ;;  %1461 = vmatmul.bf16.gmra.mxu1 %v1299_v38 }
 0x3e4   : > { %v4793_v1 = vpop.eup %3406  ;;  %v964_v47 = vpop.xlane.xlu2 %963 }
 0x3e5   : > { %v4795_v60 = vpop.eup %3408  ;;  %v1038_v62 = vsub.f32 %v4559_v14, %v964_v47  ;;  %v1039_v2 = vsub.f32 %v4589_v51, %v964_v47  ;;  %v4799_v24 = vpop.f32.mrf.mxu2 }
 0x3e6   : > { %v4801_v8 = vpop.eup %3410  ;;  %v4803_v53 = vpop.f32.mrf.mxu3  ;;  %v4807_v11 = vadd.f32 %v4795_v60, %v4793_v1 }
 0x3e7   : > { %v1348_v25 = vpop.f32.mrf.mxu0  ;;  %v4809_v54 = vpop.eup %3412  ;;  %v1142_v61 = vmul.f32 1.442695, %v1038_v62  ;;  %v1144_v32 = vmul.f32 1.442695, %v1039_v2 }
 0x3e8   : > { %5822 = vst [vmem:[#allocation22_spill] sm:$0xff] %v4807_v11  ;;  %v1437_v30 = vpop.f32.mrf.mxu1  ;;  %v4811_v38 = vpop.eup %3414  ;;  %v4817_v51 = vadd.f32 %v4809_v54, %v4801_v8 }
 0x3e9   : > { %v4813_v14 = vadd.f32 %v1437_v30, %v1348_v25  ;;  %v4819_v47 = vpop.eup %3416  ;;  %3418 = vpow2.f32 %v1142_v61 }
 0x3ea   : > { %5824 = vst [vmem:[#allocation24_spill] sm:$0xff] %v4817_v51  ;;  %3420 = vpow2.f32 %v1144_v32  ;;  %3237 = vmatmul.msk.bf16.gmra.mxu2 %vm627_vm1, %v4703_v9  ;;  %2362 = vrot.lane.b32.xlu2 %v5825_v43, %s3764_s13  ;;  %v4827_v62 = vadd.f32 %v4819_v47, %v4811_v38 }
 0x3eb   : > { %5823 = vst [vmem:[#allocation23_spill] sm:$0xff] %v4813_v14  ;;  %3252 = vmatmul.msk.bf16.gmra.mxu3 %vm627_vm1, %v4361_v29  ;;  %v1300_v29 = vpack.c.bf16 %v4733_v44, %v4745_v39 }
 0x3ec   : > { %5826 = vst [vmem:[#allocation5_spill] sm:$0xff] %v4827_v62  ;;  %v967_v2 = vpop.xlane.xlu2 %966 }
 0x3ed   : > { %v2367_v25 = vpop.permute.xlu0 %2366  ;;  %v1040_v30 = vsub.f32 %v4571_v41, %v967_v2  ;;  %v1041_v61 = vsub.f32 %v4599_v7, %v967_v2  ;;  %v4833_v32 = vpop.f32.mrf.mxu2  ;;  %v1301_v41 = vpack.c.bf16 %v4737_v35, %v4747_v10 }
 0x3ee   : > { %v4835_v11 = vpop.f32.mrf.mxu3 }
 0x3ef   : > { %v4837_v42 = vpop.f32.mrf.mxu0  ;;  %v4839_v43 = vpop.eup %3418  ;;  %v1146_v26 = vmul.f32 1.442695, %v1040_v30  ;;  %v1148_v51 = vmul.f32 1.442695, %v1041_v61 }
 0x3f0   : > { %v4841_v62 = vpop.f32.mrf.mxu1  ;;  %v4843_v5 = vpop.eup %3420 }
 0x3f1   : > { %3422 = vpow2.f32 %v1146_v26  ;;  %v4851_v7 = vadd.f32 %v4843_v5, %v4839_v43 }
 0x3f2   : > { %3424 = vpow2.f32 %v1148_v51  ;;  %1377 = vmatmul.bf16.gmra.mxu0 %v1300_v29 }
 0x3f3   : > { %5827 = vst [vmem:[#allocation25_spill] sm:$0xff] %v4851_v7  ;;  %1466 = vmatmul.bf16.gmra.mxu1 %v1301_v41  ;;  %v2385_v2 = vpop.permute.xlu1 %2384 }
 0x3f4   : > { %2503 = vmatpush.bf16.msra.mxu1 %v2385_v2  ;;  %v970_v30 = vpop.xlane.xlu2 %969 }
 0x3f5   : > { %v2383_v61 = vpop.permute.xlu0 %2382  ;;  %v1042_v45 = vsub.f32 %v4587_v40, %v970_v30  ;;  %v1043_v14 = vsub.f32 %v4615_v34, %v970_v30  ;;  %v4855_v44 = vpop.f32.mrf.mxu2  ;;  %v983_v40 = vmax.f32 %v4649_v21, %v4667_v59 }
 0x3f6   : > { %v4857_v39 = vpop.f32.mrf.mxu3 }
 0x3f7   : > { %v1353_v35 = vpop.f32.mrf.mxu0  ;;  %v4859_v10 = vpop.eup %3422  ;;  %v1150_v26 = vmul.f32 1.442695, %v1042_v45  ;;  %v1152_v7 = vmul.f32 1.442695, %v1043_v14 }
 0x3f8   : > { %v1442_v51 = vpop.f32.mrf.mxu1  ;;  %v4861_v29 = vpop.eup %3424  ;;  %2504 = vmatpush.bf16.msra.mxu1 %v2383_v61 }
 0x3f9   : > { %v4863_v41 = vadd.f32 %v1442_v51, %v1353_v35  ;;  %3426 = vpow2.f32 %v1150_v26  ;;  %v4869_v34 = vadd.f32 %v4861_v29, %v4859_v10 }
 0x3fa   : > { %3428 = vpow2.f32 %v1152_v7  ;;  %v1302_v7 = vpack.c.bf16 %v4769_v36, %v4811_v38 }
 0x3fb   : > { %5828 = vst [vmem:[#allocation26_spill] sm:$0xff] %v4863_v41  ;;  %984 = vmax.xlane.f32.xlu0 %v983_v40  ;;  %3253 = vmatmul.msk.bf16.gmra.mxu3 %vm627_vm1, %v4703_v9  ;;  %v1303_v9 = vpack.c.bf16 %v4773_v37, %v4819_v47  ;;  %v992_v40 = vmax.f32 %v4675_v3, %v4693_v63 }
 0x3fc   : > { %5829 = vst [vmem:[#allocation27_spill] sm:$0xff] %v4869_v34  ;;  %v2369_v45 = vpop.permute.xlu2 %2368  ;;  %v1936_v47 = vmax.f32 %v4725_v58, %v4779_v23 }
 0x3fd   : > { %v2365_v14 = vpop.permute.xlu0 %2364  ;;  %v4873_v2 = vpop.f32.mrf.mxu2  ;;  %2414 = vmatpush.bf16.msra.mxu0 %v2369_v45 }
 0x3fe   : > { %v4875_v30 = vpop.f32.mrf.mxu3 }
 0x3ff   : > { %v4877_v61 = vpop.f32.mrf.mxu0  ;;  %v4879_v35 = vpop.eup %3426 }
 0x400   : > { %5830 = vst [vmem:[#allocation28_spill] sm:$0xff] %v4877_v61  ;;  %v4881_v26 = vpop.f32.mrf.mxu1  ;;  %v4883_v51 = vpop.eup %3428 }
 0x401   : > { %5831 = vst [vmem:[#allocation29_spill] sm:$0xff] %v4881_v26  ;;  %2415 = vmatpush.bf16.msra.mxu0 %v2367_v25  ;;  %v4893_v45 = vadd.f32 %v4883_v51, %v4879_v35  ;;  %v1933_v25 = vmax.f32 %v4707_v52, %v4753_v56 }
 0x402   : > { %1382 = vmatmul.bf16.gmra.mxu0 %v1302_v7 }
 0x403   : > { %5832 = vst [vmem:[#allocation30_spill] sm:$0xff] %v4893_v45  ;;  %1471 = vmatmul.bf16.gmra.mxu1 %v1303_v9  ;;  %993 = vmax.xlane.f32.xlu0 %v992_v40 }
 0x405   : > { %v2381_v34 = vpop.permute.xlu0 %2380  ;;  %v4895_v41 = vpop.f32.mrf.mxu2  ;;  %2416 = vmatpush.bf16.msra.mxu0 %v2365_v14 }
 0x406   : > { %v4897_v26 = vpop.f32.mrf.mxu3  ;;  %2505 = vmatpush.bf16.msra.mxu1 %v2381_v34  ;;  %v1304_v34 = vpack.c.bf16 %v4801_v8, %v4793_v1  ;;  %v1948_v1 = vmax.f32 %v4833_v32, %v4875_v30 }
 0x407   : > { %v1358_v36 = vpop.f32.mrf.mxu0 }
 0x408   : > { %v1447_v38 = vpop.f32.mrf.mxu1 }
 0x409   : > { %v4899_v37 = vadd.f32 %v1447_v38, %v1358_v36  ;;  %v1305_v36 = vpack.c.bf16 %v4809_v54, %v4795_v60  ;;  %v1939_v38 = vmax.f32 %v4751_v6, %v4803_v53  ;;  %v5837_v54 = vld [vmem:[#allocation3_spill] sm:$0xff] }
 0x40b   : > { %5833 = vst [vmem:[#allocation31_spill] sm:$0xff] %v4899_v37  ;;  %1937 = vmax.xlane.f32.xlu0 %v1936_v47  ;;  %1934 = vmax.xlane.f32.xlu1 %v1933_v25 }
 0x40d   : > { %v4905_v7 = vpop.f32.mrf.mxu2 }
 0x40e   : > { %v4907_v9 = vpop.f32.mrf.mxu3 }
 0x40f   : > { %v4909_v14 = vpop.f32.mrf.mxu0 }
 0x410   : > { %5834 = vst [vmem:[#allocation32_spill] sm:$0xff] %v4909_v14  ;;  %v4911_v40 = vpop.f32.mrf.mxu1 }
 0x411   : > { %5835 = vst [vmem:[#allocation33_spill] sm:$0xff] %v4911_v40 }
 0x412   : > { %1387 = vmatmul.bf16.gmra.mxu0 %v1304_v34 }
 0x413   : > { %1476 = vmatmul.bf16.gmra.mxu1 %v1305_v36  ;;  %1940 = vmax.xlane.f32.xlu2 %v1939_v38  ;;  %v1306_v38 = vpack.c.bf16 %v4859_v10, %v4839_v43 }
 0x415   : > { %v4921_v37 = vpop.f32.mrf.mxu2 }
 0x416   : > { %v4919_v47 = vpop.f32.mrf.mxu3 }
 0x417   : > { %v1363_v25 = vpop.f32.mrf.mxu0 }
 0x418   : > { %v1452_v45 = vpop.f32.mrf.mxu1 }
 0x419   : > { %v4923_v14 = vadd.f32 %v1452_v45, %v1363_v25  ;;  %v1307_v45 = vpack.c.bf16 %v4861_v29, %v4843_v5  ;;  %v1951_v25 = vmax.f32 %v4855_v44, %v4897_v26  ;;  %v1957_v29 = vmax.f32 %v4895_v41, %v4919_v47 }
 0x41b   : > { %5836 = vst [vmem:[#allocation34_spill] sm:$0xff] %v4923_v14  ;;  %1949 = vmax.xlane.f32.xlu2 %v1948_v1 }
 0x41d   : > { %v4939_v1 = vpop.f32.mrf.mxu2 }
 0x41e   : > { %v4927_v8 = vpop.f32.mrf.mxu3  ;;  %v976_v60 = vpop.xlane.xlu1 %975 }
 0x41f   : > { %1620 = vrot.lane.b32.xlu0 %v5837_v54, %s3764_s13  ;;  %v1046_v34 = vsub.f32 %v4613_v46, %v976_v60  ;;  %v1047_v36 = vsub.f32 %v4643_v18, %v976_v60  ;;  %v5838_v46 = vld [vmem:[#allocation2_spill] sm:$0xff] }
 0x421   : > { %v1158_v14 = vmul.f32 1.442695, %v1046_v34  ;;  %v1160_v40 = vmul.f32 1.442695, %v1047_v36 }
 0x422   : > { %1392 = vmatmul.bf16.gmra.mxu0 %v1306_v38 }
 0x423   : > { %1481 = vmatmul.bf16.gmra.mxu1 %v1307_v45  ;;  %1952 = vmax.xlane.f32.xlu2 %v1951_v25  ;;  %3430 = vpow2.f32 %v1158_v14 }
 0x424   : > { %1618 = vrot.lane.b32.xlu1 %v5838_v46, %s3764_s13  ;;  %3432 = vpow2.f32 %v1160_v40 }
 0x425   : > { %v4953_v14 = vpop.f32.mrf.mxu2 }
 0x426   : > { %v4943_v18 = vpop.f32.mrf.mxu3  ;;  %v979_v43 = vpop.xlane.xlu1 %978 }
 0x427   : > { %v1048_v5 = vsub.f32 %v4627_v0, %v979_v43  ;;  %v1049_v10 = vsub.f32 %v4651_v22, %v979_v43 }
 0x429   : > { %v4949_v60 = vpop.eup %3430  ;;  %v1162_v54 = vmul.f32 1.442695, %v1048_v5  ;;  %v1164_v34 = vmul.f32 1.442695, %v1049_v10 }
 0x42a   : > { %v4951_v36 = vpop.eup %3432 }
 0x42b   : > { %1958 = vmax.xlane.f32.xlu2 %v1957_v29  ;;  %3434 = vpow2.f32 %v1162_v54  ;;  %v4957_v40 = vadd.f32 %v4951_v36, %v4949_v60 }
 0x42c   : > { %3436 = vpow2.f32 %v1164_v34 }
 0x42d   : > { %5839 = vst [vmem:[#allocation3_spill] sm:$0xff] %v4957_v40 }
 0x42e   : > { %v4959_v0 = vpop.f32.mrf.mxu3  ;;  %v988_v22 = vpop.xlane.xlu1 %987 }
 0x42f   : > { %5840 = vst [vmem:[#allocation2_spill] sm:$0xff] %v4959_v0  ;;  %v1054_v38 = vsub.f32 %v4661_v28, %v988_v22  ;;  %v1055_v45 = vsub.f32 %v4677_v20, %v988_v22  ;;  %v1966_v5 = vmax.f32 %v4939_v1, %v4959_v0 }
 0x430   : > { %v973_v25 = vpop.xlane.xlu0 %972 }
 0x431   : > { %v1044_v46 = vsub.f32 %v4597_v27, %v973_v25  ;;  %v1045_v43 = vsub.f32 %v4629_v48, %v973_v25  ;;  %v4967_v10 = vpop.eup %3434  ;;  %v1174_v29 = vmul.f32 1.442695, %v1054_v38  ;;  %v1176_v54 = vmul.f32 1.442695, %v1055_v45  ;;  %v4975_v48 = vpop.f32.mrf.mxu2 }
 0x432   : > { %v4969_v34 = vpop.eup %3436 }
 0x433   : > { %v1154_v40 = vmul.f32 1.442695, %v1044_v46  ;;  %v1156_v61 = vmul.f32 1.442695, %v1045_v43  ;;  %1967 = vmax.xlane.f32.xlu2 %v1966_v5  ;;  %3438 = vpow2.f32 %v1174_v29  ;;  %v4973_v28 = vadd.f32 %v4969_v34, %v4967_v10 }
 0x434   : > { %3440 = vpow2.f32 %v1176_v54 }
 0x435   : > { %5841 = vst [vmem:[#allocation35_spill] sm:$0xff] %v4973_v28  ;;  %v982_v27 = vpop.xlane.xlu2 %981  ;;  %3442 = vpow2.f32 %v1154_v40 }
 0x436   : > { %v1050_v20 = vsub.f32 %v4641_v31, %v982_v27  ;;  %v1051_v22 = vsub.f32 %v4663_v12, %v982_v27  ;;  %v4979_v38 = vpop.f32.mrf.mxu3  ;;  %3444 = vpow2.f32 %v1156_v61 }
 0x438   : > { %v1166_v45 = vmul.f32 1.442695, %v1050_v20  ;;  %v1168_v25 = vmul.f32 1.442695, %v1051_v22 }
 0x439   : > { %v4981_v46 = vpop.eup %3438 }
 0x43a   : > { %3446 = vpow2.f32 %v1166_v45  ;;  %v4983_v43 = vpop.eup %3440 }
 0x43b   : > { %3448 = vpow2.f32 %v1168_v25  ;;  %v997_v5 = vpop.xlane.xlu1 %996  ;;  %v3443_v29 = vpop.eup %3442  ;;  %v4989_v31 = vadd.f32 %v4983_v43, %v4981_v46 }
 0x43c   : > { %v1060_v54 = vsub.f32 %v4681_v55, %v997_v5  ;;  %v1061_v40 = vsub.f32 %v4705_v17, %v997_v5  ;;  %v3445_v12 = vpop.eup %3444  ;;  %v1308_v61 = vpack.c.bf16 %v3443_v29, %v4879_v35  ;;  %v5003_v35 = vpop.f32.mrf.mxu2 }
 0x43d   : > { %5842 = vst [vmem:[#allocation36_spill] sm:$0xff] %v4989_v31  ;;  %v991_v27 = vpop.xlane.xlu2 %990  ;;  %v1309_v45 = vpack.c.bf16 %v3445_v12, %v4883_v51  ;;  %v4999_v5 = vadd.f32 %v3445_v12, %v3443_v29  ;;  %v5015_v12 = vpop.f32.mrf.mxu1 }
 0x43e   : > { %v1186_v20 = vmul.f32 1.442695, %v1060_v54  ;;  %v1188_v22 = vmul.f32 1.442695, %v1061_v40  ;;  %v1056_v25 = vsub.f32 %v4665_v16, %v991_v27  ;;  %v4994_v28 = vpop.f32.mrf.mxu3  ;;  %1397 = vmatmul.bf16.gmra.mxu0 %v1308_v61  ;;  %v1057_v55 = vsub.f32 %v4683_v13, %v991_v27  ;;  %v5011_v40 = vpop.f32.mrf.mxu0  ;;  %5846 = vst [vmem:[#allocation40_spill] sm:$0xff] %v5015_v12 }
 0x43f   : > { %v1972_v17 = vmax.f32 %v4975_v48, %v4994_v28  ;;  %5843 = vst [vmem:[#allocation37_spill] sm:$0xff] %v4999_v5  ;;  %1486 = vmatmul.bf16.gmra.mxu1 %v1309_v45  ;;  %v1310_v12 = vpack.c.bf16 %v4967_v10, %v4949_v60 }
 0x440   : > { %v5001_v31 = vpop.eup %3446  ;;  %3450 = vpow2.f32 %v1186_v20  ;;  %v1178_v54 = vmul.f32 1.442695, %v1056_v25  ;;  %v1180_v16 = vmul.f32 1.442695, %v1057_v55  ;;  %5845 = vst [vmem:[#allocation39_spill] sm:$0xff] %v5011_v40  ;;  %v1945_v55 = vmax.f32 %v4799_v24, %v4857_v39 }
 0x441   : > { %v5005_v51 = vpop.eup %3448  ;;  %3452 = vpow2.f32 %v1188_v22  ;;  %1973 = vmax.xlane.f32.xlu2 %v1972_v17 }
 0x442   : > { %3454 = vpow2.f32 %v1178_v54  ;;  %v5009_v13 = vadd.f32 %v5005_v51, %v5001_v31 }
 0x443   : > { %3456 = vpow2.f32 %v1180_v16  ;;  %v1617_v29 = vpop.permute.xlu0 %1616 }
 0x444   : > { %5844 = vst [vmem:[#allocation38_spill] sm:$0xff] %v5009_v13  ;;  %3238 = vmatmul.msk.bf16.gmra.mxu2 %vm627_vm1, %v1617_v29  ;;  %3254 = vmatmul.msk.bf16.gmra.mxu3 %vm627_vm1, %v1617_v29 }
 0x445   : > { %v1932_v61 = vpop.xlane.xlu2 %1931 }
 0x446   : > { %v5017_v27 = vpop.eup %3450  ;;  %v2026_v20 = vsub.f32 %v4695_v33, %v1932_v61  ;;  %v2027_v22 = vsub.f32 %v4727_v50, %v1932_v61  ;;  %v5021_v45 = vpop.f32.mrf.mxu3 }
 0x447   : > { %v5023_v25 = vpop.eup %3452  ;;  %v5035_v33 = vpop.f32.mrf.mxu2 }
 0x448   : > { %v5027_v17 = vpop.eup %3454  ;;  %v2090_v54 = vmul.f32 1.442695, %v2026_v20  ;;  %v2092_v16 = vmul.f32 1.442695, %v2027_v22  ;;  %v5031_v29 = vadd.f32 %v5023_v25, %v5017_v27  ;;  %5848 = vst [vmem:[#allocation42_spill] sm:$0xff] %v5035_v33  ;;  %v1942_v20 = vmax.f32 %v4777_v15, %v4835_v11 }
 0x449   : > { %v5033_v5 = vpop.eup %3456  ;;  %1946 = vmax.xlane.f32.xlu0 %v1945_v55  ;;  %v1311_v55 = vpack.c.bf16 %v4969_v34, %v4951_v36  ;;  %v1954_v34 = vmax.f32 %v4873_v2, %v4907_v9 }
 0x44a   : > { %5847 = vst [vmem:[#allocation41_spill] sm:$0xff] %v5031_v29  ;;  %3458 = vpow2.f32 %v2090_v54  ;;  %v5039_v50 = vadd.f32 %v5033_v5, %v5027_v17 }
 0x44b   : > { %3460 = vpow2.f32 %v2092_v16 }
 0x44c   : > { %5849 = vst [vmem:[#allocation43_spill] sm:$0xff] %v5039_v50  ;;  %v1368_v61 = vpop.f32.mrf.mxu0 }
 0x44d   : > { %v1457_v22 = vpop.f32.mrf.mxu1  ;;  %v2363_v40 = vpop.permute.xlu2 %2362 }
 0x44e   : > { %v5045_v29 = vadd.f32 %v1457_v22, %v1368_v61  ;;  %v5049_v54 = vpop.f32.mrf.mxu3  ;;  %1943 = vmax.xlane.f32.xlu1 %v1942_v20  ;;  %1402 = vmatmul.bf16.gmra.mxu0 %v1310_v12  ;;  %v1963_v20 = vmax.f32 %v4921_v37, %v4943_v18  ;;  %v5855_v22 = vld [vmem:[#allocation4_spill] sm:$0xff] }
 0x44f   : > { %5851 = vst [vmem:[#allocation45_spill] sm:$0xff] %v5049_v54  ;;  %v1978_v16 = vmax.f32 %v5035_v33, %v5049_v54  ;;  %1491 = vmatmul.bf16.gmra.mxu1 %v1311_v55  ;;  %2417 = vmatpush.bf16.msra.mxu0 %v2363_v40  ;;  %v5061_v10 = vpop.f32.mrf.mxu2 }
 0x450   : > { %5850 = vst [vmem:[#allocation44_spill] sm:$0xff] %v5045_v29  ;;  %v5053_v50 = vpop.eup %3458 }
 0x451   : > { %v5055_v13 = vpop.eup %3460  ;;  %1979 = vmax.xlane.f32.xlu2 %v1978_v16 }
 0x452   : > { %v5059_v60 = vadd.f32 %v5055_v13, %v5053_v50 }
 0x453   : > { %v2379_v36 = vpop.permute.xlu1 %2378 }
 0x454   : > { %5852 = vst [vmem:[#allocation46_spill] sm:$0xff] %v5059_v60  ;;  %2506 = vmatpush.bf16.msra.mxu1 %v2379_v36  ;;  %v5067_v61 = vpop.f32.mrf.mxu0 }
 0x455   : > { %5853 = vst [vmem:[#allocation47_spill] sm:$0xff] %v5067_v61  ;;  %v5069_v40 = vpop.f32.mrf.mxu1 }
 0x456   : > { %v5065_v12 = vpop.f32.mrf.mxu3  ;;  %1955 = vmax.xlane.f32.xlu1 %v1954_v34  ;;  %5854 = vst [vmem:[#allocation48_spill] sm:$0xff] %v5069_v40  ;;  %v1969_v40 = vmax.f32 %v4953_v14, %v4979_v38 }
 0x457   : > { %v5075_v55 = vpop.f32.mrf.mxu2 }
 0x45d   : > { %1622 = vrot.lane.b32.xlu0 %v5855_v22, %s3764_s13 }
 0x45e   : > { %v5077_v16 = vpop.f32.mrf.mxu3  ;;  %1964 = vmax.xlane.f32.xlu1 %v1963_v20  ;;  %v1975_v20 = vmax.f32 %v5003_v35, %v5021_v45 }
 0x45f   : > { %v1373_v36 = vpop.f32.mrf.mxu0  ;;  %v1984_v60 = vmax.f32 %v5075_v55, %v5077_v16 }
 0x460   : > { %v1462_v34 = vpop.f32.mrf.mxu1 }
 0x461   : > { %v5081_v29 = vadd.f32 %v1462_v34, %v1373_v36  ;;  %1985 = vmax.xlane.f32.xlu2 %v1984_v60 }
 0x463   : > { %5856 = vst [vmem:[#allocation4_spill] sm:$0xff] %v5081_v29 }
 0x466   : > { %1970 = vmax.xlane.f32.xlu1 %v1969_v40 }
 0x467   : > { %v5085_v61 = vpop.f32.mrf.mxu0 }
 0x468   : > { %5857 = vst [vmem:[#allocation49_spill] sm:$0xff] %v5085_v61  ;;  %v5087_v22 = vpop.f32.mrf.mxu1 }
 0x469   : > { %5858 = vst [vmem:[#allocation50_spill] sm:$0xff] %v5087_v22  ;;  %1197 = vadd.xlane.f32.xlu2 %v4565_v49  ;;  %v1981_v49 = vmax.f32 %v5061_v10, %v5065_v12 }
 0x46e   : > { %v985_v54 = vpop.xlane.xlu0 %984  ;;  %1976 = vmax.xlane.f32.xlu1 %v1975_v20 }
 0x46f   : > { %v1052_v33 = vsub.f32 %v4649_v21, %v985_v54  ;;  %v1053_v36 = vsub.f32 %v4667_v59, %v985_v54  ;;  %v1378_v60 = vpop.f32.mrf.mxu0 }
 0x470   : > { %v1467_v34 = vpop.f32.mrf.mxu1 }
 0x471   : > { %v1170_v29 = vmul.f32 1.442695, %v1052_v33  ;;  %v1172_v0 = vmul.f32 1.442695, %v1053_v36  ;;  %v5094_v40 = vadd.f32 %v1467_v34, %v1378_v60  ;;  %v5104_v33 = vpop.f32.mrf.mxu3  ;;  %v5107_v34 = vpop.f32.mrf.mxu2 }
 0x473   : > { %5859 = vst [vmem:[#allocation51_spill] sm:$0xff] %v5094_v40  ;;  %3462 = vpow2.f32 %v1170_v29 }
 0x474   : > { %3464 = vpow2.f32 %v1172_v0 }
 0x476   : > { %v994_v22 = vpop.xlane.xlu0 %993  ;;  %1982 = vmax.xlane.f32.xlu1 %v1981_v49 }
 0x477   : > { %v1058_v61 = vsub.f32 %v4675_v3, %v994_v22  ;;  %v1059_v20 = vsub.f32 %v4693_v63, %v994_v22  ;;  %v5100_v21 = vpop.f32.mrf.mxu0  ;;  %v1987_v63 = vmax.f32 %v5107_v34, %v5104_v33 }
 0x478   : > { %5860 = vst [vmem:[#allocation52_spill] sm:$0xff] %v5100_v21  ;;  %v5102_v59 = vpop.f32.mrf.mxu1 }
 0x479   : > { %5861 = vst [vmem:[#allocation53_spill] sm:$0xff] %v5102_v59  ;;  %v3463_v54 = vpop.eup %3462  ;;  %v1182_v36 = vmul.f32 1.442695, %v1058_v61  ;;  %v1184_v60 = vmul.f32 1.442695, %v1059_v20 }
 0x47a   : > { %v3465_v29 = vpop.eup %3464  ;;  %v1312_v0 = vpack.c.bf16 %v3463_v54, %v5001_v31 }
 0x47b   : > { %3466 = vpow2.f32 %v1182_v36  ;;  %v1313_v49 = vpack.c.bf16 %v3465_v29, %v5005_v51  ;;  %v5110_v3 = vadd.f32 %v3465_v29, %v3463_v54 }
 0x47c   : > { %3468 = vpow2.f32 %v1184_v60  ;;  %1407 = vmatmul.bf16.gmra.mxu0 %v1312_v0 }
 0x47d   : > { %1496 = vmatmul.bf16.gmra.mxu1 %v1313_v49 }
 0x47e   : > { %v1938_v22 = vpop.xlane.xlu0 %1937  ;;  %1988 = vmax.xlane.f32.xlu1 %v1987_v63  ;;  %v1935_v31 = vpop.xlane.xlu1 %1934 }
 0x47f   : > { %v2030_v61 = vsub.f32 %v4725_v58, %v1938_v22  ;;  %v2031_v20 = vsub.f32 %v4779_v23, %v1938_v22  ;;  %v1383_v40 = vpop.f32.mrf.mxu0  ;;  %v2028_v36 = vsub.f32 %v4707_v52, %v1935_v31  ;;  %v2029_v51 = vsub.f32 %v4753_v56, %v1935_v31  ;;  %v5128_v52 = vpop.f32.mrf.mxu3 }
 0x480   : > { %v1472_v54 = vpop.f32.mrf.mxu1  ;;  %v1960_v23 = vmax.f32 %v4905_v7, %v4927_v8  ;;  %v5133_v22 = vpop.f32.mrf.mxu2 }
 0x481   : > { %v5118_v29 = vpop.eup %3466  ;;  %v2098_v60 = vmul.f32 1.442695, %v2030_v61  ;;  %v2100_v0 = vmul.f32 1.442695, %v2031_v20  ;;  %v5120_v59 = vadd.f32 %v1472_v54, %v1383_v40  ;;  %v2094_v63 = vmul.f32 1.442695, %v2028_v36 }
 0x482   : > { %v5122_v49 = vpop.eup %3468  ;;  %v2096_v21 = vmul.f32 1.442695, %v2029_v51  ;;  %v5863_v40 = vld [vmem:[#allocation9_spill] sm:$0xff] }
 0x483   : > { %5862 = vst [vmem:[#allocation54_spill] sm:$0xff] %v5120_v59  ;;  %3470 = vpow2.f32 %v2098_v60  ;;  %v5126_v58 = vadd.f32 %v5122_v49, %v5118_v29 }
 0x484   : > { %3472 = vpow2.f32 %v2100_v0 }
 0x485   : > { %3474 = vpow2.f32 %v2094_v63 }
 0x486   : > { %3476 = vpow2.f32 %v2096_v21  ;;  %v1941_v56 = vpop.xlane.xlu2 %1940  ;;  %1200 = vadd.xlane.f32.xlu1 %v5863_v40  ;;  %v1314_v21 = vpack.c.bf16 %v5027_v17, %v4981_v46  ;;  %v3321_v40 = vld [vmem:[%s5789_s3 + $0x18] sm:$0xff]  ;;  %v3319_v46 = vld [vmem:[%s5789_s3 + $0x8] sm:$0xff] }
 0x487   : > { %v2032_v61 = vsub.f32 %v4751_v6, %v1941_v56  ;;  %v2033_v20 = vsub.f32 %v4803_v53, %v1941_v56  ;;  %1961 = vmax.xlane.f32.xlu0 %v1960_v23  ;;  %v5137_v31 = vpop.f32.mrf.mxu0  ;;  %v1315_v6 = vpack.c.bf16 %v5033_v5, %v4983_v43  ;;  %v1990_v23 = vmax.f32 %v5133_v22, %v5128_v52  ;;  %v5163_v5 = vpop.f32.mrf.mxu3 }
 0x488   : > { %5864 = vst [vmem:[#allocation9_spill] sm:$0xff] %v5137_v31  ;;  %v5139_v36 = vpop.f32.mrf.mxu1  ;;  %3322 = vmatpush.bf16.msra.mxu2 %v3321_v40  ;;  %3324 = vmatpush.bf16.msra.mxu3 %v3319_v46 }
 0x489   : > { %5865 = vst [vmem:[#allocation55_spill] sm:$0xff] %v5139_v36  ;;  %v5141_v51 = vpop.eup %3470  ;;  %v2102_v54 = vmul.f32 1.442695, %v2032_v61  ;;  %v2104_v60 = vmul.f32 1.442695, %v2033_v20  ;;  %2734 = vmatpush.bf16.msrb.mxu0 %v3321_v40  ;;  %2883 = vmatpush.bf16.msrb.mxu1 %v3319_v46 }
 0x48a   : > { %v5143_v0 = vpop.eup %3472 }
 0x48b   : > { %v3475_v63 = vpop.eup %3474  ;;  %3478 = vpow2.f32 %v2102_v54  ;;  %v2224_v56 = vadd.f32 %v5143_v0, %v5141_v51 }
 0x48c   : > { %v3477_v53 = vpop.eup %3476  ;;  %3480 = vpow2.f32 %v2104_v60  ;;  %1412 = vmatmul.bf16.gmra.mxu0 %v1314_v21  ;;  %v5165_v60 = vpop.f32.mrf.mxu2 }
 0x48d   : > { %1501 = vmatmul.bf16.gmra.mxu1 %v1315_v6  ;;  %v5159_v17 = vadd.f32 %v3477_v53, %v3475_v63 }
 0x48e   : > { %v5161_v43 = vpop.xlane.xlu2 %1949  ;;  %1991 = vmax.xlane.f32.xlu1 %v1990_v23  ;;  %v1993_v23 = vmax.f32 %v5165_v60, %v5163_v5 }
 0x48f   : > { %2225 = vadd.xlane.f32.xlu0 %v2224_v56  ;;  %v1388_v61 = vpop.f32.mrf.mxu0  ;;  %v5180_v46 = vpop.f32.mrf.mxu3 }
 0x490   : > { %v1477_v20 = vpop.f32.mrf.mxu1 }
 0x491   : > { %v3479_v54 = vpop.eup %3478  ;;  %v5167_v21 = vadd.f32 %v1477_v20, %v1388_v61 }
 0x492   : > { %v3481_v6 = vpop.eup %3480 }
 0x493   : > { %5866 = vst [vmem:[#allocation56_spill] sm:$0xff] %v5167_v21  ;;  %v2227_v59 = vadd.f32 %v3481_v6, %v3479_v54 }
 0x494   : > { %v5184_v61 = vpop.f32.mrf.mxu2 }
 0x495   : > { %2228 = vadd.xlane.f32.xlu2 %v2227_v59  ;;  %v1316_v59 = vpack.c.bf16 %v5017_v27, %v5118_v29  ;;  %v1996_v20 = vmax.f32 %v5184_v61, %v5180_v46  ;;  %v1621_v27 = vpop.permute.xlu0 %1620  ;;  %v2315_v29 = vpack.c.bf16 %v3477_v53, %v5055_v13  ;;  %v2317_v13 = vpack.c.bf16 %v3481_v6, %v5143_v0 }
 0x496   : > { %1206 = vadd.xlane.f32.xlu1 %v4603_v57  ;;  %v1619_v56 = vpop.permute.xlu1 %1618  ;;  %v5175_v40 = vpop.xlane.xlu2 %1952  ;;  %v1317_v57 = vpack.c.bf16 %v5023_v25, %v5122_v49  ;;  %v2314_v25 = vpack.c.bf16 %v3475_v63, %v5053_v50  ;;  %v2316_v50 = vpack.c.bf16 %v3479_v54, %v5141_v51 }
 0x497   : > { %1994 = vmax.xlane.f32.xlu0 %v1993_v23  ;;  %v5172_v36 = vpop.f32.mrf.mxu0  ;;  %3239 = vmatmul.msk.bf16.gmra.mxu2 %vm627_vm1, %v1619_v56 }
 0x498   : > { %v5177_v31 = vpop.f32.mrf.mxu1  ;;  %3255 = vmatmul.msk.bf16.gmra.mxu3 %vm627_vm1, %v1619_v56 }
 0x499   : > { %5867 = vst [vmem:[#allocation57_spill] sm:$0xff] %v5177_v31 }
 0x49c   : > { %1417 = vmatmul.bf16.gmra.mxu0 %v1316_v59 }
 0x49d   : > { %1506 = vmatmul.bf16.gmra.mxu1 %v1317_v57  ;;  %1203 = vadd.xlane.f32.xlu2 %v4593_v4 }
 0x49e   : > { %1997 = vmax.xlane.f32.xlu1 %v1996_v20  ;;  %v5193_v31 = vpop.xlane.xlu2 %1958 }
 0x49f   : > { %v1393_v23 = vpop.f32.mrf.mxu0 }
 0x4a0   : > { %v1482_v56 = vpop.f32.mrf.mxu1 }
 0x4a1   : > { %v5191_v21 = vadd.f32 %v1482_v56, %v1393_v23 }
 0x4a3   : > { %5868 = vst [vmem:[#allocation58_spill] sm:$0xff] %v5191_v21 }
 0x4a6   : > { %1212 = vadd.xlane.f32.xlu1 %v4631_v19  ;;  %v5200_v49 = vpop.xlane.xlu2 %1967 }
 0x4a7   : > { %3240 = vmatmul.msk.bf16.gmra.mxu2 %vm627_vm1, %v1621_v27  ;;  %v5202_v4 = vpop.f32.mrf.mxu0 }
 0x4a8   : > { %3256 = vmatmul.msk.bf16.gmra.mxu3 %vm627_vm1, %v1621_v27  ;;  %v5204_v57 = vpop.f32.mrf.mxu1 }
 0x4ac   : > { %2418 = vmatmul.bf16.vlgmr.msra.gmra.mxu0 %v2314_v25 }
 0x4ad   : > { %2507 = vmatmul.bf16.vlgmr.msra.gmra.mxu1 %v2315_v29 }
 0x4b4   : > { %v1974_v59 = vpop.xlane.xlu2 %1973 }
 0x4b5   : > { %v2054_v20 = vsub.f32 %v4975_v48, %v1974_v59  ;;  %v2055_v19 = vsub.f32 %v4994_v28, %v1974_v59  ;;  %v5216_v59 = vpop.f32.mrf.mxu2 }
 0x4b7   : > { %v2146_v23 = vmul.f32 1.442695, %v2054_v20  ;;  %v2148_v56 = vmul.f32 1.442695, %v2055_v19  ;;  %v5218_v20 = vpop.f32.mrf.mxu3 }
 0x4b9   : > { %3482 = vpow2.f32 %v2146_v23 }
 0x4ba   : > { %3484 = vpow2.f32 %v2148_v56 }
 0x4bb   : > { %v1398_v63 = vpop.f32.mrf.mxu0 }
 0x4bc   : > { %v1947_v53 = vpop.xlane.xlu0 %1946  ;;  %2423 = vmatmul.bf16.gmra.mxu0 %v2316_v50  ;;  %v1487_v27 = vpop.f32.mrf.mxu1 }
 0x4bd   : > { %v2036_v25 = vsub.f32 %v4799_v24, %v1947_v53  ;;  %v2037_v29 = vsub.f32 %v4857_v39, %v1947_v53  ;;  %2512 = vmatmul.bf16.gmra.mxu1 %v2317_v13  ;;  %v5212_v48 = vadd.f32 %v1487_v27, %v1398_v63  ;;  %v2040_v53 = vsub.f32 %v4855_v44, %v5175_v40 }
 0x4bf   : > { %5869 = vst [vmem:[#allocation59_spill] sm:$0xff] %v5212_v48  ;;  %v5214_v28 = vpop.eup %3482  ;;  %v2110_v51 = vmul.f32 1.442695, %v2036_v25  ;;  %v2112_v54 = vmul.f32 1.442695, %v2037_v29 }
 0x4c0   : > { %v5220_v0 = vpop.eup %3484 }
 0x4c1   : > { %3486 = vpow2.f32 %v2110_v51  ;;  %v1944_v6 = vpop.xlane.xlu1 %1943  ;;  %v5224_v24 = vadd.f32 %v5220_v0, %v5214_v28 }
 0x4c2   : > { %3488 = vpow2.f32 %v2112_v54  ;;  %v2034_v39 = vsub.f32 %v4777_v15, %v1944_v6  ;;  %v2035_v19 = vsub.f32 %v4835_v11, %v1944_v6  ;;  %v2041_v15 = vsub.f32 %v4897_v26, %v5175_v40 }
 0x4c3   : > { %v5228_v50 = vpop.f32.mrf.mxu0  ;;  %v2118_v6 = vmul.f32 1.442695, %v2040_v53  ;;  %v2039_v26 = vsub.f32 %v4875_v30, %v5161_v43  ;;  %v5873_v30 = vld [vmem:[#allocation10_spill] sm:$0xff] }
 0x4c4   : > { %v2106_v23 = vmul.f32 1.442695, %v2034_v39  ;;  %v2108_v56 = vmul.f32 1.442695, %v2035_v19  ;;  %5870 = vst [vmem:[#allocation60_spill] sm:$0xff] %v5228_v50  ;;  %v5230_v13 = vpop.f32.mrf.mxu1 }
 0x4c5   : > { %5871 = vst [vmem:[#allocation61_spill] sm:$0xff] %v5230_v13  ;;  %v2120_v19 = vmul.f32 1.442695, %v2041_v15  ;;  %v5872_v15 = vld [vmem:[#allocation12_spill] sm:$0xff] }
 0x4c6   : > { %3490 = vpow2.f32 %v2106_v23 }
 0x4c7   : > { %v3487_v63 = vpop.eup %3486  ;;  %3492 = vpow2.f32 %v2108_v56  ;;  %v5234_v27 = vpop.f32.mrf.mxu2  ;;  %v2038_v56 = vsub.f32 %v4833_v32, %v5161_v43 }
 0x4c8   : > { %v5236_v25 = vpop.f32.mrf.mxu3  ;;  %v3489_v29 = vpop.eup %3488  ;;  %3494 = vpow2.f32 %v2118_v6 }
 0x4c9   : > { %v2002_v11 = vmax.f32 %v5234_v27, %v5236_v25  ;;  %v2233_v51 = vadd.f32 %v3489_v29, %v3487_v63  ;;  %v1956_v54 = vpop.xlane.xlu1 %1955  ;;  %3496 = vpow2.f32 %v2120_v19  ;;  %v2114_v53 = vmul.f32 1.442695, %v2038_v56 }
 0x4cb   : > { %2003 = vmax.xlane.f32.xlu1 %v2002_v11  ;;  %2234 = vadd.xlane.f32.xlu2 %v2233_v51  ;;  %v1403_v44 = vpop.f32.mrf.mxu0  ;;  %3498 = vpow2.f32 %v2114_v53 }
 0x4cc   : > { %v3491_v39 = vpop.eup %3490  ;;  %v1492_v48 = vpop.f32.mrf.mxu1 }
 0x4cd   : > { %v3493_v23 = vpop.eup %3492  ;;  %v2318_v13 = vpack.c.bf16 %v3487_v63, %v3491_v39  ;;  %v5246_v40 = vadd.f32 %v1492_v48, %v1403_v44  ;;  %v2116_v63 = vmul.f32 1.442695, %v2039_v26 }
 0x4ce   : > { %v2319_v50 = vpack.c.bf16 %v3489_v29, %v3493_v23  ;;  %v2230_v21 = vadd.f32 %v3493_v23, %v3491_v39  ;;  %v3495_v43 = vpop.eup %3494  ;;  %v1999_v29 = vmax.f32 %v5216_v59, %v5218_v20  ;;  %v2042_v23 = vsub.f32 %v4873_v2, %v1956_v54  ;;  %v3318_v2 = vld [vmem:[%s5789_s3] sm:$0xff] }
 0x4cf   : > { %v1623_v11 = vpop.permute.xlu0 %1622  ;;  %2428 = vmatmul.bf16.gmra.mxu0 %v2318_v13  ;;  %v3497_v48 = vpop.eup %3496  ;;  %3500 = vpow2.f32 %v2116_v63  ;;  %v2044_v13 = vsub.f32 %v4895_v41, %v5193_v31  ;;  %v2043_v41 = vsub.f32 %v4907_v9, %v1956_v54  ;;  %3325 = vmatpush.bf16.msra.mxu3 %v3318_v2 }
 0x4d0   : > { %3241 = vmatmul.msk.bf16.gmra.mxu2 %vm627_vm1, %v1623_v11  ;;  %3257 = vmatmul.msk.bf16.gmra.mxu3 %vm627_vm1, %v1623_v11  ;;  %v5270_v9 = vpop.f32.mrf.mxu2  ;;  %v5272_v54 = vpop.f32.mrf.mxu3 }
 0x4d1   : > { %2517 = vmatmul.bf16.gmra.mxu1 %v2319_v50  ;;  %2231 = vadd.xlane.f32.xlu0 %v2230_v21  ;;  %v1965_v32 = vpop.xlane.xlu1 %1964  ;;  %v2045_v50 = vsub.f32 %v4919_v47, %v5193_v31  ;;  %v2239_v21 = vadd.f32 %v3497_v48, %v3495_v43  ;;  %v3499_v6 = vpop.eup %3498  ;;  %v2126_v39 = vmul.f32 1.442695, %v2044_v13  ;;  %v2122_v47 = vmul.f32 1.442695, %v2042_v23 }
 0x4d2   : > { %v2320_v56 = vpack.c.bf16 %v3495_v43, %v3499_v6  ;;  %v5262_v31 = vpop.xlane.xlu2 %1979  ;;  %v2124_v63 = vmul.f32 1.442695, %v2043_v41  ;;  %2884 = vmatpush.bf16.msrb.mxu1 %v3318_v2  ;;  %v2005_v13 = vmax.f32 %v5270_v9, %v5272_v54 }
 0x4d3   : > { %1218 = vadd.xlane.f32.xlu1 %v5872_v15  ;;  %1209 = vadd.xlane.f32.xlu2 %v5873_v30  ;;  %v2128_v44 = vmul.f32 1.442695, %v2045_v50  ;;  %3502 = vpow2.f32 %v2126_v39  ;;  %v5874_v15 = vld [vmem:[#allocation11_spill] sm:$0xff] }
 0x4d5   : > { %v3501_v19 = vpop.eup %3500  ;;  %3504 = vpow2.f32 %v2128_v44 }
 0x4d6   : > { %v2321_v26 = vpack.c.bf16 %v3497_v48, %v3501_v19  ;;  %v2236_v11 = vadd.f32 %v3501_v19, %v3499_v6  ;;  %3506 = vpow2.f32 %v2122_v47  ;;  %v2048_v48 = vsub.f32 %v4921_v37, %v1965_v32 }
 0x4d7   : > { %3508 = vpow2.f32 %v2124_v63 }
 0x4d8   : > { %v2134_v19 = vmul.f32 1.442695, %v2048_v48 }
 0x4d9   : > { %2000 = vmax.xlane.f32.xlu0 %v1999_v29  ;;  %v5258_v51 = vpop.xlane.xlu1 %1970  ;;  %v3503_v30 = vpop.eup %3502  ;;  %v2049_v29 = vsub.f32 %v4943_v18, %v1965_v32 }
 0x4da   : > { %v1986_v50 = vpop.xlane.xlu2 %1985  ;;  %3510 = vpow2.f32 %v2134_v19  ;;  %v5282_v32 = vpop.f32.mrf.mxu0 }
 0x4db   : > { %2240 = vadd.xlane.f32.xlu2 %v2239_v21  ;;  %v3505_v43 = vpop.eup %3504  ;;  %v2136_v23 = vmul.f32 1.442695, %v2049_v29  ;;  %v2063_v41 = vsub.f32 %v5077_v16, %v1986_v50  ;;  %v5875_v16 = vld [vmem:[#allocation13_spill] sm:$0xff] }
 0x4dc   : > { %v2245_v21 = vadd.f32 %v3505_v43, %v3503_v30  ;;  %v3507_v39 = vpop.eup %3506 }
 0x4dd   : > { %v3509_v44 = vpop.eup %3508  ;;  %v2322_v37 = vpack.c.bf16 %v3503_v30, %v3507_v39  ;;  %3512 = vpow2.f32 %v2136_v23  ;;  %v2164_v47 = vmul.f32 1.442695, %v2063_v41 }
 0x4df   : > { %2433 = vmatmul.bf16.gmra.mxu0 %v2320_v56  ;;  %v2062_v56 = vsub.f32 %v5075_v55, %v1986_v50 }
 0x4e0   : > { %v3511_v48 = vpop.eup %3510 }
 0x4e1   : > { %2522 = vmatmul.bf16.gmra.mxu1 %v2321_v26  ;;  %2237 = vadd.xlane.f32.xlu0 %v2236_v11  ;;  %v5264_v53 = vpop.xlane.xlu1 %1976  ;;  %v2323_v26 = vpack.c.bf16 %v3505_v43, %v3509_v44  ;;  %v2242_v11 = vadd.f32 %v3509_v44, %v3507_v39  ;;  %v2162_v18 = vmul.f32 1.442695, %v2062_v56 }
 0x4e2   : > { %v1198_v29 = vpop.xlane.xlu2 %1197 }
 0x4e3   : > { %1215 = vadd.xlane.f32.xlu2 %v5874_v15  ;;  %v5284_v15 = vpop.f32.mrf.mxu1  ;;  %3514 = vpow2.f32 %v2162_v18  ;;  %v3513_v50 = vpop.eup %3512 }
 0x4e4   : > { %3516 = vpow2.f32 %v2164_v47  ;;  %v2251_v39 = vadd.f32 %v3513_v50, %v3511_v48 }
 0x4e9   : > { %2006 = vmax.xlane.f32.xlu0 %v2005_v13  ;;  %v5278_v6 = vpop.xlane.xlu1 %1982  ;;  %v2052_v13 = vsub.f32 %v4953_v14, %v5258_v51  ;;  %v5293_v44 = vpop.eup %3514 }
 0x4eb   : > { %2246 = vadd.xlane.f32.xlu2 %v2245_v21  ;;  %v2053_v21 = vsub.f32 %v4979_v38, %v5258_v51 }
 0x4ed   : > { %v2144_v23 = vmul.f32 1.442695, %v2053_v21 }
 0x4ef   : > { %2438 = vmatmul.bf16.gmra.mxu0 %v2322_v37  ;;  %v5295_v37 = vpop.eup %3516 }
 0x4f1   : > { %2527 = vmatmul.bf16.gmra.mxu1 %v2323_v26  ;;  %2243 = vadd.xlane.f32.xlu0 %v2242_v11  ;;  %v1989_v63 = vpop.xlane.xlu1 %1988 }
 0x4f2   : > { %v2064_v2 = vsub.f32 %v5107_v34, %v1989_v63  ;;  %v2065_v55 = vsub.f32 %v5104_v33, %v1989_v63  ;;  %v2142_v34 = vmul.f32 1.442695, %v2052_v13 }
 0x4f3   : > { %1221 = vadd.xlane.f32.xlu2 %v5875_v16  ;;  %v5876_v16 = vld [vmem:[#allocation23_spill] sm:$0xff] }
 0x4f4   : > { %v2166_v30 = vmul.f32 1.442695, %v2064_v2  ;;  %v2168_v43 = vmul.f32 1.442695, %v2065_v55 }
 0x4f6   : > { %3518 = vpow2.f32 %v2166_v30 }
 0x4f7   : > { %3520 = vpow2.f32 %v2168_v43 }
 0x4f8   : > { %3522 = vrcp.f32 %v1198_v29 }
 0x4f9   : > { %v1408_v33 = vpop.f32.mrf.mxu0  ;;  %v1201_v19 = vpop.xlane.xlu1 %1200 }
 0x4fa   : > { %v1497_v56 = vpop.f32.mrf.mxu1  ;;  %v1962_v41 = vpop.xlane.xlu0 %1961  ;;  %3524 = vrcp.f32 %v1201_v19 }
 0x4fb   : > { %v5297_v14 = vadd.f32 %v1497_v56, %v1408_v33  ;;  %v2046_v26 = vsub.f32 %v4905_v7, %v1962_v41  ;;  %v2047_v38 = vsub.f32 %v4927_v8, %v1962_v41  ;;  %2252 = vadd.xlane.f32.xlu2 %v2251_v39  ;;  %3526 = vpow2.f32 %v2142_v34  ;;  %v5877_v39 = vld [vmem:[#allocation18_spill] sm:$0xff] }
 0x4fc   : > { %v5301_v51 = vpop.eup %3518  ;;  %3528 = vpow2.f32 %v2144_v23  ;;  %v1440_v7 = vadd.f32 %v4841_v62, %v4837_v42  ;;  %v2050_v42 = vsub.f32 %v4939_v1, %v5200_v49  ;;  %v5878_v23 = vld [vmem:[#allocation2_spill] sm:$0xff]  ;;  %v2057_v1 = vsub.f32 %v5021_v45, %v5264_v53 }
 0x4fd   : > { %v5303_v11 = vpop.eup %3520  ;;  %v2130_v18 = vmul.f32 1.442695, %v2046_v26  ;;  %v2132_v47 = vmul.f32 1.442695, %v2047_v38  ;;  %v2051_v56 = vsub.f32 %v5878_v23, %v5200_v49  ;;  %v2056_v26 = vsub.f32 %v5003_v35, %v5264_v53  ;;  %v5881_v53 = vld [vmem:[#allocation45_spill] sm:$0xff] }
 0x4fe   : > { %v3523_v2 = vpop.eup %3522  ;;  %v2152_v35 = vmul.f32 1.442695, %v2057_v1 }
 0x4ff   : > { %3530 = vpow2.f32 %v2130_v18  ;;  %v1546_v30 = vmul.f32 %v3523_v2, %v5876_v16  ;;  %v2150_v16 = vmul.f32 1.442695, %v2056_v26 }
 0x500   : > { %v3525_v8 = vpop.eup %3524  ;;  %3532 = vpow2.f32 %v2132_v47  ;;  %v2138_v47 = vmul.f32 1.442695, %v2050_v42 }
 0x501   : > { %v1547_v43 = vmul.f32 %v3525_v8, %v1440_v7  ;;  %v5312_v13 = vpop.f32.mrf.mxu0  ;;  %v5316_v21 = vpop.xlane.xlu1 %1991  ;;  %v2140_v7 = vmul.f32 1.442695, %v2051_v56 }
 0x502   : > { %v5314_v29 = vpop.f32.mrf.mxu1  ;;  %v3527_v34 = vpop.eup %3526  ;;  %3534 = vpow2.f32 %v2138_v47  ;;  %v3320_v47 = vld [vmem:[%s5789_s3 + $0x10] sm:$0xff] }
 0x503   : > { %v1577_v33 = vpack.c.bf16 %v1547_v43, %v1546_v30  ;;  %1227 = vadd.xlane.f32.xlu2 %v5877_v39  ;;  %v3529_v19 = vpop.eup %3528  ;;  %3536 = vpow2.f32 %v2140_v7  ;;  %3323 = vmatpush.bf16.msra.mxu2 %v3320_v47 }
 0x504   : > { %v2257_v8 = vadd.f32 %v3529_v19, %v3527_v34  ;;  %3538 = vpow2.f32 %v2150_v16  ;;  %2735 = vmatpush.bf16.msrb.mxu0 %v3320_v47  ;;  %v5884_v16 = vld [vmem:[#allocation29_spill] sm:$0xff] }
 0x505   : > { %v5321_v62 = vpop.eup %3530  ;;  %3291 = vmatmul.msk.bf16.vlgmr.msra.gmra.mxu3 %vm627_vm1, %v1577_v33  ;;  %v2059_v33 = vsub.f32 %v5881_v53, %v5262_v31  ;;  %v5885_v53 = vld [vmem:[#allocation26_spill] sm:$0xff] }
 0x506   : > { %v5326_v41 = vpop.eup %3532  ;;  %v2324_v38 = vpack.c.bf16 %v3511_v48, %v5321_v62 }
 0x507   : > { %v2325_v18 = vpack.c.bf16 %v3513_v50, %v5326_v41  ;;  %v5880_v50 = vld [vmem:[#allocation42_spill] sm:$0xff] }
 0x508   : > { %v5334_v2 = vpop.xlane.xlu2 %2228  ;;  %2443 = vmatmul.bf16.gmra.mxu0 %v2324_v38  ;;  %v2058_v45 = vsub.f32 %v5880_v50, %v5262_v31  ;;  %v5344_v23 = vpop.eup %3534  ;;  %v2156_v31 = vmul.f32 1.442695, %v2059_v33 }
 0x509   : > { %2532 = vmatmul.bf16.gmra.mxu1 %v2325_v18  ;;  %v1413_v49 = vpop.f32.mrf.mxu0  ;;  %v1207_v48 = vpop.xlane.xlu1 %1206  ;;  %v5882_v18 = vld [vmem:[#allocation16_spill] sm:$0xff] }
 0x50a   : > { %v1502_v30 = vpop.f32.mrf.mxu1  ;;  %3540 = vrcp.f32 %v1207_v48  ;;  %v5348_v26 = vpop.eup %3536  ;;  %v2154_v38 = vmul.f32 1.442695, %v2058_v45 }
 0x50b   : > { %v5336_v43 = vadd.f32 %v1502_v30, %v1413_v49  ;;  %2258 = vadd.xlane.f32.xlu2 %v2257_v8  ;;  %3542 = vpow2.f32 %v2152_v35  ;;  %v3539_v1 = vpop.eup %3538  ;;  %v5883_v8 = vld [vmem:[#allocation28_spill] sm:$0xff]  ;;  %v2326_v35 = vpack.c.bf16 %v3527_v34, %v5344_v23  ;;  %v2327_v50 = vpack.c.bf16 %v3529_v19, %v5348_v26 }
 0x50c   : > { %v1445_v30 = vadd.f32 %v5884_v16, %v5883_v8 }
 0x50d   : > { %5879 = vst [vmem:[#allocation12_spill] sm:$0xff] %v5336_v43 }
 0x510   : > { %v1204_v39 = vpop.xlane.xlu2 %1203  ;;  %v3541_v7 = vpop.eup %3540 }
 0x511   : > { %3544 = vrcp.f32 %v1204_v39  ;;  %v5342_v42 = vpop.f32.mrf.mxu0  ;;  %v3543_v49 = vpop.eup %3542  ;;  %v1549_v45 = vmul.f32 %v3541_v7, %v1445_v30 }
 0x512   : > { %v5346_v56 = vpop.f32.mrf.mxu1  ;;  %3546 = vpow2.f32 %v2154_v38  ;;  %v2263_v47 = vadd.f32 %v3543_v49, %v3539_v1 }
 0x513   : > { %1233 = vadd.xlane.f32.xlu2 %v5882_v18  ;;  %3548 = vpow2.f32 %v2156_v31  ;;  %v5359_v18 = vpop.xlane.xlu0 %2225 }
 0x517   : > { %v3545_v48 = vpop.eup %3544 }
 0x518   : > { %v1548_v39 = vmul.f32 %v3545_v48, %v5885_v53  ;;  %2448 = vmatmul.bf16.gmra.mxu0 %v2326_v35  ;;  %v3547_v38 = vpop.eup %3546  ;;  %v2060_v53 = vsub.f32 %v5061_v10, %v5278_v6 }
 0x519   : > { %2537 = vmatmul.bf16.gmra.mxu1 %v2327_v50  ;;  %v1418_v33 = vpop.f32.mrf.mxu0  ;;  %v3549_v31 = vpop.eup %3548 }
 0x51a   : > { %v1507_v55 = vpop.f32.mrf.mxu1  ;;  %v5361_v63 = vpop.f32.mrf.mxu2  ;;  %v1578_v8 = vpack.c.bf16 %v1549_v45, %v1548_v39  ;;  %v2266_v30 = vadd.f32 %v3549_v31, %v3547_v38  ;;  %v2061_v39 = vsub.f32 %v5065_v12, %v5278_v6 }
 0x51b   : > { %v5363_v16 = vadd.f32 %v1507_v55, %v1418_v33  ;;  %2264 = vadd.xlane.f32.xlu2 %v2263_v47  ;;  %v5365_v34 = vpop.f32.mrf.mxu3  ;;  %v1995_v50 = vpop.xlane.xlu0 %1994  ;;  %v5889_v33 = vld [vmem:[#allocation14_spill] sm:$0xff]  ;;  %v2328_v47 = vpack.c.bf16 %v3539_v1, %v5214_v28 }
 0x51c   : > { %3292 = vmatmul.msk.bf16.gmra.mxu3 %vm627_vm1, %v1578_v8  ;;  %v2008_v19 = vmax.f32 %v5361_v63, %v5365_v34  ;;  %v2068_v8 = vsub.f32 %v5165_v60, %v1995_v50  ;;  %v1998_v1 = vpop.xlane.xlu1 %1997 }
 0x51d   : > { %5886 = vst [vmem:[#allocation10_spill] sm:$0xff] %v5363_v16  ;;  %v2158_v16 = vmul.f32 1.442695, %v2060_v53 }
 0x51e   : > { %2009 = vmax.xlane.f32.xlu1 %v2008_v19  ;;  %v2329_v19 = vpack.c.bf16 %v3543_v49, %v5220_v0  ;;  %v2174_v12 = vmul.f32 1.442695, %v2068_v8  ;;  %v2248_v0 = vadd.f32 %v5326_v41, %v5321_v62  ;;  %v2070_v49 = vsub.f32 %v5184_v61, %v1998_v1  ;;  %v5894_v62 = vld [vmem:[#allocation25_spill] sm:$0xff] }
 0x51f   : > { %3550 = vpow2.f32 %v2158_v16 }
 0x521   : > { %v5370_v7 = vpop.f32.mrf.mxu0 }
 0x522   : > { %5887 = vst [vmem:[#allocation11_spill] sm:$0xff] %v5370_v7  ;;  %v5372_v35 = vpop.f32.mrf.mxu1  ;;  %v5374_v48 = vpop.f32.mrf.mxu2  ;;  %v2160_v7 = vmul.f32 1.442695, %v2061_v39 }
 0x523   : > { %5888 = vst [vmem:[#allocation13_spill] sm:$0xff] %v5372_v35  ;;  %2267 = vadd.xlane.f32.xlu2 %v2266_v30  ;;  %v5376_v55 = vpop.f32.mrf.mxu3  ;;  %v2069_v30 = vsub.f32 %v5163_v5, %v1995_v50 }
 0x524   : > { %v2011_v45 = vmax.f32 %v5374_v48, %v5376_v55  ;;  %3552 = vpow2.f32 %v2160_v7 }
 0x525   : > { %v2176_v60 = vmul.f32 1.442695, %v2069_v30  ;;  %3554 = vpow2.f32 %v2174_v12 }
 0x526   : > { %1224 = vadd.xlane.f32.xlu1 %v5889_v33  ;;  %2012 = vmax.xlane.f32.xlu0 %v2011_v45  ;;  %v5891_v45 = vld [vmem:[#allocation24_spill] sm:$0xff]  ;;  %v5408_v33 = vpop.eup %3550 }
 0x527   : > { %3556 = vpow2.f32 %v2176_v60  ;;  %v2330_v30 = vpack.c.bf16 %v5408_v33, %v3547_v38 }
 0x528   : > { %2453 = vmatmul.bf16.gmra.mxu0 %v2328_v47  ;;  %v2178_v47 = vmul.f32 1.442695, %v2070_v49 }
 0x529   : > { %2542 = vmatmul.bf16.gmra.mxu1 %v2329_v19  ;;  %v2419_v35 = vpop.f32.mrf.mxu0  ;;  %v5895_v19 = vld [vmem:[#allocation6_spill] sm:$0xff] }
 0x52a   : > { %v2508_v10 = vpop.f32.mrf.mxu1  ;;  %v5389_v43 = vpop.f32.mrf.mxu2  ;;  %3558 = vpow2.f32 %v2178_v47 }
 0x52b   : > { %v5391_v6 = vadd.f32 %v2508_v10, %v2419_v35  ;;  %1248 = vadd.xlane.f32.xlu2 %v5891_v45  ;;  %v5394_v28 = vpop.f32.mrf.mxu3  ;;  %v2071_v35 = vsub.f32 %v5180_v46, %v1998_v1  ;;  %v5413_v16 = vpop.eup %3552  ;;  %v2254_v1 = vadd.f32 %v5348_v26, %v5344_v23 }
 0x52c   : > { %v2014_v5 = vmax.f32 %v5389_v43, %v5394_v28  ;;  %v5417_v46 = vpop.eup %3554  ;;  %v2331_v10 = vpack.c.bf16 %v5413_v16, %v3549_v31 }
 0x52d   : > { %5890 = vst [vmem:[#allocation23_spill] sm:$0xff] %v5391_v6  ;;  %v2180_v7 = vmul.f32 1.442695, %v2071_v35  ;;  %v5419_v8 = vpop.eup %3556 }
 0x52e   : > { %2015 = vmax.xlane.f32.xlu1 %v2014_v5  ;;  %2249 = vadd.xlane.f32.xlu0 %v2248_v0  ;;  %v2281_v45 = vadd.f32 %v5419_v8, %v5417_v46  ;;  %v1213_v0 = vpop.xlane.xlu1 %1212 }
 0x52f   : > { %3560 = vpow2.f32 %v2180_v7 }
 0x530   : > { %v5428_v5 = vpop.eup %3558  ;;  %3562 = vrcp.f32 %v5359_v18 }
 0x531   : > { %v5402_v50 = vpop.f32.mrf.mxu0  ;;  %3564 = vrcp.f32 %v5334_v2  ;;  %v2066_v2 = vsub.f32 %v5133_v22, %v5316_v21  ;;  %v5898_v22 = vld [vmem:[#allocation35_spill] sm:$0xff] }
 0x532   : > { %5892 = vst [vmem:[#allocation18_spill] sm:$0xff] %v5402_v50  ;;  %v5404_v53 = vpop.f32.mrf.mxu1  ;;  %v5406_v39 = vpop.f32.mrf.mxu2  ;;  %3566 = vrcp.f32 %v1213_v0 }
 0x533   : > { %5893 = vst [vmem:[#allocation2_spill] sm:$0xff] %v5404_v53  ;;  %1251 = vadd.xlane.f32.xlu2 %v5894_v62  ;;  %v5411_v41 = vpop.f32.mrf.mxu3 }
 0x534   : > { %v2017_v61 = vmax.f32 %v5406_v39, %v5411_v41 }
 0x535   : > { %v5431_v38 = vpop.eup %3560 }
 0x536   : > { %1230 = vadd.xlane.f32.xlu1 %v5895_v19  ;;  %2018 = vmax.xlane.f32.xlu0 %v2017_v61  ;;  %v2284_v47 = vadd.f32 %v5431_v38, %v5428_v5  ;;  %v3563_v7 = vpop.eup %3562 }
 0x537   : > { %v3565_v23 = vpop.eup %3564 }
 0x538   : > { %2458 = vmatmul.bf16.gmra.mxu0 %v2330_v30  ;;  %v3567_v0 = vpop.eup %3566 }
 0x539   : > { %2547 = vmatmul.bf16.gmra.mxu1 %v2331_v10  ;;  %v2424_v12 = vpop.f32.mrf.mxu0 }
 0x53a   : > { %v2513_v60 = vpop.f32.mrf.mxu1 }
 0x53b   : > { %2282 = vadd.xlane.f32.xlu2 %v2281_v45  ;;  %v2514_v49 = vadd.f32 %v2513_v60, %v2424_v12  ;;  %v2067_v12 = vsub.f32 %v5128_v52, %v5316_v21  ;;  %v5896_v60 = vpack.c.bf16 %v5301_v51, %v5293_v44 }
 0x53d   : > { %v2622_v18 = vmul.f32 %v3563_v7, %v2514_v49  ;;  %v2170_v49 = vmul.f32 1.442695, %v2066_v2  ;;  %v2172_v52 = vmul.f32 1.442695, %v2067_v12 }
 0x53e   : > { %v2235_v31 = vpop.xlane.xlu2 %2234  ;;  %2255 = vadd.xlane.f32.xlu0 %v2254_v1  ;;  %v5440_v45 = vpop.xlane.xlu1 %2003  ;;  %v5897_v1 = vpack.c.bf16 %v5303_v11, %v5295_v37 }
 0x541   : > { %v2426_v35 = vpop.f32.mrf.mxu0 }
 0x542   : > { %v2515_v62 = vpop.f32.mrf.mxu1 }
 0x543   : > { %v2516_v61 = vadd.f32 %v2515_v62, %v2426_v35  ;;  %2285 = vadd.xlane.f32.xlu2 %v2284_v47  ;;  %v5899_v35 = vld [vmem:[#allocation32_spill] sm:$0xff]  ;;  %v5900_v47 = vld [vmem:[#allocation33_spill] sm:$0xff] }
 0x544   : > { %v2232_v26 = vpop.xlane.xlu0 %2231  ;;  %v1450_v62 = vadd.f32 %v5900_v47, %v5899_v35 }
 0x545   : > { %v2623_v19 = vmul.f32 %v3565_v23, %v2516_v61 }
 0x546   : > { %v1210_v30 = vpop.xlane.xlu2 %1209  ;;  %v1551_v23 = vmul.f32 %v3567_v0, %v1450_v62  ;;  %v1219_v2 = vpop.xlane.xlu1 %1218 }
 0x547   : > { %v2653_v10 = vpack.c.bf16 %v2623_v19, %v2622_v18  ;;  %3568 = vrcp.f32 %v1210_v30  ;;  %v5901_v18 = vld [vmem:[#allocation31_spill] sm:$0xff] }
 0x548   : > { %2463 = vmatmul.bf16.gmra.mxu0 %v5896_v60  ;;  %3570 = vpow2.f32 %v2170_v49 }
 0x549   : > { %2552 = vmatmul.bf16.gmra.mxu1 %v5897_v1  ;;  %3267 = vmatmul.msk.bf16.vlgmr.msra.gmra.mxu2 %vm627_vm1, %v2653_v10  ;;  %3572 = vpow2.f32 %v2172_v52  ;;  %v5902_v10 = vld [vmem:[#allocation38_spill] sm:$0xff] }
 0x54a   : > { %3574 = vrcp.f32 %v2235_v31 }
 0x54b   : > { %1266 = vadd.xlane.f32.xlu2 %v5898_v22  ;;  %3576 = vrcp.f32 %v2232_v26 }
 0x54c   : > { %v2429_v21 = vpop.f32.mrf.mxu0  ;;  %v2001_v61 = vpop.xlane.xlu0 %2000  ;;  %3578 = vrcp.f32 %v1219_v2 }
 0x54d   : > { %v3569_v7 = vpop.eup %3568  ;;  %v2072_v49 = vsub.f32 %v5216_v59, %v2001_v61  ;;  %v2073_v62 = vsub.f32 %v5218_v20, %v2001_v61 }
 0x54e   : > { %v1550_v19 = vmul.f32 %v3569_v7, %v5901_v18  ;;  %v2241_v30 = vpop.xlane.xlu2 %2240  ;;  %v2518_v60 = vpop.f32.mrf.mxu1 }
 0x54f   : > { %v5461_v47 = vpop.eup %3570  ;;  %v2519_v31 = vadd.f32 %v2518_v60, %v2429_v21  ;;  %v2182_v59 = vmul.f32 1.442695, %v2072_v49  ;;  %v2184_v20 = vmul.f32 1.442695, %v2073_v62 }
 0x550   : > { %v1579_v1 = vpack.c.bf16 %v1551_v23, %v1550_v19  ;;  %v5464_v26 = vpop.eup %3572  ;;  %v2334_v23 = vpack.c.bf16 %v5417_v46, %v5461_v47  ;;  %v5903_v46 = vld [vmem:[#allocation39_spill] sm:$0xff] }
 0x551   : > { %v3575_v18 = vpop.eup %3574 }
 0x552   : > { %3293 = vmatmul.msk.bf16.gmra.mxu3 %vm627_vm1, %v1579_v1  ;;  %v2335_v1 = vpack.c.bf16 %v5419_v8, %v5464_v26  ;;  %v3577_v2 = vpop.eup %3576 }
 0x553   : > { %1269 = vadd.xlane.f32.xlu2 %v5902_v10  ;;  %v5455_v22 = vpop.f32.mrf.mxu2  ;;  %v5457_v12 = vpop.f32.mrf.mxu3  ;;  %v2624_v21 = vmul.f32 %v3577_v2, %v2519_v31  ;;  %v5905_v31 = vld [vmem:[#allocation34_spill] sm:$0xff] }
 0x554   : > { %v2431_v35 = vpop.f32.mrf.mxu0  ;;  %v2020_v0 = vmax.f32 %v5455_v22, %v5457_v12  ;;  %v2238_v10 = vpop.xlane.xlu0 %2237 }
 0x555   : > { %v3579_v61 = vpop.eup %3578 }
 0x556   : > { %v1216_v52 = vpop.xlane.xlu2 %1215  ;;  %v2520_v7 = vpop.f32.mrf.mxu1  ;;  %2021 = vmax.xlane.f32.xlu1 %v2020_v0 }
 0x557   : > { %3580 = vrcp.f32 %v1216_v52  ;;  %v2521_v19 = vadd.f32 %v2520_v7, %v2431_v35  ;;  %v5904_v52 = vld [vmem:[#allocation40_spill] sm:$0xff] }
 0x558   : > { %2468 = vmatmul.bf16.gmra.mxu0 %v2334_v23  ;;  %v1455_v35 = vadd.f32 %v5904_v52, %v5903_v46  ;;  %3582 = vpow2.f32 %v2182_v59  ;;  %v2074_v46 = vsub.f32 %v5234_v27, %v5440_v45  ;;  %v2269_v27 = vadd.f32 %v5413_v16, %v5408_v33 }
 0x559   : > { %v2625_v60 = vmul.f32 %v3575_v18, %v2521_v19  ;;  %2557 = vmatmul.bf16.gmra.mxu1 %v2335_v1  ;;  %3584 = vpow2.f32 %v2184_v20  ;;  %v5906_v18 = vld [vmem:[#allocation15_spill] sm:$0xff]  ;;  %v2272_v33 = vadd.f32 %v5295_v37, %v5293_v44  ;;  %v2275_v44 = vadd.f32 %v5303_v11, %v5301_v51 }
 0x55a   : > { %v1553_v49 = vmul.f32 %v3579_v61, %v1455_v35  ;;  %3586 = vrcp.f32 %v2241_v30  ;;  %v5907_v61 = vld [vmem:[#allocation5_spill] sm:$0xff]  ;;  %v5910_v37 = vld [vmem:[#allocation27_spill] sm:$0xff] }
 0x55b   : > { %v2654_v6 = vpack.c.bf16 %v2625_v60, %v2624_v21  ;;  %v5471_v0 = vpop.f32.mrf.mxu2  ;;  %v5473_v53 = vpop.f32.mrf.mxu3  ;;  %3588 = vrcp.f32 %v2238_v10 }
 0x55c   : > { %v2023_v8 = vmax.f32 %v5471_v0, %v5473_v53  ;;  %v2434_v7 = vpop.f32.mrf.mxu0  ;;  %v2007_v1 = vpop.xlane.xlu0 %2006 }
 0x55d   : > { %v3581_v50 = vpop.eup %3580  ;;  %3268 = vmatmul.msk.bf16.gmra.mxu2 %vm627_vm1, %v2654_v6  ;;  %v2076_v6 = vsub.f32 %v5270_v9, %v2007_v1 }
 0x55e   : > { %v1552_v62 = vmul.f32 %v3581_v50, %v5905_v31  ;;  %v2523_v23 = vpop.f32.mrf.mxu1  ;;  %1236 = vadd.xlane.f32.xlu1 %v5906_v18  ;;  %2024 = vmax.xlane.f32.xlu0 %v2023_v8  ;;  %v5483_v2 = vpop.eup %3582  ;;  %v2077_v50 = vsub.f32 %v5272_v54, %v2007_v1  ;;  %v2075_v54 = vsub.f32 %v5236_v25, %v5440_v45  ;;  %v2186_v31 = vmul.f32 1.442695, %v2074_v46  ;;  %v5908_v25 = vld [vmem:[#allocation20_spill] sm:$0xff] }
 0x55f   : > { %v5485_v21 = vpop.eup %3584  ;;  %v2524_v60 = vadd.f32 %v2523_v23, %v2434_v7  ;;  %v2336_v30 = vpack.c.bf16 %v5483_v2, %v5428_v5  ;;  %v2190_v8 = vmul.f32 1.442695, %v2076_v6 }
 0x560   : > { %v1580_v19 = vpack.c.bf16 %v1553_v49, %v1552_v62  ;;  %v3587_v10 = vpop.eup %3586  ;;  %v2337_v35 = vpack.c.bf16 %v5485_v21, %v5431_v38  ;;  %v2188_v62 = vmul.f32 1.442695, %v2075_v54  ;;  %v2247_v38 = vpop.xlane.xlu2 %2246 }
 0x561   : > { %v3589_v9 = vpop.eup %3588  ;;  %3590 = vpow2.f32 %v2190_v8  ;;  %v2278_v8 = vadd.f32 %v5464_v26, %v5461_v47 }
 0x562   : > { %3294 = vmatmul.msk.bf16.gmra.mxu3 %vm627_vm1, %v1580_v19  ;;  %v2626_v7 = vmul.f32 %v3589_v9, %v2524_v60 }
 0x564   : > { %v2436_v59 = vpop.f32.mrf.mxu0  ;;  %v2244_v45 = vpop.xlane.xlu0 %2243 }
 0x566   : > { %v2525_v20 = vpop.f32.mrf.mxu1  ;;  %1239 = vadd.xlane.f32.xlu1 %v5907_v61  ;;  %2261 = vadd.xlane.f32.xlu0 %v5224_v24  ;;  %v2192_v24 = vmul.f32 1.442695, %v2077_v50 }
 0x567   : > { %v2526_v52 = vadd.f32 %v2525_v20, %v2436_v59  ;;  %v3591_v19 = vpop.eup %3590  ;;  %v5909_v20 = vld [vmem:[#allocation22_spill] sm:$0xff] }
 0x568   : > { %2473 = vmatmul.bf16.gmra.mxu0 %v2336_v30  ;;  %3592 = vpow2.f32 %v2192_v24  ;;  %v1222_v51 = vpop.xlane.xlu2 %1221 }
 0x569   : > { %v2627_v49 = vmul.f32 %v3587_v10, %v2526_v52  ;;  %2562 = vmatmul.bf16.gmra.mxu1 %v2337_v35  ;;  %3594 = vpow2.f32 %v2186_v31  ;;  %v2287_v31 = vadd.f32 %v5485_v21, %v5483_v2 }
 0x56a   : > { %3596 = vpow2.f32 %v2188_v62 }
 0x56b   : > { %v2655_v5 = vpack.c.bf16 %v2627_v49, %v2626_v7  ;;  %3598 = vrcp.f32 %v2247_v38  ;;  %v5911_v7 = vld [vmem:[#allocation30_spill] sm:$0xff] }
 0x56c   : > { %v2439_v23 = vpop.f32.mrf.mxu0  ;;  %3600 = vrcp.f32 %v2244_v45 }
 0x56d   : > { %3269 = vmatmul.msk.bf16.gmra.mxu2 %vm627_vm1, %v2655_v5  ;;  %v5912_v5 = vld [vmem:[#allocation37_spill] sm:$0xff]  ;;  %3602 = vrcp.f32 %v1222_v51 }
 0x56e   : > { %v2528_v18 = vpop.f32.mrf.mxu1  ;;  %1242 = vadd.xlane.f32.xlu0 %v5908_v25  ;;  %2270 = vadd.xlane.f32.xlu1 %v2269_v27  ;;  %v3593_v1 = vpop.eup %3592 }
 0x56f   : > { %v3595_v16 = vpop.eup %3594  ;;  %v2529_v6 = vadd.f32 %v2528_v18, %v2439_v23  ;;  %v5913_v18 = vld [vmem:[#allocation3_spill] sm:$0xff] }
 0x570   : > { %v3597_v60 = vpop.eup %3596  ;;  %v2338_v61 = vpack.c.bf16 %v3591_v19, %v3595_v16  ;;  %v2253_v45 = vpop.xlane.xlu2 %2252 }
 0x571   : > { %v3599_v30 = vpop.eup %3598  ;;  %v2339_v46 = vpack.c.bf16 %v3593_v1, %v3597_v60  ;;  %v2290_v26 = vadd.f32 %v3597_v60, %v3595_v16 }
 0x572   : > { %v3601_v52 = vpop.eup %3600 }
 0x573   : > { %v2628_v35 = vmul.f32 %v3601_v52, %v2529_v6  ;;  %v2293_v6 = vadd.f32 %v3593_v1, %v3591_v19  ;;  %v3603_v16 = vpop.eup %3602 }
 0x574   : > { %v2441_v59 = vpop.f32.mrf.mxu0 }
 0x576   : > { %v2530_v50 = vpop.f32.mrf.mxu1  ;;  %1245 = vadd.xlane.f32.xlu0 %v5909_v20  ;;  %2273 = vadd.xlane.f32.xlu1 %v2272_v33 }
 0x577   : > { %v2531_v10 = vadd.f32 %v2530_v50, %v2441_v59 }
 0x578   : > { %2478 = vmatmul.bf16.gmra.mxu0 %v2338_v61  ;;  %v5914_v61 = vld [vmem:[#allocation47_spill] sm:$0xff] }
 0x579   : > { %v2629_v9 = vmul.f32 %v3599_v30, %v2531_v10  ;;  %2567 = vmatmul.bf16.gmra.mxu1 %v2339_v46  ;;  %v5915_v30 = vld [vmem:[#allocation48_spill] sm:$0xff] }
 0x57a   : > { %v5916_v46 = vld [vmem:[#allocation44_spill] sm:$0xff] }
 0x57b   : > { %v2656_v54 = vpack.c.bf16 %v2629_v9, %v2628_v35  ;;  %v1554_v52 = vmul.f32 %v3603_v16, %v5916_v46 }
 0x57d   : > { %3270 = vmatmul.msk.bf16.gmra.mxu2 %vm627_vm1, %v2656_v54 }
 0x57e   : > { %1254 = vadd.xlane.f32.xlu1 %v5910_v37  ;;  %2276 = vadd.xlane.f32.xlu0 %v2275_v44  ;;  %v1228_v37 = vpop.xlane.xlu2 %1227 }
 0x585   : > { %v5513_v49 = vpop.f32.mrf.mxu0 }
 0x586   : > { %1257 = vadd.xlane.f32.xlu1 %v5911_v7  ;;  %2279 = vadd.xlane.f32.xlu0 %v2278_v8  ;;  %v2533_v24 = vpop.f32.mrf.mxu1  ;;  %v2259_v16 = vpop.xlane.xlu2 %2258 }
 0x58d   : > { %v2446_v27 = vpop.f32.mrf.mxu0 }
 0x58e   : > { %2288 = vadd.xlane.f32.xlu1 %v2287_v31  ;;  %1260 = vadd.xlane.f32.xlu0 %v5912_v5  ;;  %v2535_v47 = vpop.f32.mrf.mxu1 }
 0x58f   : > { %v2536_v51 = vadd.f32 %v2535_v47, %v2446_v27 }
 0x591   : > { %v2010_v11 = vpop.xlane.xlu1 %2009 }
 0x592   : > { %v2078_v62 = vsub.f32 %v5361_v63, %v2010_v11  ;;  %v2079_v23 = vsub.f32 %v5365_v34, %v2010_v11 }
 0x594   : > { %v2194_v38 = vmul.f32 1.442695, %v2078_v62  ;;  %v2196_v25 = vmul.f32 1.442695, %v2079_v23  ;;  %v5917_v62 = vld [vmem:[#allocation36_spill] sm:$0xff] }
 0x595   : > { %v5523_v60 = vpop.f32.mrf.mxu0 }
 0x596   : > { %1263 = vadd.xlane.f32.xlu0 %v5913_v18  ;;  %2291 = vadd.xlane.f32.xlu1 %v2290_v26  ;;  %3604 = vpow2.f32 %v2194_v38  ;;  %v5525_v50 = vpop.f32.mrf.mxu1 }
 0x599   : > { %v2013_v2 = vpop.xlane.xlu0 %2012  ;;  %v1225_v21 = vpop.xlane.xlu1 %1224 }
 0x59a   : > { %v2080_v59 = vsub.f32 %v5374_v48, %v2013_v2  ;;  %v2081_v33 = vsub.f32 %v5376_v55, %v2013_v2  ;;  %3606 = vrcp.f32 %v1225_v21  ;;  %v1460_v48 = vadd.f32 %v5915_v30, %v5914_v61  ;;  %v5919_v30 = vld [vmem:[#allocation49_spill] sm:$0xff] }
 0x59b   : > { %3608 = vpow2.f32 %v2196_v25 }
 0x59c   : > { %v2198_v63 = vmul.f32 1.442695, %v2080_v59  ;;  %v2200_v34 = vmul.f32 1.442695, %v2081_v33  ;;  %v3605_v20 = vpop.eup %3604 }
 0x59d   : > { %v2451_v18 = vpop.f32.mrf.mxu0 }
 0x59e   : > { %3610 = vpow2.f32 %v2198_v63  ;;  %2294 = vadd.xlane.f32.xlu0 %v2293_v6  ;;  %1272 = vadd.xlane.f32.xlu1 %v5110_v3  ;;  %v2540_v25 = vpop.f32.mrf.mxu1 }
 0x59f   : > { %3612 = vpow2.f32 %v2200_v34 }
 0x5a0   : > { %v3607_v55 = vpop.eup %3606  ;;  %3614 = vrcp.f32 %v2253_v45 }
 0x5a1   : > { %v3609_v10 = vpop.eup %3608  ;;  %v1555_v19 = vmul.f32 %v3607_v55, %v1460_v48  ;;  %v2250_v1 = vpop.xlane.xlu0 %2249  ;;  %v5920_v48 = vld [vmem:[#allocation50_spill] sm:$0xff] }
 0x5a2   : > { %v2016_v35 = vpop.xlane.xlu1 %2015  ;;  %3616 = vrcp.f32 %v2250_v1  ;;  %v2296_v31 = vadd.f32 %v3609_v10, %v3605_v20  ;;  %v1465_v55 = vadd.f32 %v5920_v48, %v5919_v30 }
 0x5a3   : > { %v2082_v9 = vsub.f32 %v5389_v43, %v2016_v35  ;;  %v2083_v54 = vsub.f32 %v5394_v28, %v2016_v35  ;;  %v1581_v44 = vpack.c.bf16 %v1555_v19, %v1554_v52  ;;  %v2534_v28 = vadd.f32 %v2533_v24, %v5513_v49 }
 0x5a4   : > { %v3611_v3 = vpop.eup %3610 }
 0x5a5   : > { %v2202_v8 = vmul.f32 1.442695, %v2082_v9  ;;  %v2204_v7 = vmul.f32 1.442695, %v2083_v54  ;;  %v3613_v5 = vpop.eup %3612  ;;  %3295 = vmatmul.msk.bf16.gmra.mxu3 %vm627_vm1, %v1581_v44  ;;  %v2340_v11 = vpack.c.bf16 %v3611_v3, %v3605_v20  ;;  %v5918_v20 = vld [vmem:[#allocation43_spill] sm:$0xff]  ;;  %v5543_v19 = vpop.f32.mrf.mxu0  ;;  %v2541_v44 = vadd.f32 %v2540_v25, %v2451_v18 }
 0x5a6   : > { %1275 = vadd.xlane.f32.xlu1 %v5917_v62  ;;  %2297 = vadd.xlane.f32.xlu0 %v2296_v31  ;;  %v2299_v23 = vadd.f32 %v3613_v5, %v3611_v3  ;;  %v2341_v26 = vpack.c.bf16 %v3613_v5, %v3609_v10  ;;  %v3615_v43 = vpop.eup %3614  ;;  %v5545_v1 = vpop.f32.mrf.mxu1  ;;  %v2539_v31 = vadd.f32 %v5525_v50, %v5523_v60  ;;  %v5922_v62 = vld [vmem:[#allocation41_spill] sm:$0xff] }
 0x5a7   : > { %3618 = vpow2.f32 %v2202_v8  ;;  %2483 = vmatmul.bf16.gmra.mxu0 %v2340_v11  ;;  %v2631_v27 = vmul.f32 %v3615_v43, %v2536_v51 }
 0x5a8   : > { %3620 = vpow2.f32 %v2204_v7  ;;  %v3617_v38 = vpop.eup %3616  ;;  %2300 = vadd.xlane.f32.xlu2 %v2299_v23  ;;  %2572 = vmatmul.bf16.gmra.mxu1 %v2341_v26 }
 0x5a9   : > { %3622 = vrcp.f32 %v1228_v37  ;;  %v2630_v47 = vmul.f32 %v3617_v38, %v2534_v28  ;;  %v2019_v2 = vpop.xlane.xlu0 %2018  ;;  %v2891_v28 = vpop.f32.mrf.mxu3 }
 0x5aa   : > { %v1231_v21 = vpop.xlane.xlu1 %1230  ;;  %v2084_v45 = vsub.f32 %v5406_v39, %v2019_v2  ;;  %v2085_v59 = vsub.f32 %v5411_v41, %v2019_v2  ;;  %v5921_v41 = vld [vmem:[#allocation4_spill] sm:$0xff] }
 0x5ab   : > { %3624 = vrcp.f32 %v1231_v21  ;;  %v2657_v33 = vpack.c.bf16 %v2631_v27, %v2630_v47  ;;  %v1234_v27 = vpop.xlane.xlu2 %1233 }
 0x5ac   : > { %v2206_v49 = vmul.f32 1.442695, %v2084_v45  ;;  %v2208_v24 = vmul.f32 1.442695, %v2085_v59  ;;  %v5566_v59 = vld [vmem:[%s5790_s4] ss:$0 sm:$0xff] }
 0x5ad   : > { %v3619_v63 = vpop.eup %3618  ;;  %3271 = vmatmul.msk.bf16.gmra.mxu2 %vm627_vm1, %v2657_v33  ;;  %v5552_v26 = vpop.f32.mrf.mxu0 }
 0x5ae   : > { %v3621_v34 = vpop.eup %3620  ;;  %3626 = vpow2.f32 %v2206_v49  ;;  %1278 = vadd.xlane.f32.xlu0 %v5918_v20  ;;  %v2545_v43 = vpop.f32.mrf.mxu1 }
 0x5af   : > { %v3623_v6 = vpop.eup %3622  ;;  %v2302_v61 = vadd.f32 %v3621_v34, %v3619_v63  ;;  %3628 = vpow2.f32 %v2208_v24 }
 0x5b0   : > { %v1556_v10 = vmul.f32 %v3623_v6, %v5921_v41  ;;  %3630 = vrcp.f32 %v2259_v16 }
 0x5b1   : > { %v3625_v39 = vpop.eup %3624  ;;  %2303 = vadd.xlane.f32.xlu2 %v2302_v61  ;;  %v2256_v52 = vpop.xlane.xlu0 %2255 }
 0x5b2   : > { %v1557_v46 = vmul.f32 %v3625_v39, %v1465_v55  ;;  %3632 = vrcp.f32 %v2256_v52  ;;  %v2893_v33 = vpop.f32.mrf.mxu3  ;;  %v5924_v52 = vld [vmem:[#allocation52_spill] sm:$0xff] }
 0x5b4   : > { %v1582_v35 = vpack.c.bf16 %v1557_v46, %v1556_v10  ;;  %v3627_v9 = vpop.eup %3626  ;;  %v2265_v10 = vpop.xlane.xlu2 %2264 }
 0x5b5   : > { %v3629_v54 = vpop.eup %3628  ;;  %v2342_v3 = vpack.c.bf16 %v3627_v9, %v3619_v63  ;;  %v5556_v38 = vpop.f32.mrf.mxu0  ;;  %v3722_v63 = vld [vmem:[%s3835_s14 + $0x10] sm:$0xff] }
 0x5b6   : > { %3296 = vmatmul.msk.bf16.gmra.mxu3 %vm627_vm1, %v1582_v35  ;;  %1281 = vadd.xlane.f32.xlu0 %v5126_v58  ;;  %v2305_v37 = vadd.f32 %v3629_v54, %v3627_v9  ;;  %v2343_v8 = vpack.c.bf16 %v3629_v54, %v3621_v34  ;;  %v3631_v7 = vpop.eup %3630  ;;  %v5923_v58 = vld [vmem:[#allocation7_spill] sm:$0xff]  ;;  %v5558_v60 = vpop.f32.mrf.mxu1  ;;  %v5925_v35 = vld [vmem:[#allocation53_spill] sm:$0xff] }
 0x5b7   : > { %2488 = vmatmul.bf16.gmra.mxu0 %v2342_v3  ;;  %v2633_v51 = vmul.f32 %v3631_v7, %v2541_v44  ;;  %v1470_v9 = vadd.f32 %v5925_v35, %v5924_v52  ;;  %v5926_v3 = vld [vmem:[#allocation51_spill] sm:$0xff] }
 0x5b8   : > { %v3633_v5 = vpop.eup %3632  ;;  %2306 = vadd.xlane.f32.xlu1 %v2305_v37  ;;  %2577 = vmatmul.bf16.gmra.mxu1 %v2343_v8 }
 0x5b9   : > { %v2632_v11 = vmul.f32 %v3633_v5, %v2539_v31  ;;  %1284 = vadd.xlane.f32.xlu2 %v5922_v62 }
 0x5ba   : > { %v2896_v44 = vpop.f32.mrf.mxu3 }
 0x5bb   : > { %v2658_v23 = vpack.c.bf16 %v2633_v51, %v2632_v11 }
 0x5bd   : > { %3272 = vmatmul.msk.bf16.gmra.mxu2 %vm627_vm1, %v2658_v23 }
 0x5c1   : > { %1191 = vadd.xlane.f32.xlu2 %v5923_v58 }
 0x5c9   : > { %2222 = vadd.xlane.f32.xlu2 %v5159_v17  ;;  %v2022_v50 = vpop.xlane.xlu1 %2021 }
 0x5ca   : > { %v2086_v18 = vsub.f32 %v5455_v22, %v2022_v50  ;;  %v2087_v25 = vsub.f32 %v5457_v12, %v2022_v50  ;;  %v5576_v22 = vpop.f32.mrf.mxu0  ;;  %v5578_v12 = vpop.f32.mrf.mxu1 }
 0x5cc   : > { %v2210_v47 = vmul.f32 1.442695, %v2086_v18  ;;  %v2212_v2 = vmul.f32 1.442695, %v2087_v25  ;;  %v2742_v21 = vpop.f32.mrf.mxu2 }
 0x5cd   : > { %v2892_v45 = vadd.f32 %v2891_v28, %v2742_v21  ;;  %v2546_v28 = vadd.f32 %v2545_v43, %v5552_v26  ;;  %v5927_v26 = vld [vmem:[#allocation8_spill] sm:$0xff] }
 0x5ce   : > { %3634 = vpow2.f32 %v2210_v47  ;;  %v2544_v47 = vadd.f32 %v5545_v1, %v5543_v19 }
 0x5cf   : > { %3636 = vpow2.f32 %v2212_v2  ;;  %v2968_v17 = vadd.f32 %v3722_v63, %v2892_v45 }
 0x5d0   : > { %3638 = vrcp.f32 %v1234_v27 }
 0x5d1   : > { %v3004_v49 = vadd.f32 %v5566_v59, %v2968_v17  ;;  %v2025_v24 = vpop.xlane.xlu0 %2024  ;;  %v1237_v34 = vpop.xlane.xlu1 %1236 }
 0x5d2   : > { %v2088_v6 = vsub.f32 %v5471_v0, %v2025_v24  ;;  %v2089_v16 = vsub.f32 %v5473_v53, %v2025_v24  ;;  %3640 = vrcp.f32 %v1237_v34  ;;  %v3723_v0 = vld [vmem:[%s3835_s14 + $0x18] sm:$0xff]  ;;  %v5590_v51 = vpop.f32.mrf.mxu0  ;;  %v5592_v11 = vpop.f32.mrf.mxu1  ;;  %v3724_v24 = vld [vmem:[%s3835_s14 + $0x20] sm:$0xff] }
 0x5d3   : > { %3036 = vst.msk [vmem:[%s5574_s29 + $0x10] sm:$0xff] %vm328_vm0, %v3004_v49  ;;  %v2898_v17 = vpop.f32.mrf.mxu3  ;;  %v2268_v49 = vpop.xlane.xlu2 %2267 }
 0x5d4   : > { %v3635_v20 = vpop.eup %3634  ;;  %v2214_v61 = vmul.f32 1.442695, %v2088_v6  ;;  %v2216_v30 = vmul.f32 1.442695, %v2089_v16  ;;  %v2744_v48 = vpop.f32.mrf.mxu2 }
 0x5d5   : > { %v3637_v55 = vpop.eup %3636  ;;  %v2894_v39 = vadd.f32 %v2893_v33, %v2744_v48  ;;  %v5929_v48 = vld [vmem:[#allocation55_spill] sm:$0xff] }
 0x5d6   : > { %v3639_v41 = vpop.eup %3638  ;;  %3642 = vpow2.f32 %v2214_v61  ;;  %v2308_v46 = vadd.f32 %v3637_v55, %v3635_v20 }
 0x5d7   : > { %3644 = vpow2.f32 %v2216_v30  ;;  %v2969_v53 = vadd.f32 %v3723_v0, %v2894_v39  ;;  %v1558_v37 = vmul.f32 %v3639_v41, %v5926_v3  ;;  %v5928_v30 = vld [vmem:[#allocation9_spill] sm:$0xff] }
 0x5d8   : > { %v3641_v54 = vpop.eup %3640  ;;  %2309 = vadd.xlane.f32.xlu1 %v2308_v46  ;;  %3646 = vrcp.f32 %v2265_v10  ;;  %v5930_v10 = vld [vmem:[#allocation46_spill] sm:$0xff] }
 0x5d9   : > { %v1559_v8 = vmul.f32 %v3641_v54, %v1470_v9  ;;  %v3005_v7 = vadd.f32 %v5566_v59, %v2969_v53  ;;  %v2262_v31 = vpop.xlane.xlu0 %2261  ;;  %v1240_v5 = vpop.xlane.xlu1 %1239  ;;  %v5931_v46 = vld [vmem:[#allocation54_spill] sm:$0xff]  ;;  %v3725_v54 = vld [vmem:[%s3835_s14 + $0x28] sm:$0xff] }
 0x5da   : > { %3648 = vrcp.f32 %v2262_v31  ;;  %v2466_v1 = vpop.f32.mrf.mxu0  ;;  %v2555_v16 = vpop.f32.mrf.mxu1  ;;  %v2551_v31 = vadd.f32 %v5578_v12, %v5576_v22  ;;  %v3726_v22 = vld [vmem:[%s3835_s14 + $0x30] sm:$0xff] }
 0x5db   : > { %3037 = vst.msk [vmem:[%s5574_s29 + $0x18] sm:$0xff] %vm328_vm0, %v3005_v7  ;;  %v1583_v62 = vpack.c.bf16 %v1559_v8, %v1558_v37  ;;  %3650 = vrcp.f32 %v1240_v5  ;;  %v2901_v53 = vpop.f32.mrf.mxu3  ;;  %v1249_v8 = vpop.xlane.xlu2 %1248  ;;  %v2549_v7 = vadd.f32 %v5558_v60, %v5556_v38 }
 0x5dc   : > { %v3643_v23 = vpop.eup %3642 }
 0x5dd   : > { %v3645_v58 = vpop.eup %3644  ;;  %3297 = vmatmul.msk.bf16.gmra.mxu3 %vm627_vm1, %v1583_v62  ;;  %v2344_v50 = vpack.c.bf16 %v3643_v23, %v3635_v20 }
 0x5de   : > { %v2311_v18 = vadd.f32 %v3645_v58, %v3643_v23  ;;  %v2345_v25 = vpack.c.bf16 %v3645_v58, %v3637_v55  ;;  %v3647_v27 = vpop.eup %3646  ;;  %v1475_v55 = vadd.f32 %v5929_v48, %v5928_v30 }
 0x5df   : > { %2493 = vmatmul.bf16.gmra.mxu0 %v2344_v50  ;;  %v2635_v45 = vmul.f32 %v3647_v27, %v2546_v28 }
 0x5e0   : > { %v3649_v2 = vpop.eup %3648  ;;  %v2747_v21 = vpop.f32.mrf.mxu2  ;;  %2312 = vadd.xlane.f32.xlu0 %v2311_v18  ;;  %2582 = vmatmul.bf16.gmra.mxu1 %v2345_v25 }
 0x5e1   : > { %v2634_v33 = vmul.f32 %v3649_v2, %v2544_v47  ;;  %v2897_v63 = vadd.f32 %v2896_v44, %v2747_v21  ;;  %1194 = vadd.xlane.f32.xlu1 %v5927_v26  ;;  %v1243_v43 = vpop.xlane.xlu0 %1242  ;;  %v2271_v6 = vpop.xlane.xlu1 %2270  ;;  %v5933_v26 = vld [vmem:[#allocation56_spill] sm:$0xff] }
 0x5e2   : > { %3652 = vrcp.f32 %v1243_v43  ;;  %v3651_v61 = vpop.eup %3650  ;;  %v5617_v62 = vpop.f32.mrf.mxu0 }
 0x5e3   : > { %v2970_v34 = vadd.f32 %v3724_v24, %v2897_v63  ;;  %v2659_v19 = vpack.c.bf16 %v2635_v45, %v2634_v33  ;;  %3654 = vrcp.f32 %v2271_v6  ;;  %v1560_v52 = vmul.f32 %v3651_v61, %v5931_v46  ;;  %v5619_v23 = vpop.f32.mrf.mxu1  ;;  %v2903_v2 = vpop.f32.mrf.mxu3  ;;  %v5932_v33 = vld [vmem:[#allocation57_spill] sm:$0xff] }
 0x5e4   : > { %3656 = vrcp.f32 %v2268_v49  ;;  %v1480_v63 = vadd.f32 %v5932_v33, %v5172_v36  ;;  %v2554_v46 = vadd.f32 %v5592_v11, %v5590_v51 }
 0x5e5   : > { %v3006_v20 = vadd.f32 %v5566_v59, %v2970_v34  ;;  %3273 = vmatmul.msk.bf16.gmra.mxu2 %vm627_vm1, %v2659_v19 }
 0x5e7   : > { %3038 = vst.msk [vmem:[%s5574_s29 + $0x20] sm:$0xff] %vm328_vm0, %v3006_v20  ;;  %v3727_v20 = vld [vmem:[%s3835_s14 + $0x38] sm:$0xff] }
 0x5e8   : > { %v3653_v39 = vpop.eup %3652  ;;  %v2749_v41 = vpop.f32.mrf.mxu2  ;;  %2219 = vadd.xlane.f32.xlu0 %v5930_v10 }
 0x5e9   : > { %v1561_v35 = vmul.f32 %v3653_v39, %v1475_v55  ;;  %v2899_v9 = vadd.f32 %v2898_v17, %v2749_v41  ;;  %v1246_v0 = vpop.xlane.xlu0 %1245  ;;  %v3655_v37 = vpop.eup %3654  ;;  %v2556_v39 = vadd.f32 %v2555_v16, %v2466_v1 }
 0x5ea   : > { %3658 = vrcp.f32 %v1246_v0  ;;  %v2637_v58 = vmul.f32 %v3655_v37, %v2551_v31  ;;  %v3657_v28 = vpop.eup %3656  ;;  %v2274_v60 = vpop.xlane.xlu1 %2273 }
 0x5eb   : > { %v2971_v44 = vadd.f32 %v3725_v54, %v2899_v9  ;;  %v1584_v3 = vpack.c.bf16 %v1561_v35, %v1560_v52  ;;  %3660 = vrcp.f32 %v1249_v8  ;;  %v2636_v38 = vmul.f32 %v3657_v28, %v2549_v7  ;;  %v2471_v17 = vpop.f32.mrf.mxu0  ;;  %v2560_v34 = vpop.f32.mrf.mxu1  ;;  %v3728_v54 = vld [vmem:[%s3835_s14 + $0x40] sm:$0xff] }
 0x5ec   : > { %v1252_v55 = vpop.xlane.xlu2 %1251  ;;  %v2906_v10 = vpop.f32.mrf.mxu3  ;;  %v1485_v8 = vadd.f32 %v5204_v57, %v5202_v4  ;;  %v5934_v28 = vld [vmem:[#allocation58_spill] sm:$0xff]  ;;  %v3729_v4 = vld [vmem:[%s3835_s14 + $0x48] sm:$0xff] }
 0x5ed   : > { %v3007_v5 = vadd.f32 %v5566_v59, %v2971_v44  ;;  %3298 = vmatmul.msk.bf16.gmra.mxu3 %vm627_vm1, %v1584_v3  ;;  %v2660_v27 = vpack.c.bf16 %v2637_v58, %v2636_v38 }
 0x5ef   : > { %3039 = vst.msk [vmem:[%s5574_s29 + $0x28] sm:$0xff] %vm328_vm0, %v3007_v5 }
 0x5f0   : > { %v2752_v50 = vpop.f32.mrf.mxu2  ;;  %v3659_v47 = vpop.eup %3658 }
 0x5f1   : > { %v2902_v18 = vadd.f32 %v2901_v53, %v2752_v50  ;;  %v2277_v25 = vpop.xlane.xlu0 %2276  ;;  %v3661_v45 = vpop.eup %3660  ;;  %v1562_v43 = vmul.f32 %v3659_v47, %v5933_v26  ;;  %v2561_v47 = vadd.f32 %v2560_v34, %v2471_v17 }
 0x5f2   : > { %3662 = vrcp.f32 %v2277_v25  ;;  %v1563_v24 = vmul.f32 %v3661_v45, %v1480_v63  ;;  %v1255_v19 = vpop.xlane.xlu1 %1254 }
 0x5f3   : > { %v2972_v12 = vadd.f32 %v3726_v22, %v2902_v18  ;;  %3664 = vrcp.f32 %v2274_v60  ;;  %v2474_v16 = vpop.f32.mrf.mxu0  ;;  %v2563_v53 = vpop.f32.mrf.mxu1 }
 0x5f4   : > { %v1585_v30 = vpack.c.bf16 %v1563_v24, %v1562_v43  ;;  %3666 = vrcp.f32 %v1255_v19  ;;  %v2283_v7 = vpop.xlane.xlu2 %2282  ;;  %v2908_v5 = vpop.f32.mrf.mxu3  ;;  %v5936_v19 = vld [vmem:[#allocation61_spill] sm:$0xff] }
 0x5f5   : > { %v3008_v21 = vadd.f32 %v5566_v59, %v2972_v12  ;;  %3274 = vmatmul.msk.bf16.gmra.mxu2 %vm627_vm1, %v2660_v27  ;;  %3668 = vrcp.f32 %v1252_v55  ;;  %v2559_v27 = vadd.f32 %v5619_v23, %v5617_v62 }
 0x5f7   : > { %3040 = vst.msk [vmem:[%s5574_s29 + $0x30] sm:$0xff] %vm328_vm0, %v3008_v21 }
 0x5f8   : > { %v2754_v49 = vpop.f32.mrf.mxu2  ;;  %v3663_v48 = vpop.eup %3662 }
 0x5f9   : > { %v2904_v6 = vadd.f32 %v2903_v2, %v2754_v49  ;;  %v3665_v41 = vpop.eup %3664  ;;  %v2639_v52 = vmul.f32 %v3663_v48, %v2556_v39  ;;  %v2280_v0 = vpop.xlane.xlu0 %2279 }
 0x5fa   : > { %v2638_v9 = vmul.f32 %v3665_v41, %v2554_v46  ;;  %v3667_v37 = vpop.eup %3666  ;;  %3670 = vrcp.f32 %v2280_v0  ;;  %v1258_v38 = vpop.xlane.xlu1 %1257  ;;  %v2564_v41 = vadd.f32 %v2563_v53, %v2474_v16  ;;  %v1495_v16 = vadd.f32 %v5284_v15, %v5282_v32 }
 0x5fb   : > { %v2973_v61 = vadd.f32 %v3727_v20, %v2904_v6  ;;  %v3669_v11 = vpop.eup %3668  ;;  %v1565_v31 = vmul.f32 %v3667_v37, %v1485_v8  ;;  %3672 = vrcp.f32 %v2283_v7  ;;  %v2476_v25 = vpop.f32.mrf.mxu0  ;;  %v5935_v6 = vld [vmem:[#allocation60_spill] sm:$0xff] }
 0x5fc   : > { %v2661_v3 = vpack.c.bf16 %v2639_v52, %v2638_v9  ;;  %v1564_v50 = vmul.f32 %v3669_v11, %v5934_v28  ;;  %v2565_v2 = vpop.f32.mrf.mxu1  ;;  %v2286_v26 = vpop.xlane.xlu2 %2285  ;;  %v1490_v62 = vadd.f32 %v5936_v19, %v5935_v6 }
 0x5fd   : > { %v3009_v36 = vadd.f32 %v5566_v59, %v2973_v61  ;;  %3299 = vmatmul.msk.bf16.gmra.mxu3 %vm627_vm1, %v1585_v30  ;;  %v5937_v61 = vld [vmem:[#allocation59_spill] sm:$0xff] }
 0x5fe   : > { %v1586_v22 = vpack.c.bf16 %v1565_v31, %v1564_v50 }
 0x5ff   : > { %3041 = vst.msk [vmem:[%s5574_s29 + $0x38] sm:$0xff] %vm328_vm0, %v3009_v36 }
 0x600   : > { %v2757_v35 = vpop.f32.mrf.mxu2  ;;  %v3671_v12 = vpop.eup %3670 }
 0x601   : > { %v2907_v1 = vadd.f32 %v2906_v10, %v2757_v35  ;;  %v1261_v18 = vpop.xlane.xlu0 %1260  ;;  %v2640_v45 = vmul.f32 %v3671_v12, %v2559_v27  ;;  %v3673_v33 = vpop.eup %3672  ;;  %v2566_v10 = vadd.f32 %v2565_v2, %v2476_v25  ;;  %v3730_v25 = vld [vmem:[%s3835_s14 + $0x50] sm:$0xff] }
 0x602   : > { %3674 = vrcp.f32 %v1261_v18  ;;  %v2641_v63 = vmul.f32 %v3673_v33, %v2561_v47  ;;  %v2289_v43 = vpop.xlane.xlu1 %2288 }
 0x603   : > { %v2974_v44 = vadd.f32 %v3728_v54, %v2907_v1  ;;  %3676 = vrcp.f32 %v1258_v38  ;;  %v2479_v17 = vpop.f32.mrf.mxu0 }
 0x604   : > { %v2662_v49 = vpack.c.bf16 %v2641_v63, %v2640_v45  ;;  %3678 = vrcp.f32 %v2289_v43  ;;  %v2568_v34 = vpop.f32.mrf.mxu1  ;;  %v1267_v36 = vpop.xlane.xlu2 %1266  ;;  %v1500_v45 = vadd.f32 %v5314_v29, %v5312_v13  ;;  %v3731_v13 = vld [vmem:[%s3835_s14 + $0x58] sm:$0xff] }
 0x605   : > { %v3010_v51 = vadd.f32 %v5566_v59, %v2974_v44  ;;  %3275 = vmatmul.msk.bf16.gmra.mxu2 %vm627_vm1, %v2661_v3  ;;  %3680 = vrcp.f32 %v2286_v26 }
 0x607   : > { %3042 = vst.msk [vmem:[%s5574_s29 + $0x40] sm:$0xff] %vm328_vm0, %v3010_v51 }
 0x608   : > { %v2759_v58 = vpop.f32.mrf.mxu2  ;;  %v3675_v24 = vpop.eup %3674 }
 0x609   : > { %v2909_v60 = vadd.f32 %v2908_v5, %v2759_v58  ;;  %v3677_v23 = vpop.eup %3676  ;;  %v1567_v20 = vmul.f32 %v3675_v24, %v1490_v62  ;;  %v1264_v48 = vpop.xlane.xlu0 %1263 }
 0x60a   : > { %v1566_v30 = vmul.f32 %v3677_v23, %v5937_v61  ;;  %v3679_v39 = vpop.eup %3678  ;;  %3682 = vrcp.f32 %v1264_v48  ;;  %v2292_v1 = vpop.xlane.xlu1 %2291 }
 0x60b   : > { %v2975_v57 = vadd.f32 %v3729_v4, %v2909_v60  ;;  %v2643_v46 = vmul.f32 %v3679_v39, %v2566_v10  ;;  %v3681_v52 = vpop.eup %3680  ;;  %3684 = vrcp.f32 %v1267_v36  ;;  %v2481_v35 = vpop.f32.mrf.mxu0  ;;  %v2569_v60 = vadd.f32 %v2568_v34, %v2479_v17 }
 0x60c   : > { %v1587_v55 = vpack.c.bf16 %v1567_v20, %v1566_v30  ;;  %v2642_v9 = vmul.f32 %v3681_v52, %v2564_v41  ;;  %v2570_v0 = vpop.f32.mrf.mxu1  ;;  %v1270_v53 = vpop.xlane.xlu2 %1269 }
 0x60d   : > { %v3011_v21 = vadd.f32 %v5566_v59, %v2975_v57  ;;  %3300 = vmatmul.msk.bf16.gmra.mxu3 %vm627_vm1, %v1586_v22  ;;  %v2571_v50 = vadd.f32 %v2570_v0, %v2481_v35 }
 0x60e   : > { %v2663_v44 = vpack.c.bf16 %v2643_v46, %v2642_v9  ;;  %v3732_v9 = vld [vmem:[%s3835_s14 + $0x60] sm:$0xff] }
 0x60f   : > { %3043 = vst.msk [vmem:[%s5574_s29 + $0x48] sm:$0xff] %vm328_vm0, %v3011_v21 }
 0x610   : > { %v3683_v3 = vpop.eup %3682 }
 0x611   : > { %v2295_v54 = vpop.xlane.xlu0 %2294  ;;  %v3685_v37 = vpop.eup %3684  ;;  %v1568_v8 = vmul.f32 %v3683_v3, %v5246_v40 }
 0x612   : > { %3686 = vrcp.f32 %v2295_v54  ;;  %v1569_v51 = vmul.f32 %v3685_v37, %v1495_v16  ;;  %v1273_v5 = vpop.xlane.xlu1 %1272  ;;  %v1505_v54 = vadd.f32 %v5346_v56, %v5342_v42 }
 0x613   : > { %3688 = vrcp.f32 %v2292_v1 }
 0x614   : > { %v1588_v58 = vpack.c.bf16 %v1569_v51, %v1568_v8  ;;  %3690 = vrcp.f32 %v1273_v5  ;;  %v3733_v5 = vld [vmem:[%s3835_s14 + $0x68] sm:$0xff] }
 0x615   : > { %3276 = vmatmul.msk.bf16.gmra.mxu2 %vm627_vm1, %v2662_v49  ;;  %3692 = vrcp.f32 %v1270_v53 }
 0x618   : > { %v3687_v28 = vpop.eup %3686 }
 0x619   : > { %v3689_v38 = vpop.eup %3688  ;;  %v2645_v18 = vmul.f32 %v3687_v28, %v2571_v50  ;;  %v2298_v4 = vpop.xlane.xlu0 %2297 }
 0x61a   : > { %v2644_v40 = vmul.f32 %v3689_v38, %v2569_v60  ;;  %v3691_v2 = vpop.eup %3690  ;;  %v1276_v19 = vpop.xlane.xlu1 %1275 }
 0x61b   : > { %v2301_v32 = vpop.xlane.xlu2 %2300  ;;  %v3693_v63 = vpop.eup %3692  ;;  %v1571_v26 = vmul.f32 %v3691_v2, %v1500_v45  ;;  %v5940_v2 = vld [vmem:[#allocation13_spill] sm:$0xff]  ;;  %v5941_v45 = vld [vmem:[#allocation10_spill] sm:$0xff] }
 0x61c   : > { %v2664_v47 = vpack.c.bf16 %v2645_v18, %v2644_v40  ;;  %3694 = vrcp.f32 %v2301_v32  ;;  %v1570_v49 = vmul.f32 %v3693_v63, %v5297_v14 }
 0x61d   : > { %3301 = vmatmul.msk.bf16.gmra.mxu3 %vm627_vm1, %v1587_v55  ;;  %3696 = vrcp.f32 %v2298_v4 }
 0x61e   : > { %v1589_v17 = vpack.c.bf16 %v1571_v26, %v1570_v49  ;;  %v5942_v49 = vld [vmem:[#allocation19_spill] sm:$0xff] }
 0x621   : > { %v1279_v62 = vpop.xlane.xlu0 %1278 }
 0x622   : > { %v3695_v48 = vpop.eup %3694  ;;  %3698 = vrcp.f32 %v1279_v62 }
 0x623   : > { %v3697_v39 = vpop.eup %3696  ;;  %3700 = vrcp.f32 %v1276_v19 }
 0x624   : > { %v2484_v11 = vpop.f32.mrf.mxu0  ;;  %v2304_v24 = vpop.xlane.xlu2 %2303 }
 0x625   : > { %3277 = vmatmul.msk.bf16.gmra.mxu2 %vm627_vm1, %v2663_v44  ;;  %v2573_v7 = vpop.f32.mrf.mxu1 }
 0x626   : > { %v2574_v34 = vadd.f32 %v2573_v7, %v2484_v11  ;;  %v5938_v11 = vld [vmem:[#allocation12_spill] sm:$0xff] }
 0x628   : > { %v2911_v31 = vpop.f32.mrf.mxu3  ;;  %v2646_v41 = vmul.f32 %v3697_v39, %v2574_v34  ;;  %v3699_v1 = vpop.eup %3698 }
 0x629   : > { %v3701_v3 = vpop.eup %3700  ;;  %v1573_v37 = vmul.f32 %v3699_v1, %v1505_v54  ;;  %v1282_v42 = vpop.xlane.xlu0 %1281 }
 0x62a   : > { %v1572_v7 = vmul.f32 %v3701_v3, %v5938_v11  ;;  %v3734_v11 = vld [vmem:[%s3835_s14 + $0x70] sm:$0xff] }
 0x62b   : > { %v2307_v52 = vpop.xlane.xlu1 %2306 }
 0x62c   : > { %v2486_v22 = vpop.f32.mrf.mxu0  ;;  %v1285_v46 = vpop.xlane.xlu2 %1284  ;;  %3702 = vrcp.f32 %v2307_v52  ;;  %v1590_v50 = vpack.c.bf16 %v1573_v37, %v1572_v7 }
 0x62d   : > { %3302 = vmatmul.msk.bf16.gmra.mxu3 %vm627_vm1, %v1588_v58  ;;  %v2575_v12 = vpop.f32.mrf.mxu1  ;;  %3704 = vrcp.f32 %v2304_v24  ;;  %v5943_v24 = vld [vmem:[#allocation21_spill] sm:$0xff] }
 0x62e   : > { %v2576_v23 = vadd.f32 %v2575_v12, %v2486_v22  ;;  %3706 = vrcp.f32 %v1282_v42 }
 0x62f   : > { %3708 = vrcp.f32 %v1285_v46 }
 0x630   : > { %v2762_v15 = vpop.f32.mrf.mxu2  ;;  %v2913_v21 = vpop.f32.mrf.mxu3  ;;  %v2647_v55 = vmul.f32 %v3695_v48, %v2576_v23 }
 0x631   : > { %v2912_v57 = vadd.f32 %v2911_v31, %v2762_v15 }
 0x632   : > { %v2665_v35 = vpack.c.bf16 %v2647_v55, %v2646_v41  ;;  %v3703_v32 = vpop.eup %3702  ;;  %v5946_v55 = vld [vmem:[#allocation2_spill] sm:$0xff] }
 0x633   : > { %v2976_v27 = vadd.f32 %v3730_v25, %v2912_v57  ;;  %v3705_v40 = vpop.eup %3704 }
 0x634   : > { %v2489_v20 = vpop.f32.mrf.mxu0  ;;  %v1192_v38 = vpop.xlane.xlu2 %1191 }
 0x635   : > { %v3012_v33 = vadd.f32 %v5566_v59, %v2976_v27  ;;  %3278 = vmatmul.msk.bf16.gmra.mxu2 %vm627_vm1, %v2664_v47  ;;  %v2578_v61 = vpop.f32.mrf.mxu1  ;;  %v3707_v57 = vpop.eup %3706  ;;  %3710 = vrcp.f32 %v1192_v38  ;;  %v5939_v47 = vld [vmem:[#allocation11_spill] sm:$0xff] }
 0x636   : > { %v2579_v60 = vadd.f32 %v2578_v61, %v2489_v20  ;;  %v3709_v25 = vpop.eup %3708 }
 0x637   : > { %3044 = vst.msk [vmem:[%s5574_s29 + $0x50] sm:$0xff] %vm328_vm0, %v3012_v33  ;;  %v1574_v33 = vmul.f32 %v3707_v57, %v5941_v45  ;;  %v3738_v45 = vld [vmem:[%s3835_s14 + $0x90] sm:$0xff] }
 0x638   : > { %v2764_v43 = vpop.f32.mrf.mxu2  ;;  %v2648_v4 = vmul.f32 %v3705_v40, %v2579_v60 }
 0x639   : > { %v2914_v6 = vadd.f32 %v2913_v21, %v2764_v43  ;;  %v2916_v14 = vpop.f32.mrf.mxu3  ;;  %v1510_v21 = vadd.f32 %v5940_v2, %v5939_v47 }
 0x63b   : > { %v2977_v29 = vadd.f32 %v3731_v13, %v2914_v6  ;;  %v1575_v63 = vmul.f32 %v3709_v25, %v1510_v21  ;;  %v3711_v43 = vpop.eup %3710  ;;  %v1435_v6 = vadd.f32 %v5943_v24, %v5942_v49  ;;  %v5944_v13 = vld [vmem:[#allocation17_spill] sm:$0xff] }
 0x63c   : > { %v2491_v16 = vpop.f32.mrf.mxu0  ;;  %v2223_v26 = vpop.xlane.xlu2 %2222  ;;  %v3739_v24 = vld [vmem:[%s3835_s14 + $0x98] sm:$0xff] }
 0x63d   : > { %v3013_v30 = vadd.f32 %v5566_v59, %v2977_v29  ;;  %3303 = vmatmul.msk.bf16.gmra.mxu3 %vm627_vm1, %v1589_v17  ;;  %v2580_v53 = vpop.f32.mrf.mxu1  ;;  %v1591_v23 = vpack.c.bf16 %v1575_v63, %v1574_v33  ;;  %v1544_v29 = vmul.f32 %v3711_v43, %v5944_v13 }
 0x63e   : > { %v2581_v56 = vadd.f32 %v2580_v53, %v2491_v16 }
 0x63f   : > { %3045 = vst.msk [vmem:[%s5574_s29 + $0x58] sm:$0xff] %vm328_vm0, %v3013_v30 }
 0x640   : > { %v2767_v36 = vpop.f32.mrf.mxu2  ;;  %v2649_v15 = vmul.f32 %v3703_v32, %v2581_v56  ;;  %v3736_v32 = vld [vmem:[%s3835_s14 + $0x80] sm:$0xff] }
 0x641   : > { %v2917_v10 = vadd.f32 %v2916_v14, %v2767_v36  ;;  %v2918_v8 = vpop.f32.mrf.mxu3  ;;  %v5945_v14 = vld [vmem:[#allocation18_spill] sm:$0xff] }
 0x642   : > { %v2666_v22 = vpack.c.bf16 %v2649_v15, %v2648_v4  ;;  %v2511_v39 = vadd.f32 %v5946_v55, %v5945_v14 }
 0x643   : > { %v2978_v0 = vadd.f32 %v3732_v9, %v2917_v10  ;;  %v5947_v10 = vld [vmem:[#allocation23_spill] sm:$0xff] }
 0x645   : > { %v3014_v44 = vadd.f32 %v5566_v59, %v2978_v0  ;;  %3279 = vmatmul.msk.bf16.gmra.mxu2 %vm627_vm1, %v2665_v35 }
 0x647   : > { %3046 = vst.msk [vmem:[%s5574_s29 + $0x60] sm:$0xff] %vm328_vm0, %v3014_v44 }
 0x648   : > { %v2769_v51 = vpop.f32.mrf.mxu2 }
 0x649   : > { %v2919_v31 = vadd.f32 %v2918_v8, %v2769_v51 }
 0x64b   : > { %v2979_v58 = vadd.f32 %v3733_v5, %v2919_v31  ;;  %v2310_v28 = vpop.xlane.xlu1 %2309 }
 0x64d   : > { %v3015_v18 = vadd.f32 %v5566_v59, %v2979_v58  ;;  %3304 = vmatmul.msk.bf16.gmra.mxu3 %vm627_vm1, %v1590_v50  ;;  %v3735_v58 = vld [vmem:[%s3835_s14 + $0x78] sm:$0xff] }
 0x64f   : > { %3047 = vst.msk [vmem:[%s5574_s29 + $0x68] sm:$0xff] %vm328_vm0, %v3015_v18 }
 0x653   : > { %v2313_v12 = vpop.xlane.xlu0 %2312 }
 0x654   : > { %v1195_v27 = vpop.xlane.xlu1 %1194 }
 0x655   : > { %3712 = vrcp.f32 %v1195_v27  ;;  %3280 = vmatmul.msk.bf16.gmra.mxu2 %vm627_vm1, %v2666_v22 }
 0x656   : > { %3714 = vrcp.f32 %v2223_v26 }
 0x65b   : > { %v3713_v19 = vpop.eup %3712  ;;  %v2220_v62 = vpop.xlane.xlu0 %2219 }
 0x65c   : > { %v1545_v17 = vmul.f32 %v3713_v19, %v1435_v6  ;;  %3716 = vrcp.f32 %v2220_v62  ;;  %v2494_v34 = vpop.f32.mrf.mxu0  ;;  %v3715_v30 = vpop.eup %3714 }
 0x65d   : > { %v2583_v20 = vpop.f32.mrf.mxu1  ;;  %3305 = vmatmul.msk.bf16.gmra.mxu3 %vm627_vm1, %v1591_v23  ;;  %3718 = vrcp.f32 %v2310_v28  ;;  %v2621_v41 = vmul.f32 %v3715_v30, %v2511_v39 }
 0x65e   : > { %v1576_v61 = vpack.c.bf16 %v1545_v17, %v1544_v29  ;;  %3720 = vrcp.f32 %v2313_v12  ;;  %v2584_v52 = vadd.f32 %v2583_v20, %v2494_v34  ;;  %v3737_v12 = vld [vmem:[%s3835_s14 + $0x88] sm:$0xff]  ;;  %v3740_v29 = vld [vmem:[%s3835_s14 + $0xa0] sm:$0xff] }
 0x660   : > { %3290 = vmatmul.msk.bf16.vlgmr.msrb.gmra.mxu1 %vm627_vm1, %v1576_v61  ;;  %v2921_v48 = vpop.f32.mrf.mxu3 }
 0x662   : > { %v3717_v36 = vpop.eup %3716 }
 0x663   : > { %v2620_v46 = vmul.f32 %v3717_v36, %v5947_v10  ;;  %v3719_v1 = vpop.eup %3718  ;;  %v3742_v10 = vld [vmem:[%s3835_s14 + $0xb0] sm:$0xff] }
 0x664   : > { %v2496_v35 = vpop.f32.mrf.mxu0  ;;  %v3721_v44 = vpop.eup %3720  ;;  %v2650_v3 = vmul.f32 %v3719_v1, %v2584_v52  ;;  %v3743_v1 = vld [vmem:[%s3835_s14 + $0xb8] sm:$0xff] }
 0x665   : > { %v2652_v9 = vpack.c.bf16 %v2621_v41, %v2620_v46  ;;  %v2585_v0 = vpop.f32.mrf.mxu1 }
 0x666   : > { %v2586_v54 = vadd.f32 %v2585_v0, %v2496_v35 }
 0x667   : > { %3266 = vmatmul.msk.bf16.vlgmr.msrb.gmra.mxu0 %vm627_vm1, %v2652_v9 }
 0x668   : > { %v2651_v37 = vmul.f32 %v3721_v44, %v2586_v54  ;;  %v2772_v16 = vpop.f32.mrf.mxu2  ;;  %v2923_v53 = vpop.f32.mrf.mxu3 }
 0x669   : > { %v2922_v8 = vadd.f32 %v2921_v48, %v2772_v16  ;;  %v3741_v48 = vld [vmem:[%s3835_s14 + $0xa8] sm:$0xff] }
 0x66a   : > { %v2667_v51 = vpack.c.bf16 %v2651_v37, %v2650_v3 }
 0x66b   : > { %v2980_v7 = vadd.f32 %v3734_v11, %v2922_v8 }
 0x66c   : > { %3281 = vmatmul.msk.bf16.gmra.mxu2 %vm627_vm1, %v2667_v51 }
 0x66d   : > { %v3016_v31 = vadd.f32 %v5566_v59, %v2980_v7 }
 0x66f   : > { %3048 = vst.msk [vmem:[%s5574_s29 + $0x70] sm:$0xff] %vm328_vm0, %v3016_v31 }
 0x670   : > { %v2774_v42 = vpop.f32.mrf.mxu2  ;;  %v2926_v56 = vpop.f32.mrf.mxu3 }
 0x671   : > { %v2924_v5 = vadd.f32 %v2923_v53, %v2774_v42  ;;  %v3744_v53 = vld [vmem:[%s3835_s14 + $0xc0] sm:$0xff]  ;;  %v3745_v42 = vld [vmem:[%s3835_s14 + $0xc8] sm:$0xff] }
 0x673   : > { %v2981_v28 = vadd.f32 %v3735_v58, %v2924_v5 }
 0x675   : > { %v3017_v50 = vadd.f32 %v5566_v59, %v2981_v28 }
 0x677   : > { %3049 = vst.msk [vmem:[%s5574_s29 + $0x78] sm:$0xff] %vm328_vm0, %v3017_v50  ;;  %v3746_v50 = vld [vmem:[%s3835_s14 + $0xd0] sm:$0xff] }
 0x678   : > { %v2777_v38 = vpop.f32.mrf.mxu2  ;;  %v2928_v60 = vpop.f32.mrf.mxu3 }
 0x679   : > { %v2927_v18 = vadd.f32 %v2926_v56, %v2777_v38 }
 0x67b   : > { %v2982_v15 = vadd.f32 %v3736_v32, %v2927_v18 }
 0x67d   : > { %v3018_v40 = vadd.f32 %v5566_v59, %v2982_v15 }
 0x67f   : > { %3050 = vst.msk [vmem:[%s5574_s29 + $0x80] sm:$0xff] %vm328_vm0, %v3018_v40  ;;  %v3747_v40 = vld [vmem:[%s3835_s14 + $0xd8] sm:$0xff] }
 0x680   : > { %v2779_v4 = vpop.f32.mrf.mxu2  ;;  %v2931_v57 = vpop.f32.mrf.mxu3 }
 0x681   : > { %v2929_v22 = vadd.f32 %v2928_v60, %v2779_v4 }
 0x683   : > { %v2983_v25 = vadd.f32 %v3737_v12, %v2929_v22 }
 0x685   : > { %v3019_v27 = vadd.f32 %v5566_v59, %v2983_v25 }
 0x687   : > { %3051 = vst.msk [vmem:[%s5574_s29 + $0x88] sm:$0xff] %vm328_vm0, %v3019_v27  ;;  %v3748_v27 = vld [vmem:[%s3835_s14 + $0xe0] sm:$0xff] }
 0x688   : > { %v2782_v47 = vpop.f32.mrf.mxu2  ;;  %v2933_v2 = vpop.f32.mrf.mxu3 }
 0x689   : > { %v2932_v21 = vadd.f32 %v2931_v57, %v2782_v47 }
 0x68b   : > { %v2984_v33 = vadd.f32 %v3738_v45, %v2932_v21 }
 0x68d   : > { %v3020_v63 = vadd.f32 %v5566_v59, %v2984_v33 }
 0x68f   : > { %3052 = vst.msk [vmem:[%s5574_s29 + $0x90] sm:$0xff] %vm328_vm0, %v3020_v63 }
 0x690   : > { %v2784_v26 = vpop.f32.mrf.mxu2  ;;  %v2936_v43 = vpop.f32.mrf.mxu3 }
 0x691   : > { %v2934_v49 = vadd.f32 %v2933_v2, %v2784_v26  ;;  %v3749_v26 = vld [vmem:[%s3835_s14 + $0xe8] sm:$0xff] }
 0x693   : > { %v2985_v6 = vadd.f32 %v3739_v24, %v2934_v49 }
 0x695   : > { %v3021_v19 = vadd.f32 %v5566_v59, %v2985_v6 }
 0x697   : > { %3053 = vst.msk [vmem:[%s5574_s29 + $0x98] sm:$0xff] %vm328_vm0, %v3021_v19  ;;  %v3750_v19 = vld [vmem:[%s3835_s14] sm:$0xff] }
 0x698   : > { %v2787_v62 = vpop.f32.mrf.mxu2  ;;  %v2938_v23 = vpop.f32.mrf.mxu3 }
 0x699   : > { %v2937_v13 = vadd.f32 %v2936_v43, %v2787_v62 }
 0x69b   : > { %v2986_v17 = vadd.f32 %v3740_v29, %v2937_v13 }
 0x69d   : > { %v3022_v34 = vadd.f32 %v5566_v59, %v2986_v17 }
 0x69f   : > { %3054 = vst.msk [vmem:[%s5574_s29 + $0xa0] sm:$0xff] %vm328_vm0, %v3022_v34 }
 0x6a0   : > { %v2789_v20 = vpop.f32.mrf.mxu2  ;;  %v2941_v61 = vpop.f32.mrf.mxu3 }
 0x6a1   : > { %v2939_v30 = vadd.f32 %v2938_v23, %v2789_v20  ;;  %v3751_v20 = vld [vmem:[%s3835_s14 + $0x8] sm:$0xff] }
 0x6a3   : > { %v2987_v14 = vadd.f32 %v3741_v48, %v2939_v30 }
 0x6a5   : > { %v3023_v55 = vadd.f32 %v5566_v59, %v2987_v14 }
 0x6a7   : > { %3055 = vst.msk [vmem:[%s5574_s29 + $0xa8] sm:$0xff] %vm328_vm0, %v3023_v55  ;;  %v3752_v55 = vld [vmem:[%s3835_s14 + $0xf0] sm:$0xff] }
 0x6a8   : > { %v2792_v39 = vpop.f32.mrf.mxu2  ;;  %v2943_v36 = vpop.f32.mrf.mxu3 }
 0x6a9   : > { %v2942_v41 = vadd.f32 %v2941_v61, %v2792_v39 }
 0x6ab   : > { %v2988_v46 = vadd.f32 %v3742_v10, %v2942_v41 }
 0x6ad   : > { %v3024_v52 = vadd.f32 %v5566_v59, %v2988_v46 }
 0x6af   : > { %3056 = vst.msk [vmem:[%s5574_s29 + $0xb0] sm:$0xff] %vm328_vm0, %v3024_v52  ;;  %v3753_v52 = vld [vmem:[%s3835_s14 + $0xf8] sm:$0xff] }
 0x6b0   : > { %v2794_v35 = vpop.f32.mrf.mxu2  ;;  %v2946_v9 = vpop.f32.mrf.mxu3 }
 0x6b1   : > { %v2944_v0 = vadd.f32 %v2943_v36, %v2794_v35 }
 0x6b3   : > { %v2989_v54 = vadd.f32 %v3743_v1, %v2944_v0 }
 0x6b5   : > { %v3025_v44 = vadd.f32 %v5566_v59, %v2989_v54 }
 0x6b7   : > { %3057 = vst.msk [vmem:[%s5574_s29 + $0xb8] sm:$0xff] %vm328_vm0, %v3025_v44 }
 0x6b8   : > { %v2797_v3 = vpop.f32.mrf.mxu2  ;;  %v2948_v37 = vpop.f32.mrf.mxu3 }
 0x6b9   : > { %v2947_v16 = vadd.f32 %v2946_v9, %v2797_v3 }
 0x6bb   : > { %v2990_v8 = vadd.f32 %v3744_v53, %v2947_v16 }
 0x6bd   : > { %v3026_v51 = vadd.f32 %v5566_v59, %v2990_v8 }
 0x6bf   : > { %3058 = vst.msk [vmem:[%s5574_s29 + $0xc0] sm:$0xff] %vm328_vm0, %v3026_v51 }
 0x6c0   : > { %v2799_v11 = vpop.f32.mrf.mxu2  ;;  %v2951_v31 = vpop.f32.mrf.mxu3 }
 0x6c1   : > { %v2949_v7 = vadd.f32 %v2948_v37, %v2799_v11 }
 0x6c3   : > { %v2991_v56 = vadd.f32 %v3745_v42, %v2949_v7 }
 0x6c5   : > { %v3027_v5 = vadd.f32 %v5566_v59, %v2991_v56 }
 0x6c7   : > { %3059 = vst.msk [vmem:[%s5574_s29 + $0xc8] sm:$0xff] %vm328_vm0, %v3027_v5 }
 0x6c8   : > { %v2802_v58 = vpop.f32.mrf.mxu2  ;;  %v2953_v60 = vpop.f32.mrf.mxu3 }
 0x6c9   : > { %v2952_v28 = vadd.f32 %v2951_v31, %v2802_v58 }
 0x6cb   : > { %v2992_v38 = vadd.f32 %v3746_v50, %v2952_v28 }
 0x6cd   : > { %v3028_v18 = vadd.f32 %v5566_v59, %v2992_v38 }
 0x6cf   : > { %3060 = vst.msk [vmem:[%s5574_s29 + $0xd0] sm:$0xff] %vm328_vm0, %v3028_v18 }
 0x6d0   : > { %v2804_v32 = vpop.f32.mrf.mxu2  ;;  %v2956_v22 = vpop.f32.mrf.mxu3 }
 0x6d1   : > { %v2954_v15 = vadd.f32 %v2953_v60, %v2804_v32 }
 0x6d3   : > { %v2993_v4 = vadd.f32 %v3747_v40, %v2954_v15 }
 0x6d5   : > { %v3029_v57 = vadd.f32 %v5566_v59, %v2993_v4 }
 0x6d7   : > { %3061 = vst.msk [vmem:[%s5574_s29 + $0xd8] sm:$0xff] %vm328_vm0, %v3029_v57 }
 0x6d8   : > { %v2807_v12 = vpop.f32.mrf.mxu2  ;;  %v2958_v21 = vpop.f32.mrf.mxu3 }
 0x6d9   : > { %v2957_v25 = vadd.f32 %v2956_v22, %v2807_v12 }
 0x6db   : > { %v2994_v47 = vadd.f32 %v3748_v27, %v2957_v25 }
 0x6dd   : > { %v3030_v2 = vadd.f32 %v5566_v59, %v2994_v47  ;;  %v2886_v63 = vpop.f32.mrf.mxu1 }
 0x6df   : > { %3062 = vst.msk [vmem:[%s5574_s29 + $0xe0] sm:$0xff] %vm328_vm0, %v3030_v2 }
 0x6e0   : > { %v2809_v45 = vpop.f32.mrf.mxu2  ;;  %v2961_v17 = vpop.f32.mrf.mxu3 }
 0x6e1   : > { %v2959_v33 = vadd.f32 %v2958_v21, %v2809_v45 }
 0x6e3   : > { %v2995_v43 = vadd.f32 %v3749_v26, %v2959_v33 }
 0x6e4   : > { %v2737_v49 = vpop.f32.mrf.mxu0 }
 0x6e5   : > { %v3031_v24 = vadd.f32 %v5566_v59, %v2995_v43  ;;  %v2887_v6 = vadd.f32 %v2886_v63, %v2737_v49  ;;  %v2888_v13 = vpop.f32.mrf.mxu1 }
 0x6e7   : > { %3063 = vst.msk [vmem:[%s5574_s29 + $0xe8] sm:$0xff] %vm328_vm0, %v3031_v24  ;;  %v2966_v62 = vadd.f32 %v3750_v19, %v2887_v6 }
 0x6e8   : > { %v2963_v41 = vpop.f32.mrf.mxu3 }
 0x6e9   : > { %v3002_v23 = vadd.f32 %v5566_v59, %v2966_v62 }
 0x6eb   : > { %3034 = vst.msk [vmem:[%s5574_s29] sm:$0xff] %vm328_vm0, %v3002_v23 }
 0x6ec   : > { %v2739_v29 = vpop.f32.mrf.mxu0 }
 0x6ed   : > { %v2889_v34 = vadd.f32 %v2888_v13, %v2739_v29 }
 0x6ef   : > { %v2967_v61 = vadd.f32 %v3751_v20, %v2889_v34  ;;  %v2812_v30 = vpop.f32.mrf.mxu2 }
 0x6f0   : > { %v2962_v48 = vadd.f32 %v2961_v17, %v2812_v30 }
 0x6f1   : > { %v3003_v14 = vadd.f32 %v5566_v59, %v2967_v61 }
 0x6f2   : > { %v2996_v39 = vadd.f32 %v3752_v55, %v2962_v48 }
 0x6f3   : > { %3035 = vst.msk [vmem:[%s5574_s29 + $0x8] sm:$0xff] %vm328_vm0, %v3003_v14 }
 0x6f4   : > { %v3032_v36 = vadd.f32 %v5566_v59, %v2996_v39 }
 0x6f6   : > { %3064 = vst.msk [vmem:[%s5574_s29 + $0xf0] sm:$0xff] %vm328_vm0, %v3032_v36 }
 0x6f7   : > { %v2814_v10 = vpop.f32.mrf.mxu2 }
 0x6f8   : > { %v2964_v46 = vadd.f32 %v2963_v41, %v2814_v10 }
 0x6fa   : > { %v2997_v35 = vadd.f32 %v3753_v52, %v2964_v46 }
 0x6fc   : > { %v3033_v9 = vadd.f32 %v5566_v59, %v2997_v35 }
 0x6fe   : > { %3065 = vst.msk [vmem:[%s5574_s29 + $0xf8] sm:$0xff] %vm328_vm0, %v3033_v9 }
 0x6ff PF: > { %s15_s18 = sadd.s32 1, %s3760_s18  }
 0x700   : > { %p12_p4 = scmp.ge.s32.totalorder %s15_s18, 4  }
 0x702   :  { %14 = sbr.rel (!%p12_p4) target bundleno = 1 (0x1), region = 70 }

</bundles_post_ra>
